<compile_context>
chip_gen: v6e
topology: v6e:2x2x1
jax: 0.10.0
libtpu: 0.0.40
codegen_flags: <defaults>
</compile_context>

<pallas_src>
import functools
import math

import jax
import jax.numpy as jnp
from jax.experimental import pallas as pl
from jax.experimental.pallas import tpu as pltpu

_BF16 = jnp.bfloat16
_INV_SQRT2 = 0.7071067811865476
_LN_EPS = 1e-5  # torch nn.LayerNorm default


# --------------------------------------------------------------------- in-kernel helpers

def _ln(x, g, b):
    """LayerNorm over last dim in f32 (biased variance, torch eps). g, b: (1, D)."""
    m = jnp.mean(x, axis=-1, keepdims=True)
    v = jnp.mean(jnp.square(x - m), axis=-1, keepdims=True)
    return (x - m) * jax.lax.rsqrt(v + _LN_EPS) * g + b


def _bdot(a_bf16, w_bf16):
    """bf16 x bf16 matmul on the MXU, f32 accumulation."""
    return jnp.dot(a_bf16, w_bf16, preferred_element_type=jnp.float32)


def _gelu(x):
    # exact (erf-based) GELU, matching torch nn.GELU default
    return 0.5 * x * (1.0 + jax.lax.erf(x * _INV_SQRT2))


def _softmax_rows(s):
    """Row softmax in f32; normalization via approx reciprocal on the EUP."""
    s = s - jnp.max(s, axis=-1, keepdims=True)
    p = jnp.exp(s)
    return p * pl.reciprocal(jnp.sum(p, axis=-1, keepdims=True), approx=True)


def _attend_head(qh, kh, vh, scale):
    """softmax(qh kh^T * scale) vh for one head. qh/kh/vh are bf16, result f32."""
    s = jax.lax.dot_general(qh, kh, (((1,), (1,)), ((), ())),
                            preferred_element_type=jnp.float32) * scale
    p = _softmax_rows(s)
    return _bdot(p.astype(_BF16), vh)


def _mha(x_q, kv, wp, bp, heads, qkv_stride, k_off):
    """Shared multi-head attention body.

    x_q: (M, W) query projections; kv: (S, heads*qkv_stride*dh-ish) packed per-head k/v (torch
    .view(.., heads, -1) layout); wp: (W, W) bf16 out-proj. Returns attn output + bias, f32.
    """
    d_model = wp.shape[-1]
    dh = d_model // heads
    scale = 1.0 / math.sqrt(dh)
    attn = jnp.zeros((x_q.shape[0], d_model), jnp.float32)
    for h in range(heads):
        qh = x_q[:, h * dh:(h + 1) * dh].astype(_BF16)
        base = qkv_stride * dh * h + k_off * dh
        kh = kv[:, base:base + dh].astype(_BF16)
        vh = kv[:, base + dh:base + 2 * dh].astype(_BF16)
        oh = _attend_head(qh, kh, vh, scale)          # (M, dh) f32
        attn = attn + _bdot(oh.astype(_BF16), wp[h * dh:(h + 1) * dh, :])
    return attn + bp


# --------------------------------------------------------------------------- kernels

def _fused_cross_kernel(pcf_ref, ang_ref,
                        query_ref, wpf_ref, wsin_ref, wcos_ref, bin_ref,
                        l1g_ref, l1b_ref, l2g_ref, l2b_ref,
                        wq_ref, bq_ref, wkv_ref, bkv_ref, wp_ref, bp_ref,
                        l3g_ref, l3b_ref, w1_ref, b1_ref, w2_ref, b2_ref,
                        o_ref, *, heads):
    """FourierEmbedder + input_proj + ResidualCrossAttentionBlock, fully fused in VMEM."""
    # --- Fourier embedding + input projection (split matmul replaces the concat) ---
    pcf = pcf_ref[0].astype(_BF16)                 # (N, 3[+C])
    ang = ang_ref[0]                               # (N, 3*F)  f32 phases
    data = _bdot(pcf, wpf_ref[...])
    data = data + _bdot(jnp.sin(ang).astype(_BF16), wsin_ref[...])
    data = data + _bdot(jnp.cos(ang).astype(_BF16), wcos_ref[...])
    data = data + bin_ref[...]                     # (N, W) f32

    # --- residual cross-attention block ---
    x = query_ref[...]                             # (M, W) f32 learned query (shared over batch)
    q = _bdot(_ln(x, l1g_ref[...], l1b_ref[...]).astype(_BF16), wq_ref[...]) + bq_ref[...]
    kv = _bdot(_ln(data, l2g_ref[...], l2b_ref[...]).astype(_BF16), wkv_ref[...]) + bkv_ref[...]
    x = x + _mha(q, kv, wp_ref[...], bp_ref[...], heads, qkv_stride=2, k_off=0)

    h1 = _bdot(_ln(x, l3g_ref[...], l3b_ref[...]).astype(_BF16), w1_ref[...]) + b1_ref[...]
    y = _bdot(_gelu(h1).astype(_BF16), w2_ref[...]) + b2_ref[...]
    o_ref[0] = x + y


def _self_stack_kernel(x_ref,
                       l1g_ref, l1b_ref, wqkv_ref, bqkv_ref, wp_ref, bp_ref,
                       l2g_ref, l2b_ref, w1_ref, b1_ref, w2_ref, b2_ref,
                       o_ref, acc_ref, *, heads):
    """All ResidualAttentionBlocks over grid axis 1 (layers); residual stream in VMEM scratch."""
    l = pl.program_id(1)

    @pl.when(l == 0)
    def _():
        acc_ref[...] = x_ref[0]

    x = acc_ref[...]                               # (M, W) f32 residual stream
    qkv = _bdot(_ln(x, l1g_ref[0], l1b_ref[0]).astype(_BF16), wqkv_ref[0]) + bqkv_ref[0]
    x = x + _mha(qkv, qkv, wp_ref[0], bp_ref[0], heads, qkv_stride=3, k_off=1)

    h1 = _bdot(_ln(x, l2g_ref[0], l2b_ref[0]).astype(_BF16), w1_ref[0]) + b1_ref[0]
    y = _bdot(_gelu(h1).astype(_BF16), w2_ref[0]) + b2_ref[0]
    acc_ref[...] = x + y

    @pl.when(l == pl.num_programs(1) - 1)
    def _():
        o_ref[0] = acc_ref[...]


# --------------------------------------------------------------------------- wrappers

def _batch_spec(s, d):
    return pl.BlockSpec((1, s, d), lambda b: (b, 0, 0))


def _rep_spec(a):
    # weight / bias replicated across the batch grid (stays resident in VMEM)
    return pl.BlockSpec(a.shape, lambda b: (0,) * a.ndim)


def fused_cross(params, pc, feats, heads):
    """Fused Fourier embedding + input projection + cross-attention block.

    pc: [B, N, 3], feats: [B, N, C] or None -> latents [B, M, W].
    """
    cp = params['cross_attn']
    a = cp['attn']
    freqs = params['frequencies']
    B, N, _ = pc.shape
    F = freqs.shape[0]
    w_in = params['input_proj_w']
    W = w_in.shape[1]
    M = params['query'].shape[0]

    # f32 phases pc[...,None]*freqs (tiny, kept in JAX; see TODO(synk) at top)
    ang = (pc[..., None] * freqs).reshape(B, N, 3 * F)
    # split the projection weight by the concat layout [pc(3), sin(3F), cos(3F), feats(C)]
    w_sin = w_in[3:3 + 3 * F]
    w_cos = w_in[3 + 3 * F:3 + 6 * F]
    if feats is None:
        pcf = pc
        w_pf = w_in[:3]
    else:
        pcf = jnp.concatenate([pc, feats], axis=-1)
        w_pf = jnp.concatenate([w_in[:3], w_in[3 + 6 * F:]], axis=0)
    C2 = pcf.shape[-1]

    args = (
        pcf, ang,
        params['query'],
        w_pf.astype(_BF16), w_sin.astype(_BF16), w_cos.astype(_BF16),
        params['input_proj_b'].reshape(1, W),
        cp['ln1_g'].reshape(1, W), cp['ln1_b'].reshape(1, W),
        cp['ln2_g'].reshape(1, W), cp['ln2_b'].reshape(1, W),
        a['c_q_w'].astype(_BF16), a['c_q_b'].reshape(1, W),
        a['c_kv_w'].astype(_BF16), a['c_kv_b'].reshape(1, 2 * W),
        a['c_proj_w'].astype(_BF16), a['c_proj_b'].reshape(1, W),
        cp['ln3_g'].reshape(1, W), cp['ln3_b'].reshape(1, W),
        cp['mlp_w1'].astype(_BF16), cp['mlp_b1'].reshape(1, 4 * W),
        cp['mlp_w2'].astype(_BF16), cp['mlp_b2'].reshape(1, W),
    )
    in_specs = [_batch_spec(N, C2), _batch_spec(N, 3 * F)] + [_rep_spec(t) for t in args[2:]]
    return pl.pallas_call(
        functools.partial(_fused_cross_kernel, heads=heads),
        out_shape=jax.ShapeDtypeStruct((B, M, W), jnp.float32),
        grid=(B,),
        in_specs=in_specs,
        out_specs=_batch_spec(M, W),
        compiler_params=pltpu.CompilerParams(dimension_semantics=("parallel",)),
    )(*args)


def self_stack(x, layer_params, heads):
    """All self-attention layers in one pallas_call; weights stacked over a leading L axis."""
    L = len(layer_params)
    if L == 0:
        return x
    B, M, W = x.shape

    def stack(fn):
        return jnp.stack([fn(p) for p in layer_params], axis=0)

    args = (
        x,
        stack(lambda p: p['ln1_g'].reshape(1, W)),
        stack(lambda p: p['ln1_b'].reshape(1, W)),
        stack(lambda p: p['attn']['c_qkv_w'].astype(_BF16)),
        stack(lambda p: p['attn']['c_qkv_b'].reshape(1, 3 * W)),
        stack(lambda p: p['attn']['c_proj_w'].astype(_BF16)),
        stack(lambda p: p['attn']['c_proj_b'].reshape(1, W)),
        stack(lambda p: p['ln2_g'].reshape(1, W)),
        stack(lambda p: p['ln2_b'].reshape(1, W)),
        stack(lambda p: p['mlp_w1'].astype(_BF16)),
        stack(lambda p: p['mlp_b1'].reshape(1, 4 * W)),
        stack(lambda p: p['mlp_w2'].astype(_BF16)),
        stack(lambda p: p['mlp_b2'].reshape(1, W)),
    )

    def layer_spec(a):
        # pick the current layer's slice; stays resident while the batch block is processed
        return pl.BlockSpec((1,) + a.shape[1:], lambda b, l: (l, 0, 0))

    in_specs = [pl.BlockSpec((1, M, W), lambda b, l: (b, 0, 0))] + \
               [layer_spec(t) for t in args[1:]]
    return pl.pallas_call(
        functools.partial(_self_stack_kernel, heads=heads),
        out_shape=jax.ShapeDtypeStruct((B, M, W), jnp.float32),
        grid=(B, L),
        in_specs=in_specs,
        out_specs=pl.BlockSpec((1, M, W), lambda b, l: (b, 0, 0)),
        scratch_shapes=[pltpu.VMEM((M, W), jnp.float32)],
        compiler_params=pltpu.CompilerParams(
            dimension_semantics=("parallel", "arbitrary")),
    )(*args)


def cross_attention_encoder_forward(params, pc, feats, heads):
    """pc: [B, N, 3], feats: [B, N, C] or None -> (latents [B, M, W], pc)."""
    x = fused_cross(params, pc, feats, heads)
    x = self_stack(x, params['self_layers'], heads)
    # use_ln_post defaults to False -> ln_post is None
    return x, pc


# ------------------------------------------------------ pure-JAX reference (same bf16 policy)

def _ref_dot(a, w):
    return jnp.dot(a.astype(_BF16), w.astype(_BF16), preferred_element_type=jnp.float32)


def _ref_ln(x, g, b):
    m = x.mean(-1, keepdims=True)
    v = jnp.square(x - m).mean(-1, keepdims=True)
    return (x - m) * jax.lax.rsqrt(v + _LN_EPS) * g + b


def _ref_mlp(x, w1, b1, w2, b2):
    h = _ref_dot(x, w1) + b1
    h = 0.5 * h * (1.0 + jax.lax.erf(h * _INV_SQRT2))
    return _ref_dot(h, w2) + b2


def _ref_heads_attn(q, k, v):
    dh = q.shape[-1]
    s = jnp.einsum('bthd,bshd->bhts', q.astype(_BF16), k.astype(_BF16),
                   preferred_element_type=jnp.float32) / math.sqrt(dh)
    p = jax.nn.softmax(s, axis=-1)
    o = jnp.einsum('bhts,bshd->bthd', p.astype(_BF16), v.astype(_BF16),
                   preferred_element_type=jnp.float32)
    return o.reshape(o.shape[0], o.shape[1], -1)


def _ref_mha_self(x, p, heads):
    B, T, W = x.shape
    dh = W // heads
    qkv = (_ref_dot(x, p['c_qkv_w']) + p['c_qkv_b']).reshape(B, T, heads, 3 * dh)
    q, k, v = qkv[..., :dh], qkv[..., dh:2 * dh], qkv[..., 2 * dh:]
    return _ref_dot(_ref_heads_attn(q, k, v), p['c_proj_w']) + p['c_proj_b']


def _ref_mha_cross(x, data, p, heads):
    B, T, W = x.shape
    S = data.shape[1]
    dh = W // heads
    q = (_ref_dot(x, p['c_q_w']) + p['c_q_b']).reshape(B, T, heads, dh)
    kv = (_ref_dot(data, p['c_kv_w']) + p['c_kv_b']).reshape(B, S, heads, 2 * dh)
    k, v = kv[..., :dh], kv[..., dh:]
    return _ref_dot(_ref_heads_attn(q, k, v), p['c_proj_w']) + p['c_proj_b']


def reference_forward(params, pc, feats, heads):
    freqs = params['frequencies']
    B, N, _ = pc.shape
    embed = (pc[..., None] * freqs).reshape(B, N, -1)
    data = jnp.concatenate([pc, jnp.sin(embed), jnp.cos(embed)], axis=-1)
    if feats is not None:
        data = jnp.concatenate([data, feats], axis=-1)
    data = _ref_dot(data, params['input_proj_w']) + params['input_proj_b']
    M, W = params['query'].shape
    x = jnp.broadcast_to(params['query'][None], (B, M, W))
    p = params['cross_attn']
    x = x + _ref_mha_cross(_ref_ln(x, p['ln1_g'], p['ln1_b']),
                           _ref_ln(data, p['ln2_g'], p['ln2_b']), p['attn'], heads)
    x = x + _ref_mlp(_ref_ln(x, p['ln3_g'], p['ln3_b']),
                     p['mlp_w1'], p['mlp_b1'], p['mlp_w2'], p['mlp_b2'])
    for lp in params['self_layers']:
        x = x + _ref_mha_self(_ref_ln(x, lp['ln1_g'], lp['ln1_b']), lp['attn'], heads)
        x = x + _ref_mlp(_ref_ln(x, lp['ln2_g'], lp['ln2_b']),
                         lp['mlp_w1'], lp['mlp_b1'], lp['mlp_w2'], lp['mlp_b2'])
    return x, pc


# ------------------------------------------------------------------------------ param init

def init_params(key, *, num_latents, width, heads, layers, point_feats, num_freqs):
    del heads
    keys = iter(jax.random.split(key, 512))

    def w(shape, scale=0.02):
        return jax.random.normal(next(keys), shape, dtype=jnp.float32) * scale

    def lin(din, dout):
        return w((din, dout)), w((dout,))

    def ln(d):
        return jnp.ones((d,), jnp.float32), jnp.zeros((d,), jnp.float32)

    fourier_out = 3 * (num_freqs * 2 + 1)                      # include_input=True
    din = fourier_out + point_feats

    params = {
        'frequencies': (2.0 ** jnp.arange(num_freqs, dtype=jnp.float32)) * jnp.pi,
        'query': w((num_latents, width)),
    }
    params['input_proj_w'], params['input_proj_b'] = lin(din, width)

    # ResidualCrossAttentionBlock
    cq_w, cq_b = lin(width, width)
    ckv_w, ckv_b = lin(width, 2 * width)
    cpr_w, cpr_b = lin(width, width)
    l1g, l1b = ln(width); l2g, l2b = ln(width); l3g, l3b = ln(width)
    m1w, m1b = lin(width, 4 * width); m2w, m2b = lin(4 * width, width)
    params['cross_attn'] = dict(
        ln1_g=l1g, ln1_b=l1b, ln2_g=l2g, ln2_b=l2b, ln3_g=l3g, ln3_b=l3b,
        attn=dict(c_q_w=cq_w, c_q_b=cq_b, c_kv_w=ckv_w, c_kv_b=ckv_b,
                  c_proj_w=cpr_w, c_proj_b=cpr_b),
        mlp_w1=m1w, mlp_b1=m1b, mlp_w2=m2w, mlp_b2=m2b)

    # Transformer (self-attention) layers
    self_layers = []
    for _ in range(layers):
        qkv_w, qkv_b = lin(width, 3 * width)
        pr_w, pr_b = lin(width, width)
        g1, b1 = ln(width); g2, b2 = ln(width)
        w1, bb1 = lin(width, 4 * width); w2, bb2 = lin(4 * width, width)
        self_layers.append(dict(
            ln1_g=g1, ln1_b=b1, ln2_g=g2, ln2_b=b2,
            attn=dict(c_qkv_w=qkv_w, c_qkv_b=qkv_b, c_proj_w=pr_w, c_proj_b=pr_b),
            mlp_w1=w1, mlp_b1=bb1, mlp_w2=w2, mlp_b2=bb2))
    params['self_layers'] = self_layers
    return params


# ------------------------------------------------------------------------------------ main

if __name__ == "__main__":
    B, N = 2, 16
    point_feats = 4
    num_latents = 8
    width = 32
    heads = 4
    layers = 2
    num_freqs = 6

    key = jax.random.PRNGKey(0)
    k_param, k_pc, k_feat = jax.random.split(key, 3)

    params = init_params(k_param, num_latents=num_latents, width=width, heads=heads,
                         layers=layers, point_feats=point_feats, num_freqs=num_freqs)
    pc = jax.random.normal(k_pc, (B, N, 3), dtype=jnp.float32)
    feats = jax.random.normal(k_feat, (B, N, point_feats), dtype=jnp.float32)

    fwd = jax.jit(functools.partial(cross_attention_encoder_forward, heads=heads))
    latents, pc_out = fwd(params, pc, feats)
    latents = jax.block_until_ready(latents)

    # pure-JAX reference of the same math / same bf16-matmul policy
    latents_ref, _ = reference_forward(params, pc, feats, heads)
    latents_ref = jax.block_until_ready(latents_ref)

    assert latents.shape == (B, num_latents, width)
    assert pc_out.shape == (B, N, 3)
    err = float(jnp.max(jnp.abs(latents - latents_ref)))
    assert err < 1e-2, f"Pallas output mismatch vs reference: max abs err = {err}"

    print("KERNEL_OK")
</pallas_src>

<mosaic_0001>
module attributes {stable_mosaic.version = 11 : i64} {
  func.func @_fused_cross_kernel(%arg0: i32, %arg1: memref<1x16x7xf32, #tpu.memory_space<vmem>>, %arg2: memref<1x16x18xf32, #tpu.memory_space<vmem>>, %arg3: memref<8x32xf32, #tpu.memory_space<vmem>>, %arg4: memref<7x32xbf16, #tpu.memory_space<vmem>>, %arg5: memref<18x32xbf16, #tpu.memory_space<vmem>>, %arg6: memref<18x32xbf16, #tpu.memory_space<vmem>>, %arg7: memref<1x32xf32, #tpu.memory_space<vmem>>, %arg8: memref<1x32xf32, #tpu.memory_space<vmem>>, %arg9: memref<1x32xf32, #tpu.memory_space<vmem>>, %arg10: memref<1x32xf32, #tpu.memory_space<vmem>>, %arg11: memref<1x32xf32, #tpu.memory_space<vmem>>, %arg12: memref<32x32xbf16, #tpu.memory_space<vmem>>, %arg13: memref<1x32xf32, #tpu.memory_space<vmem>>, %arg14: memref<32x64xbf16, #tpu.memory_space<vmem>>, %arg15: memref<1x64xf32, #tpu.memory_space<vmem>>, %arg16: memref<32x32xbf16, #tpu.memory_space<vmem>>, %arg17: memref<1x32xf32, #tpu.memory_space<vmem>>, %arg18: memref<1x32xf32, #tpu.memory_space<vmem>>, %arg19: memref<1x32xf32, #tpu.memory_space<vmem>>, %arg20: memref<32x128xbf16, #tpu.memory_space<vmem>>, %arg21: memref<1x128xf32, #tpu.memory_space<vmem>>, %arg22: memref<128x32xbf16, #tpu.memory_space<vmem>>, %arg23: memref<1x32xf32, #tpu.memory_space<vmem>>, %arg24: memref<1x8x32xf32, #tpu.memory_space<vmem>>) attributes {dimension_semantics = [#tpu.dimension_semantics<parallel>], iteration_bounds = array<i64: 2>, scalar_prefetch = 0 : i64, scratch_operands = 0 : i64, tpu.core_type = #tpu.core_type<tc>, window_params = [{transform_indices = @transform_0, window_bounds = array<i64: 1, 16, 7>}, {transform_indices = @transform_1, window_bounds = array<i64: 1, 16, 18>}, {pipeline_mode = #tpu.pipeline_mode<synchronous>, transform_indices = @transform_2, window_bounds = array<i64: 8, 32>}, {pipeline_mode = #tpu.pipeline_mode<synchronous>, transform_indices = @transform_3, window_bounds = array<i64: 7, 32>}, {pipeline_mode = #tpu.pipeline_mode<synchronous>, transform_indices = @transform_4, window_bounds = array<i64: 18, 32>}, {pipeline_mode = #tpu.pipeline_mode<synchronous>, transform_indices = @transform_5, window_bounds = array<i64: 18, 32>}, {pipeline_mode = #tpu.pipeline_mode<synchronous>, transform_indices = @transform_6, window_bounds = array<i64: 1, 32>}, {pipeline_mode = #tpu.pipeline_mode<synchronous>, transform_indices = @transform_7, window_bounds = array<i64: 1, 32>}, {pipeline_mode = #tpu.pipeline_mode<synchronous>, transform_indices = @transform_8, window_bounds = array<i64: 1, 32>}, {pipeline_mode = #tpu.pipeline_mode<synchronous>, transform_indices = @transform_9, window_bounds = array<i64: 1, 32>}, {pipeline_mode = #tpu.pipeline_mode<synchronous>, transform_indices = @transform_10, window_bounds = array<i64: 1, 32>}, {pipeline_mode = #tpu.pipeline_mode<synchronous>, transform_indices = @transform_11, window_bounds = array<i64: 32, 32>}, {pipeline_mode = #tpu.pipeline_mode<synchronous>, transform_indices = @transform_12, window_bounds = array<i64: 1, 32>}, {pipeline_mode = #tpu.pipeline_mode<synchronous>, transform_indices = @transform_13, window_bounds = array<i64: 32, 64>}, {pipeline_mode = #tpu.pipeline_mode<synchronous>, transform_indices = @transform_14, window_bounds = array<i64: 1, 64>}, {pipeline_mode = #tpu.pipeline_mode<synchronous>, transform_indices = @transform_15, window_bounds = array<i64: 32, 32>}, {pipeline_mode = #tpu.pipeline_mode<synchronous>, transform_indices = @transform_16, window_bounds = array<i64: 1, 32>}, {pipeline_mode = #tpu.pipeline_mode<synchronous>, transform_indices = @transform_17, window_bounds = array<i64: 1, 32>}, {pipeline_mode = #tpu.pipeline_mode<synchronous>, transform_indices = @transform_18, window_bounds = array<i64: 1, 32>}, {pipeline_mode = #tpu.pipeline_mode<synchronous>, transform_indices = @transform_19, window_bounds = array<i64: 32, 128>}, {pipeline_mode = #tpu.pipeline_mode<synchronous>, transform_indices = @transform_20, window_bounds = array<i64: 1, 128>}, {pipeline_mode = #tpu.pipeline_mode<synchronous>, transform_indices = @transform_21, window_bounds = array<i64: 128, 32>}, {pipeline_mode = #tpu.pipeline_mode<synchronous>, transform_indices = @transform_22, window_bounds = array<i64: 1, 32>}, {transform_indices = @transform_23, window_bounds = array<i64: 1, 8, 32>}]} {
    %c0 = arith.constant 0 : index
    %c0_0 = arith.constant 0 : index
    %c0_1 = arith.constant 0 : index
    %0 = vector.load %arg1[%c0, %c0_0, %c0_1] : memref<1x16x7xf32, #tpu.memory_space<vmem>>, vector<1x16x7xf32>
    %1 = vector.shape_cast %0 : vector<1x16x7xf32> to vector<16x7xf32>
    %2 = arith.truncf %1 : vector<16x7xf32> to vector<16x7xbf16>
    %c0_2 = arith.constant 0 : index
    %c0_3 = arith.constant 0 : index
    %c0_4 = arith.constant 0 : index
    %3 = vector.load %arg2[%c0_2, %c0_3, %c0_4] : memref<1x16x18xf32, #tpu.memory_space<vmem>>, vector<1x16x18xf32>
    %4 = vector.shape_cast %3 : vector<1x16x18xf32> to vector<16x18xf32>
    %c0_5 = arith.constant 0 : index
    %c0_6 = arith.constant 0 : index
    %5 = vector.load %arg4[%c0_5, %c0_6] : memref<7x32xbf16, #tpu.memory_space<vmem>>, vector<7x32xbf16>
    %cst = arith.constant dense<0.000000e+00> : vector<16x32xf32>
    %6 = tpu.matmul %2, %5, %cst {dimension_numbers = #tpu.dot_dimension_numbers<[1], [0], [0], [1], [0, 0, 1, 1], [], []>} : vector<16x7xbf16>, vector<7x32xbf16>, vector<16x32xf32> -> vector<16x32xf32>
    %7 = math.sin %4 : vector<16x18xf32>
    %8 = arith.truncf %7 : vector<16x18xf32> to vector<16x18xbf16>
    %c0_7 = arith.constant 0 : index
    %c0_8 = arith.constant 0 : index
    %9 = vector.load %arg5[%c0_7, %c0_8] : memref<18x32xbf16, #tpu.memory_space<vmem>>, vector<18x32xbf16>
    %cst_9 = arith.constant dense<0.000000e+00> : vector<16x32xf32>
    %10 = tpu.matmul %8, %9, %cst_9 {dimension_numbers = #tpu.dot_dimension_numbers<[1], [0], [0], [1], [0, 0, 1, 1], [], []>} : vector<16x18xbf16>, vector<18x32xbf16>, vector<16x32xf32> -> vector<16x32xf32>
    %11 = arith.addf %6, %10 : vector<16x32xf32>
    %12 = math.cos %4 : vector<16x18xf32>
    %13 = arith.truncf %12 : vector<16x18xf32> to vector<16x18xbf16>
    %c0_10 = arith.constant 0 : index
    %c0_11 = arith.constant 0 : index
    %14 = vector.load %arg6[%c0_10, %c0_11] : memref<18x32xbf16, #tpu.memory_space<vmem>>, vector<18x32xbf16>
    %cst_12 = arith.constant dense<0.000000e+00> : vector<16x32xf32>
    %15 = tpu.matmul %13, %14, %cst_12 {dimension_numbers = #tpu.dot_dimension_numbers<[1], [0], [0], [1], [0, 0, 1, 1], [], []>} : vector<16x18xbf16>, vector<18x32xbf16>, vector<16x32xf32> -> vector<16x32xf32>
    %16 = arith.addf %11, %15 : vector<16x32xf32>
    %c0_13 = arith.constant 0 : index
    %c0_14 = arith.constant 0 : index
    %17 = vector.load %arg7[%c0_13, %c0_14] : memref<1x32xf32, #tpu.memory_space<vmem>>, vector<1x32xf32>
    %18 = vector.broadcast %17 : vector<1x32xf32> to vector<16x32xf32>
    %19 = arith.addf %16, %18 : vector<16x32xf32>
    %c0_15 = arith.constant 0 : index
    %c0_16 = arith.constant 0 : index
    %20 = vector.load %arg3[%c0_15, %c0_16] : memref<8x32xf32, #tpu.memory_space<vmem>>, vector<8x32xf32>
    %c0_17 = arith.constant 0 : index
    %c0_18 = arith.constant 0 : index
    %21 = vector.load %arg8[%c0_17, %c0_18] : memref<1x32xf32, #tpu.memory_space<vmem>>, vector<1x32xf32>
    %c0_19 = arith.constant 0 : index
    %c0_20 = arith.constant 0 : index
    %22 = vector.load %arg9[%c0_19, %c0_20] : memref<1x32xf32, #tpu.memory_space<vmem>>, vector<1x32xf32>
    %cst_21 = arith.constant dense<0.000000e+00> : vector<8xf32>
    %23 = vector.multi_reduction <add>, %20, %cst_21 [1] : vector<8x32xf32> to vector<8xf32>
    %24 = vector.shape_cast %23 : vector<8xf32> to vector<8x1xf32>
    %cst_22 = arith.constant 3.200000e+01 : f32
    %25 = vector.broadcast %cst_22 : f32 to vector<8x1xf32>
    %26 = arith.divf %24, %25 : vector<8x1xf32>
    %27 = vector.broadcast %26 : vector<8x1xf32> to vector<8x32xf32>
    %28 = arith.subf %20, %27 : vector<8x32xf32>
    %29 = arith.mulf %28, %28 : vector<8x32xf32>
    %cst_23 = arith.constant dense<0.000000e+00> : vector<8xf32>
    %30 = vector.multi_reduction <add>, %29, %cst_23 [1] : vector<8x32xf32> to vector<8xf32>
    %31 = vector.shape_cast %30 : vector<8xf32> to vector<8x1xf32>
    %cst_24 = arith.constant 3.200000e+01 : f32
    %32 = vector.broadcast %cst_24 : f32 to vector<8x1xf32>
    %33 = arith.divf %31, %32 : vector<8x1xf32>
    %34 = vector.broadcast %26 : vector<8x1xf32> to vector<8x32xf32>
    %35 = arith.subf %20, %34 : vector<8x32xf32>
    %cst_25 = arith.constant 9.99999974E-6 : f32
    %36 = vector.broadcast %cst_25 : f32 to vector<8x1xf32>
    %37 = arith.addf %33, %36 : vector<8x1xf32>
    %38 = math.rsqrt %37 : vector<8x1xf32>
    %39 = vector.broadcast %38 : vector<8x1xf32> to vector<8x32xf32>
    %40 = arith.mulf %35, %39 : vector<8x32xf32>
    %41 = vector.broadcast %21 : vector<1x32xf32> to vector<8x32xf32>
    %42 = arith.mulf %40, %41 : vector<8x32xf32>
    %43 = vector.broadcast %22 : vector<1x32xf32> to vector<8x32xf32>
    %44 = arith.addf %42, %43 : vector<8x32xf32>
    %45 = arith.truncf %44 : vector<8x32xf32> to vector<8x32xbf16>
    %c0_26 = arith.constant 0 : index
    %c0_27 = arith.constant 0 : index
    %46 = vector.load %arg12[%c0_26, %c0_27] : memref<32x32xbf16, #tpu.memory_space<vmem>>, vector<32x32xbf16>
    %cst_28 = arith.constant dense<0.000000e+00> : vector<8x32xf32>
    %47 = tpu.matmul %45, %46, %cst_28 {dimension_numbers = #tpu.dot_dimension_numbers<[1], [0], [0], [1], [0, 0, 1, 1], [], []>} : vector<8x32xbf16>, vector<32x32xbf16>, vector<8x32xf32> -> vector<8x32xf32>
    %c0_29 = arith.constant 0 : index
    %c0_30 = arith.constant 0 : index
    %48 = vector.load %arg13[%c0_29, %c0_30] : memref<1x32xf32, #tpu.memory_space<vmem>>, vector<1x32xf32>
    %49 = vector.broadcast %48 : vector<1x32xf32> to vector<8x32xf32>
    %50 = arith.addf %47, %49 : vector<8x32xf32>
    %c0_31 = arith.constant 0 : index
    %c0_32 = arith.constant 0 : index
    %51 = vector.load %arg10[%c0_31, %c0_32] : memref<1x32xf32, #tpu.memory_space<vmem>>, vector<1x32xf32>
    %c0_33 = arith.constant 0 : index
    %c0_34 = arith.constant 0 : index
    %52 = vector.load %arg11[%c0_33, %c0_34] : memref<1x32xf32, #tpu.memory_space<vmem>>, vector<1x32xf32>
    %cst_35 = arith.constant dense<0.000000e+00> : vector<16xf32>
    %53 = vector.multi_reduction <add>, %19, %cst_35 [1] : vector<16x32xf32> to vector<16xf32>
    %54 = vector.shape_cast %53 : vector<16xf32> to vector<16x1xf32>
    %cst_36 = arith.constant 3.200000e+01 : f32
    %55 = vector.broadcast %cst_36 : f32 to vector<16x1xf32>
    %56 = arith.divf %54, %55 : vector<16x1xf32>
    %57 = vector.broadcast %56 : vector<16x1xf32> to vector<16x32xf32>
    %58 = arith.subf %19, %57 : vector<16x32xf32>
    %59 = arith.mulf %58, %58 : vector<16x32xf32>
    %cst_37 = arith.constant dense<0.000000e+00> : vector<16xf32>
    %60 = vector.multi_reduction <add>, %59, %cst_37 [1] : vector<16x32xf32> to vector<16xf32>
    %61 = vector.shape_cast %60 : vector<16xf32> to vector<16x1xf32>
    %cst_38 = arith.constant 3.200000e+01 : f32
    %62 = vector.broadcast %cst_38 : f32 to vector<16x1xf32>
    %63 = arith.divf %61, %62 : vector<16x1xf32>
    %64 = vector.broadcast %56 : vector<16x1xf32> to vector<16x32xf32>
    %65 = arith.subf %19, %64 : vector<16x32xf32>
    %cst_39 = arith.constant 9.99999974E-6 : f32
    %66 = vector.broadcast %cst_39 : f32 to vector<16x1xf32>
    %67 = arith.addf %63, %66 : vector<16x1xf32>
    %68 = math.rsqrt %67 : vector<16x1xf32>
    %69 = vector.broadcast %68 : vector<16x1xf32> to vector<16x32xf32>
    %70 = arith.mulf %65, %69 : vector<16x32xf32>
    %71 = vector.broadcast %51 : vector<1x32xf32> to vector<16x32xf32>
    %72 = arith.mulf %70, %71 : vector<16x32xf32>
    %73 = vector.broadcast %52 : vector<1x32xf32> to vector<16x32xf32>
    %74 = arith.addf %72, %73 : vector<16x32xf32>
    %75 = arith.truncf %74 : vector<16x32xf32> to vector<16x32xbf16>
    %c0_40 = arith.constant 0 : index
    %c0_41 = arith.constant 0 : index
    %76 = vector.load %arg14[%c0_40, %c0_41] : memref<32x64xbf16, #tpu.memory_space<vmem>>, vector<32x64xbf16>
    %cst_42 = arith.constant dense<0.000000e+00> : vector<16x64xf32>
    %77 = tpu.matmul %75, %76, %cst_42 {dimension_numbers = #tpu.dot_dimension_numbers<[1], [0], [0], [1], [0, 0, 1, 1], [], []>} : vector<16x32xbf16>, vector<32x64xbf16>, vector<16x64xf32> -> vector<16x64xf32>
    %c0_43 = arith.constant 0 : index
    %c0_44 = arith.constant 0 : index
    %78 = vector.load %arg15[%c0_43, %c0_44] : memref<1x64xf32, #tpu.memory_space<vmem>>, vector<1x64xf32>
    %79 = vector.broadcast %78 : vector<1x64xf32> to vector<16x64xf32>
    %80 = arith.addf %77, %79 : vector<16x64xf32>
    %c0_45 = arith.constant 0 : index
    %c0_46 = arith.constant 0 : index
    %81 = vector.load %arg16[%c0_45, %c0_46] : memref<32x32xbf16, #tpu.memory_space<vmem>>, vector<32x32xbf16>
    %c0_47 = arith.constant 0 : index
    %c0_48 = arith.constant 0 : index
    %82 = vector.load %arg17[%c0_47, %c0_48] : memref<1x32xf32, #tpu.memory_space<vmem>>, vector<1x32xf32>
    %cst_49 = arith.constant 0.000000e+00 : f32
    %83 = vector.broadcast %cst_49 : f32 to vector<8x32xf32>
    %84 = vector.extract_strided_slice %50 {offsets = [0, 0], sizes = [8, 8], strides = [1, 1]} : vector<8x32xf32> to vector<8x8xf32>
    %85 = arith.truncf %84 : vector<8x8xf32> to vector<8x8xbf16>
    %86 = vector.extract_strided_slice %80 {offsets = [0, 0], sizes = [16, 8], strides = [1, 1]} : vector<16x64xf32> to vector<16x8xf32>
    %87 = arith.truncf %86 : vector<16x8xf32> to vector<16x8xbf16>
    %88 = vector.extract_strided_slice %80 {offsets = [0, 8], sizes = [16, 8], strides = [1, 1]} : vector<16x64xf32> to vector<16x8xf32>
    %89 = arith.truncf %88 : vector<16x8xf32> to vector<16x8xbf16>
    %cst_50 = arith.constant dense<0.000000e+00> : vector<8x16xf32>
    %90 = tpu.matmul %85, %87, %cst_50 {dimension_numbers = #tpu.dot_dimension_numbers<[1], [1], [0], [0], [0, 0, 1, 0], [], []>} : vector<8x8xbf16>, vector<16x8xbf16>, vector<8x16xf32> -> vector<8x16xf32>
    %cst_51 = arith.constant 0.353553385 : f32
    %91 = vector.broadcast %cst_51 : f32 to vector<8x16xf32>
    %92 = arith.mulf %90, %91 : vector<8x16xf32>
    %cst_52 = arith.constant dense<0xFF800000> : vector<8xf32>
    %93 = vector.multi_reduction <maximumf>, %92, %cst_52 [1] : vector<8x16xf32> to vector<8xf32>
    %94 = vector.shape_cast %93 : vector<8xf32> to vector<8x1xf32>
    %95 = vector.broadcast %94 : vector<8x1xf32> to vector<8x16xf32>
    %96 = arith.subf %92, %95 : vector<8x16xf32>
    %97 = math.exp %96 : vector<8x16xf32>
    %cst_53 = arith.constant dense<0.000000e+00> : vector<8xf32>
    %98 = vector.multi_reduction <add>, %97, %cst_53 [1] : vector<8x16xf32> to vector<8xf32>
    %99 = vector.shape_cast %98 : vector<8xf32> to vector<8x1xf32>
    %100 = tpu.reciprocal %99 {approx = true} : vector<8x1xf32> -> vector<8x1xf32>
    %101 = vector.broadcast %100 : vector<8x1xf32> to vector<8x16xf32>
    %102 = arith.mulf %97, %101 : vector<8x16xf32>
    %103 = arith.truncf %102 : vector<8x16xf32> to vector<8x16xbf16>
    %cst_54 = arith.constant dense<0.000000e+00> : vector<8x8xf32>
    %104 = tpu.matmul %103, %89, %cst_54 {dimension_numbers = #tpu.dot_dimension_numbers<[1], [0], [0], [1], [0, 0, 1, 1], [], []>} : vector<8x16xbf16>, vector<16x8xbf16>, vector<8x8xf32> -> vector<8x8xf32>
    %105 = arith.truncf %104 : vector<8x8xf32> to vector<8x8xbf16>
    %106 = vector.extract_strided_slice %81 {offsets = [0, 0], sizes = [8, 32], strides = [1, 1]} : vector<32x32xbf16> to vector<8x32xbf16>
    %cst_55 = arith.constant dense<0.000000e+00> : vector<8x32xf32>
    %107 = tpu.matmul %105, %106, %cst_55 {dimension_numbers = #tpu.dot_dimension_numbers<[1], [0], [0], [1], [0, 0, 1, 1], [], []>} : vector<8x8xbf16>, vector<8x32xbf16>, vector<8x32xf32> -> vector<8x32xf32>
    %108 = arith.addf %83, %107 : vector<8x32xf32>
    %109 = vector.extract_strided_slice %50 {offsets = [0, 8], sizes = [8, 8], strides = [1, 1]} : vector<8x32xf32> to vector<8x8xf32>
    %110 = arith.truncf %109 : vector<8x8xf32> to vector<8x8xbf16>
    %111 = vector.extract_strided_slice %80 {offsets = [0, 16], sizes = [16, 8], strides = [1, 1]} : vector<16x64xf32> to vector<16x8xf32>
    %112 = arith.truncf %111 : vector<16x8xf32> to vector<16x8xbf16>
    %113 = vector.extract_strided_slice %80 {offsets = [0, 24], sizes = [16, 8], strides = [1, 1]} : vector<16x64xf32> to vector<16x8xf32>
    %114 = arith.truncf %113 : vector<16x8xf32> to vector<16x8xbf16>
    %cst_56 = arith.constant dense<0.000000e+00> : vector<8x16xf32>
    %115 = tpu.matmul %110, %112, %cst_56 {dimension_numbers = #tpu.dot_dimension_numbers<[1], [1], [0], [0], [0, 0, 1, 0], [], []>} : vector<8x8xbf16>, vector<16x8xbf16>, vector<8x16xf32> -> vector<8x16xf32>
    %cst_57 = arith.constant 0.353553385 : f32
    %116 = vector.broadcast %cst_57 : f32 to vector<8x16xf32>
    %117 = arith.mulf %115, %116 : vector<8x16xf32>
    %cst_58 = arith.constant dense<0xFF800000> : vector<8xf32>
    %118 = vector.multi_reduction <maximumf>, %117, %cst_58 [1] : vector<8x16xf32> to vector<8xf32>
    %119 = vector.shape_cast %118 : vector<8xf32> to vector<8x1xf32>
    %120 = vector.broadcast %119 : vector<8x1xf32> to vector<8x16xf32>
    %121 = arith.subf %117, %120 : vector<8x16xf32>
    %122 = math.exp %121 : vector<8x16xf32>
    %cst_59 = arith.constant dense<0.000000e+00> : vector<8xf32>
    %123 = vector.multi_reduction <add>, %122, %cst_59 [1] : vector<8x16xf32> to vector<8xf32>
    %124 = vector.shape_cast %123 : vector<8xf32> to vector<8x1xf32>
    %125 = tpu.reciprocal %124 {approx = true} : vector<8x1xf32> -> vector<8x1xf32>
    %126 = vector.broadcast %125 : vector<8x1xf32> to vector<8x16xf32>
    %127 = arith.mulf %122, %126 : vector<8x16xf32>
    %128 = arith.truncf %127 : vector<8x16xf32> to vector<8x16xbf16>
    %cst_60 = arith.constant dense<0.000000e+00> : vector<8x8xf32>
    %129 = tpu.matmul %128, %114, %cst_60 {dimension_numbers = #tpu.dot_dimension_numbers<[1], [0], [0], [1], [0, 0, 1, 1], [], []>} : vector<8x16xbf16>, vector<16x8xbf16>, vector<8x8xf32> -> vector<8x8xf32>
    %130 = arith.truncf %129 : vector<8x8xf32> to vector<8x8xbf16>
    %131 = vector.extract_strided_slice %81 {offsets = [8, 0], sizes = [8, 32], strides = [1, 1]} : vector<32x32xbf16> to vector<8x32xbf16>
    %cst_61 = arith.constant dense<0.000000e+00> : vector<8x32xf32>
    %132 = tpu.matmul %130, %131, %cst_61 {dimension_numbers = #tpu.dot_dimension_numbers<[1], [0], [0], [1], [0, 0, 1, 1], [], []>} : vector<8x8xbf16>, vector<8x32xbf16>, vector<8x32xf32> -> vector<8x32xf32>
    %133 = arith.addf %108, %132 : vector<8x32xf32>
    %134 = vector.extract_strided_slice %50 {offsets = [0, 16], sizes = [8, 8], strides = [1, 1]} : vector<8x32xf32> to vector<8x8xf32>
    %135 = arith.truncf %134 : vector<8x8xf32> to vector<8x8xbf16>
    %136 = vector.extract_strided_slice %80 {offsets = [0, 32], sizes = [16, 8], strides = [1, 1]} : vector<16x64xf32> to vector<16x8xf32>
    %137 = arith.truncf %136 : vector<16x8xf32> to vector<16x8xbf16>
    %138 = vector.extract_strided_slice %80 {offsets = [0, 40], sizes = [16, 8], strides = [1, 1]} : vector<16x64xf32> to vector<16x8xf32>
    %139 = arith.truncf %138 : vector<16x8xf32> to vector<16x8xbf16>
    %cst_62 = arith.constant dense<0.000000e+00> : vector<8x16xf32>
    %140 = tpu.matmul %135, %137, %cst_62 {dimension_numbers = #tpu.dot_dimension_numbers<[1], [1], [0], [0], [0, 0, 1, 0], [], []>} : vector<8x8xbf16>, vector<16x8xbf16>, vector<8x16xf32> -> vector<8x16xf32>
    %cst_63 = arith.constant 0.353553385 : f32
    %141 = vector.broadcast %cst_63 : f32 to vector<8x16xf32>
    %142 = arith.mulf %140, %141 : vector<8x16xf32>
    %cst_64 = arith.constant dense<0xFF800000> : vector<8xf32>
    %143 = vector.multi_reduction <maximumf>, %142, %cst_64 [1] : vector<8x16xf32> to vector<8xf32>
    %144 = vector.shape_cast %143 : vector<8xf32> to vector<8x1xf32>
    %145 = vector.broadcast %144 : vector<8x1xf32> to vector<8x16xf32>
    %146 = arith.subf %142, %145 : vector<8x16xf32>
    %147 = math.exp %146 : vector<8x16xf32>
    %cst_65 = arith.constant dense<0.000000e+00> : vector<8xf32>
    %148 = vector.multi_reduction <add>, %147, %cst_65 [1] : vector<8x16xf32> to vector<8xf32>
    %149 = vector.shape_cast %148 : vector<8xf32> to vector<8x1xf32>
    %150 = tpu.reciprocal %149 {approx = true} : vector<8x1xf32> -> vector<8x1xf32>
    %151 = vector.broadcast %150 : vector<8x1xf32> to vector<8x16xf32>
    %152 = arith.mulf %147, %151 : vector<8x16xf32>
    %153 = arith.truncf %152 : vector<8x16xf32> to vector<8x16xbf16>
    %cst_66 = arith.constant dense<0.000000e+00> : vector<8x8xf32>
    %154 = tpu.matmul %153, %139, %cst_66 {dimension_numbers = #tpu.dot_dimension_numbers<[1], [0], [0], [1], [0, 0, 1, 1], [], []>} : vector<8x16xbf16>, vector<16x8xbf16>, vector<8x8xf32> -> vector<8x8xf32>
    %155 = arith.truncf %154 : vector<8x8xf32> to vector<8x8xbf16>
    %156 = vector.extract_strided_slice %81 {offsets = [16, 0], sizes = [8, 32], strides = [1, 1]} : vector<32x32xbf16> to vector<8x32xbf16>
    %cst_67 = arith.constant dense<0.000000e+00> : vector<8x32xf32>
    %157 = tpu.matmul %155, %156, %cst_67 {dimension_numbers = #tpu.dot_dimension_numbers<[1], [0], [0], [1], [0, 0, 1, 1], [], []>} : vector<8x8xbf16>, vector<8x32xbf16>, vector<8x32xf32> -> vector<8x32xf32>
    %158 = arith.addf %133, %157 : vector<8x32xf32>
    %159 = vector.extract_strided_slice %50 {offsets = [0, 24], sizes = [8, 8], strides = [1, 1]} : vector<8x32xf32> to vector<8x8xf32>
    %160 = arith.truncf %159 : vector<8x8xf32> to vector<8x8xbf16>
    %161 = vector.extract_strided_slice %80 {offsets = [0, 48], sizes = [16, 8], strides = [1, 1]} : vector<16x64xf32> to vector<16x8xf32>
    %162 = arith.truncf %161 : vector<16x8xf32> to vector<16x8xbf16>
    %163 = vector.extract_strided_slice %80 {offsets = [0, 56], sizes = [16, 8], strides = [1, 1]} : vector<16x64xf32> to vector<16x8xf32>
    %164 = arith.truncf %163 : vector<16x8xf32> to vector<16x8xbf16>
    %cst_68 = arith.constant dense<0.000000e+00> : vector<8x16xf32>
    %165 = tpu.matmul %160, %162, %cst_68 {dimension_numbers = #tpu.dot_dimension_numbers<[1], [1], [0], [0], [0, 0, 1, 0], [], []>} : vector<8x8xbf16>, vector<16x8xbf16>, vector<8x16xf32> -> vector<8x16xf32>
    %cst_69 = arith.constant 0.353553385 : f32
    %166 = vector.broadcast %cst_69 : f32 to vector<8x16xf32>
    %167 = arith.mulf %165, %166 : vector<8x16xf32>
    %cst_70 = arith.constant dense<0xFF800000> : vector<8xf32>
    %168 = vector.multi_reduction <maximumf>, %167, %cst_70 [1] : vector<8x16xf32> to vector<8xf32>
    %169 = vector.shape_cast %168 : vector<8xf32> to vector<8x1xf32>
    %170 = vector.broadcast %169 : vector<8x1xf32> to vector<8x16xf32>
    %171 = arith.subf %167, %170 : vector<8x16xf32>
    %172 = math.exp %171 : vector<8x16xf32>
    %cst_71 = arith.constant dense<0.000000e+00> : vector<8xf32>
    %173 = vector.multi_reduction <add>, %172, %cst_71 [1] : vector<8x16xf32> to vector<8xf32>
    %174 = vector.shape_cast %173 : vector<8xf32> to vector<8x1xf32>
    %175 = tpu.reciprocal %174 {approx = true} : vector<8x1xf32> -> vector<8x1xf32>
    %176 = vector.broadcast %175 : vector<8x1xf32> to vector<8x16xf32>
    %177 = arith.mulf %172, %176 : vector<8x16xf32>
    %178 = arith.truncf %177 : vector<8x16xf32> to vector<8x16xbf16>
    %cst_72 = arith.constant dense<0.000000e+00> : vector<8x8xf32>
    %179 = tpu.matmul %178, %164, %cst_72 {dimension_numbers = #tpu.dot_dimension_numbers<[1], [0], [0], [1], [0, 0, 1, 1], [], []>} : vector<8x16xbf16>, vector<16x8xbf16>, vector<8x8xf32> -> vector<8x8xf32>
    %180 = arith.truncf %179 : vector<8x8xf32> to vector<8x8xbf16>
    %181 = vector.extract_strided_slice %81 {offsets = [24, 0], sizes = [8, 32], strides = [1, 1]} : vector<32x32xbf16> to vector<8x32xbf16>
    %cst_73 = arith.constant dense<0.000000e+00> : vector<8x32xf32>
    %182 = tpu.matmul %180, %181, %cst_73 {dimension_numbers = #tpu.dot_dimension_numbers<[1], [0], [0], [1], [0, 0, 1, 1], [], []>} : vector<8x8xbf16>, vector<8x32xbf16>, vector<8x32xf32> -> vector<8x32xf32>
    %183 = arith.addf %158, %182 : vector<8x32xf32>
    %184 = vector.broadcast %82 : vector<1x32xf32> to vector<8x32xf32>
    %185 = arith.addf %183, %184 : vector<8x32xf32>
    %186 = arith.addf %20, %185 : vector<8x32xf32>
    %c0_74 = arith.constant 0 : index
    %c0_75 = arith.constant 0 : index
    %187 = vector.load %arg18[%c0_74, %c0_75] : memref<1x32xf32, #tpu.memory_space<vmem>>, vector<1x32xf32>
    %c0_76 = arith.constant 0 : index
    %c0_77 = arith.constant 0 : index
    %188 = vector.load %arg19[%c0_76, %c0_77] : memref<1x32xf32, #tpu.memory_space<vmem>>, vector<1x32xf32>
    %cst_78 = arith.constant dense<0.000000e+00> : vector<8xf32>
    %189 = vector.multi_reduction <add>, %186, %cst_78 [1] : vector<8x32xf32> to vector<8xf32>
    %190 = vector.shape_cast %189 : vector<8xf32> to vector<8x1xf32>
    %cst_79 = arith.constant 3.200000e+01 : f32
    %191 = vector.broadcast %cst_79 : f32 to vector<8x1xf32>
    %192 = arith.divf %190, %191 : vector<8x1xf32>
    %193 = vector.broadcast %192 : vector<8x1xf32> to vector<8x32xf32>
    %194 = arith.subf %186, %193 : vector<8x32xf32>
    %195 = arith.mulf %194, %194 : vector<8x32xf32>
    %cst_80 = arith.constant dense<0.000000e+00> : vector<8xf32>
    %196 = vector.multi_reduction <add>, %195, %cst_80 [1] : vector<8x32xf32> to vector<8xf32>
    %197 = vector.shape_cast %196 : vector<8xf32> to vector<8x1xf32>
    %cst_81 = arith.constant 3.200000e+01 : f32
    %198 = vector.broadcast %cst_81 : f32 to vector<8x1xf32>
    %199 = arith.divf %197, %198 : vector<8x1xf32>
    %200 = vector.broadcast %192 : vector<8x1xf32> to vector<8x32xf32>
    %201 = arith.subf %186, %200 : vector<8x32xf32>
    %cst_82 = arith.constant 9.99999974E-6 : f32
    %202 = vector.broadcast %cst_82 : f32 to vector<8x1xf32>
    %203 = arith.addf %199, %202 : vector<8x1xf32>
    %204 = math.rsqrt %203 : vector<8x1xf32>
    %205 = vector.broadcast %204 : vector<8x1xf32> to vector<8x32xf32>
    %206 = arith.mulf %201, %205 : vector<8x32xf32>
    %207 = vector.broadcast %187 : vector<1x32xf32> to vector<8x32xf32>
    %208 = arith.mulf %206, %207 : vector<8x32xf32>
    %209 = vector.broadcast %188 : vector<1x32xf32> to vector<8x32xf32>
    %210 = arith.addf %208, %209 : vector<8x32xf32>
    %211 = arith.truncf %210 : vector<8x32xf32> to vector<8x32xbf16>
    %c0_83 = arith.constant 0 : index
    %c0_84 = arith.constant 0 : index
    %212 = vector.load %arg20[%c0_83, %c0_84] : memref<32x128xbf16, #tpu.memory_space<vmem>>, vector<32x128xbf16>
    %cst_85 = arith.constant dense<0.000000e+00> : vector<8x128xf32>
    %213 = tpu.matmul %211, %212, %cst_85 {dimension_numbers = #tpu.dot_dimension_numbers<[1], [0], [0], [1], [0, 0, 1, 1], [], []>} : vector<8x32xbf16>, vector<32x128xbf16>, vector<8x128xf32> -> vector<8x128xf32>
    %c0_86 = arith.constant 0 : index
    %c0_87 = arith.constant 0 : index
    %214 = vector.load %arg21[%c0_86, %c0_87] : memref<1x128xf32, #tpu.memory_space<vmem>>, vector<1x128xf32>
    %215 = vector.broadcast %214 : vector<1x128xf32> to vector<8x128xf32>
    %216 = arith.addf %213, %215 : vector<8x128xf32>
    %cst_88 = arith.constant 5.000000e-01 : f32
    %217 = vector.broadcast %cst_88 : f32 to vector<8x128xf32>
    %218 = arith.mulf %217, %216 : vector<8x128xf32>
    %cst_89 = arith.constant 0.707106769 : f32
    %219 = vector.broadcast %cst_89 : f32 to vector<8x128xf32>
    %220 = arith.mulf %216, %219 : vector<8x128xf32>
    %221 = math.erf %220 : vector<8x128xf32>
    %cst_90 = arith.constant 1.000000e+00 : f32
    %222 = vector.broadcast %cst_90 : f32 to vector<8x128xf32>
    %223 = arith.addf %222, %221 : vector<8x128xf32>
    %224 = arith.mulf %218, %223 : vector<8x128xf32>
    %225 = arith.truncf %224 : vector<8x128xf32> to vector<8x128xbf16>
    %c0_91 = arith.constant 0 : index
    %c0_92 = arith.constant 0 : index
    %226 = vector.load %arg22[%c0_91, %c0_92] : memref<128x32xbf16, #tpu.memory_space<vmem>>, vector<128x32xbf16>
    %cst_93 = arith.constant dense<0.000000e+00> : vector<8x32xf32>
    %227 = tpu.matmul %225, %226, %cst_93 {dimension_numbers = #tpu.dot_dimension_numbers<[1], [0], [0], [1], [0, 0, 1, 1], [], []>} : vector<8x128xbf16>, vector<128x32xbf16>, vector<8x32xf32> -> vector<8x32xf32>
    %c0_94 = arith.constant 0 : index
    %c0_95 = arith.constant 0 : index
    %228 = vector.load %arg23[%c0_94, %c0_95] : memref<1x32xf32, #tpu.memory_space<vmem>>, vector<1x32xf32>
    %229 = vector.broadcast %228 : vector<1x32xf32> to vector<8x32xf32>
    %230 = arith.addf %227, %229 : vector<8x32xf32>
    %231 = arith.addf %186, %230 : vector<8x32xf32>
    %c0_96 = arith.constant 0 : index
    %c0_97 = arith.constant 0 : index
    %c0_98 = arith.constant 0 : index
    %232 = vector.load %arg24[%c0_96, %c0_97, %c0_98] : memref<1x8x32xf32, #tpu.memory_space<vmem>>, vector<1x8x32xf32>
    %233 = vector.shape_cast %232 : vector<1x8x32xf32> to vector<8x32xf32>
    %234 = vector.shape_cast %231 : vector<8x32xf32> to vector<1x8x32xf32>
    tpu.vector_store %arg24[%c0_96, %c0_97, %c0_98], %234 {strides = array<i32>} : memref<1x8x32xf32, #tpu.memory_space<vmem>>, vector<1x8x32xf32>,
    return
  }
  func.func @transform_0(%arg0: i32) -> (i32, i32, i32) {
    %c0_i32 = arith.constant 0 : i32
    %c0_i32_0 = arith.constant 0 : i32
    %c0_i32_1 = arith.constant 0 : i32
    return %arg0, %c0_i32, %c0_i32_0 : i32, i32, i32
  }
  func.func @transform_1(%arg0: i32) -> (i32, i32, i32) {
    %c0_i32 = arith.constant 0 : i32
    %c0_i32_0 = arith.constant 0 : i32
    %c0_i32_1 = arith.constant 0 : i32
    return %arg0, %c0_i32, %c0_i32_0 : i32, i32, i32
  }
  func.func @transform_2(%arg0: i32) -> (i32, i32) {
    %c0_i32 = arith.constant 0 : i32
    %c0_i32_0 = arith.constant 0 : i32
    %c0_i32_1 = arith.constant 0 : i32
    return %c0_i32, %c0_i32_0 : i32, i32
  }
  func.func @transform_3(%arg0: i32) -> (i32, i32) {
    %c0_i32 = arith.constant 0 : i32
    %c0_i32_0 = arith.constant 0 : i32
    %c0_i32_1 = arith.constant 0 : i32
    return %c0_i32, %c0_i32_0 : i32, i32
  }
  func.func @transform_4(%arg0: i32) -> (i32, i32) {
    %c0_i32 = arith.constant 0 : i32
    %c0_i32_0 = arith.constant 0 : i32
    %c0_i32_1 = arith.constant 0 : i32
    return %c0_i32, %c0_i32_0 : i32, i32
  }
  func.func @transform_5(%arg0: i32) -> (i32, i32) {
    %c0_i32 = arith.constant 0 : i32
    %c0_i32_0 = arith.constant 0 : i32
    %c0_i32_1 = arith.constant 0 : i32
    return %c0_i32, %c0_i32_0 : i32, i32
  }
  func.func @transform_6(%arg0: i32) -> (i32, i32) {
    %c0_i32 = arith.constant 0 : i32
    %c0_i32_0 = arith.constant 0 : i32
    %c0_i32_1 = arith.constant 0 : i32
    return %c0_i32, %c0_i32_0 : i32, i32
  }
  func.func @transform_7(%arg0: i32) -> (i32, i32) {
    %c0_i32 = arith.constant 0 : i32
    %c0_i32_0 = arith.constant 0 : i32
    %c0_i32_1 = arith.constant 0 : i32
    return %c0_i32, %c0_i32_0 : i32, i32
  }
  func.func @transform_8(%arg0: i32) -> (i32, i32) {
    %c0_i32 = arith.constant 0 : i32
    %c0_i32_0 = arith.constant 0 : i32
    %c0_i32_1 = arith.constant 0 : i32
    return %c0_i32, %c0_i32_0 : i32, i32
  }
  func.func @transform_9(%arg0: i32) -> (i32, i32) {
    %c0_i32 = arith.constant 0 : i32
    %c0_i32_0 = arith.constant 0 : i32
    %c0_i32_1 = arith.constant 0 : i32
    return %c0_i32, %c0_i32_0 : i32, i32
  }
  func.func @transform_10(%arg0: i32) -> (i32, i32) {
    %c0_i32 = arith.constant 0 : i32
    %c0_i32_0 = arith.constant 0 : i32
    %c0_i32_1 = arith.constant 0 : i32
    return %c0_i32, %c0_i32_0 : i32, i32
  }
  func.func @transform_11(%arg0: i32) -> (i32, i32) {
    %c0_i32 = arith.constant 0 : i32
    %c0_i32_0 = arith.constant 0 : i32
    %c0_i32_1 = arith.constant 0 : i32
    return %c0_i32, %c0_i32_0 : i32, i32
  }
  func.func @transform_12(%arg0: i32) -> (i32, i32) {
    %c0_i32 = arith.constant 0 : i32
    %c0_i32_0 = arith.constant 0 : i32
    %c0_i32_1 = arith.constant 0 : i32
    return %c0_i32, %c0_i32_0 : i32, i32
  }
  func.func @transform_13(%arg0: i32) -> (i32, i32) {
    %c0_i32 = arith.constant 0 : i32
    %c0_i32_0 = arith.constant 0 : i32
    %c0_i32_1 = arith.constant 0 : i32
    return %c0_i32, %c0_i32_0 : i32, i32
  }
  func.func @transform_14(%arg0: i32) -> (i32, i32) {
    %c0_i32 = arith.constant 0 : i32
    %c0_i32_0 = arith.constant 0 : i32
    %c0_i32_1 = arith.constant 0 : i32
    return %c0_i32, %c0_i32_0 : i32, i32
  }
  func.func @transform_15(%arg0: i32) -> (i32, i32) {
    %c0_i32 = arith.constant 0 : i32
    %c0_i32_0 = arith.constant 0 : i32
    %c0_i32_1 = arith.constant 0 : i32
    return %c0_i32, %c0_i32_0 : i32, i32
  }
  func.func @transform_16(%arg0: i32) -> (i32, i32) {
    %c0_i32 = arith.constant 0 : i32
    %c0_i32_0 = arith.constant 0 : i32
    %c0_i32_1 = arith.constant 0 : i32
    return %c0_i32, %c0_i32_0 : i32, i32
  }
  func.func @transform_17(%arg0: i32) -> (i32, i32) {
    %c0_i32 = arith.constant 0 : i32
    %c0_i32_0 = arith.constant 0 : i32
    %c0_i32_1 = arith.constant 0 : i32
    return %c0_i32, %c0_i32_0 : i32, i32
  }
  func.func @transform_18(%arg0: i32) -> (i32, i32) {
    %c0_i32 = arith.constant 0 : i32
    %c0_i32_0 = arith.constant 0 : i32
    %c0_i32_1 = arith.constant 0 : i32
    return %c0_i32, %c0_i32_0 : i32, i32
  }
  func.func @transform_19(%arg0: i32) -> (i32, i32) {
    %c0_i32 = arith.constant 0 : i32
    %c0_i32_0 = arith.constant 0 : i32
    %c0_i32_1 = arith.constant 0 : i32
    return %c0_i32, %c0_i32_0 : i32, i32
  }
  func.func @transform_20(%arg0: i32) -> (i32, i32) {
    %c0_i32 = arith.constant 0 : i32
    %c0_i32_0 = arith.constant 0 : i32
    %c0_i32_1 = arith.constant 0 : i32
    return %c0_i32, %c0_i32_0 : i32, i32
  }
  func.func @transform_21(%arg0: i32) -> (i32, i32) {
    %c0_i32 = arith.constant 0 : i32
    %c0_i32_0 = arith.constant 0 : i32
    %c0_i32_1 = arith.constant 0 : i32
    return %c0_i32, %c0_i32_0 : i32, i32
  }
  func.func @transform_22(%arg0: i32) -> (i32, i32) {
    %c0_i32 = arith.constant 0 : i32
    %c0_i32_0 = arith.constant 0 : i32
    %c0_i32_1 = arith.constant 0 : i32
    return %c0_i32, %c0_i32_0 : i32, i32
  }
  func.func @transform_23(%arg0: i32) -> (i32, i32, i32) {
    %c0_i32 = arith.constant 0 : i32
    %c0_i32_0 = arith.constant 0 : i32
    %c0_i32_1 = arith.constant 0 : i32
    return %arg0, %c0_i32, %c0_i32_0 : i32, i32, i32
  }
}

module attributes {stable_mosaic.version = 11 : i64} {
  func.func @_self_stack_kernel(%arg0: i32, %arg1: i32, %arg2: memref<1x8x32xf32, #tpu.memory_space<vmem>>, %arg3: memref<1x1x32xf32, #tpu.memory_space<vmem>>, %arg4: memref<1x1x32xf32, #tpu.memory_space<vmem>>, %arg5: memref<1x32x96xbf16, #tpu.memory_space<vmem>>, %arg6: memref<1x1x96xf32, #tpu.memory_space<vmem>>, %arg7: memref<1x32x32xbf16, #tpu.memory_space<vmem>>, %arg8: memref<1x1x32xf32, #tpu.memory_space<vmem>>, %arg9: memref<1x1x32xf32, #tpu.memory_space<vmem>>, %arg10: memref<1x1x32xf32, #tpu.memory_space<vmem>>, %arg11: memref<1x32x128xbf16, #tpu.memory_space<vmem>>, %arg12: memref<1x1x128xf32, #tpu.memory_space<vmem>>, %arg13: memref<1x128x32xbf16, #tpu.memory_space<vmem>>, %arg14: memref<1x1x32xf32, #tpu.memory_space<vmem>>, %arg15: memref<1x8x32xf32, #tpu.memory_space<vmem>>, %arg16: memref<8x32xf32, #tpu.memory_space<vmem>>) attributes {dimension_semantics = [#tpu.dimension_semantics<parallel>, #tpu.dimension_semantics<arbitrary>], iteration_bounds = array<i64: 2, 2>, scalar_prefetch = 0 : i64, scratch_operands = 1 : i64, tpu.core_type = #tpu.core_type<tc>, window_params = [{transform_indices = @transform_0, window_bounds = array<i64: 1, 8, 32>}, {transform_indices = @transform_1, window_bounds = array<i64: 1, 1, 32>}, {transform_indices = @transform_2, window_bounds = array<i64: 1, 1, 32>}, {transform_indices = @transform_3, window_bounds = array<i64: 1, 32, 96>}, {transform_indices = @transform_4, window_bounds = array<i64: 1, 1, 96>}, {transform_indices = @transform_5, window_bounds = array<i64: 1, 32, 32>}, {transform_indices = @transform_6, window_bounds = array<i64: 1, 1, 32>}, {transform_indices = @transform_7, window_bounds = array<i64: 1, 1, 32>}, {transform_indices = @transform_8, window_bounds = array<i64: 1, 1, 32>}, {transform_indices = @transform_9, window_bounds = array<i64: 1, 32, 128>}, {transform_indices = @transform_10, window_bounds = array<i64: 1, 1, 128>}, {transform_indices = @transform_11, window_bounds = array<i64: 1, 128, 32>}, {transform_indices = @transform_12, window_bounds = array<i64: 1, 1, 32>}, {transform_indices = @transform_13, window_bounds = array<i64: 1, 8, 32>}]} {
    %c0_i32 = arith.constant 0 : i32
    %0 = arith.cmpi eq, %arg1, %c0_i32 : i32
    %1 = arith.extui %0 : i1 to i32
    %c0_i32_0 = arith.constant 0 : i32
    %2 = arith.cmpi ne, %1, %c0_i32_0 : i32
    scf.if %2 {
      %c0_81 = arith.constant 0 : index
      %c0_82 = arith.constant 0 : index
      %c0_83 = arith.constant 0 : index
      %201 = vector.load %arg2[%c0_81, %c0_82, %c0_83] : memref<1x8x32xf32, #tpu.memory_space<vmem>>, vector<1x8x32xf32>
      %202 = vector.shape_cast %201 : vector<1x8x32xf32> to vector<8x32xf32>
      %c0_84 = arith.constant 0 : index
      %c0_85 = arith.constant 0 : index
      %203 = vector.load %arg16[%c0_84, %c0_85] : memref<8x32xf32, #tpu.memory_space<vmem>>, vector<8x32xf32>
      tpu.vector_store %arg16[%c0_84, %c0_85], %202 {strides = array<i32>} : memref<8x32xf32, #tpu.memory_space<vmem>>, vector<8x32xf32>,
    } else {
    }
    %c0 = arith.constant 0 : index
    %c0_1 = arith.constant 0 : index
    %3 = vector.load %arg16[%c0, %c0_1] : memref<8x32xf32, #tpu.memory_space<vmem>>, vector<8x32xf32>
    %c0_2 = arith.constant 0 : index
    %c0_3 = arith.constant 0 : index
    %c0_4 = arith.constant 0 : index
    %4 = vector.load %arg3[%c0_2, %c0_3, %c0_4] : memref<1x1x32xf32, #tpu.memory_space<vmem>>, vector<1x1x32xf32>
    %5 = vector.shape_cast %4 : vector<1x1x32xf32> to vector<1x32xf32>
    %c0_5 = arith.constant 0 : index
    %c0_6 = arith.constant 0 : index
    %c0_7 = arith.constant 0 : index
    %6 = vector.load %arg4[%c0_5, %c0_6, %c0_7] : memref<1x1x32xf32, #tpu.memory_space<vmem>>, vector<1x1x32xf32>
    %7 = vector.shape_cast %6 : vector<1x1x32xf32> to vector<1x32xf32>
    %cst = arith.constant dense<0.000000e+00> : vector<8xf32>
    %8 = vector.multi_reduction <add>, %3, %cst [1] : vector<8x32xf32> to vector<8xf32>
    %9 = vector.shape_cast %8 : vector<8xf32> to vector<8x1xf32>
    %cst_8 = arith.constant 3.200000e+01 : f32
    %10 = vector.broadcast %cst_8 : f32 to vector<8x1xf32>
    %11 = arith.divf %9, %10 : vector<8x1xf32>
    %12 = vector.broadcast %11 : vector<8x1xf32> to vector<8x32xf32>
    %13 = arith.subf %3, %12 : vector<8x32xf32>
    %14 = arith.mulf %13, %13 : vector<8x32xf32>
    %cst_9 = arith.constant dense<0.000000e+00> : vector<8xf32>
    %15 = vector.multi_reduction <add>, %14, %cst_9 [1] : vector<8x32xf32> to vector<8xf32>
    %16 = vector.shape_cast %15 : vector<8xf32> to vector<8x1xf32>
    %cst_10 = arith.constant 3.200000e+01 : f32
    %17 = vector.broadcast %cst_10 : f32 to vector<8x1xf32>
    %18 = arith.divf %16, %17 : vector<8x1xf32>
    %19 = vector.broadcast %11 : vector<8x1xf32> to vector<8x32xf32>
    %20 = arith.subf %3, %19 : vector<8x32xf32>
    %cst_11 = arith.constant 9.99999974E-6 : f32
    %21 = vector.broadcast %cst_11 : f32 to vector<8x1xf32>
    %22 = arith.addf %18, %21 : vector<8x1xf32>
    %23 = math.rsqrt %22 : vector<8x1xf32>
    %24 = vector.broadcast %23 : vector<8x1xf32> to vector<8x32xf32>
    %25 = arith.mulf %20, %24 : vector<8x32xf32>
    %26 = vector.broadcast %5 : vector<1x32xf32> to vector<8x32xf32>
    %27 = arith.mulf %25, %26 : vector<8x32xf32>
    %28 = vector.broadcast %7 : vector<1x32xf32> to vector<8x32xf32>
    %29 = arith.addf %27, %28 : vector<8x32xf32>
    %30 = arith.truncf %29 : vector<8x32xf32> to vector<8x32xbf16>
    %c0_12 = arith.constant 0 : index
    %c0_13 = arith.constant 0 : index
    %c0_14 = arith.constant 0 : index
    %31 = vector.load %arg5[%c0_12, %c0_13, %c0_14] : memref<1x32x96xbf16, #tpu.memory_space<vmem>>, vector<1x32x96xbf16>
    %32 = vector.shape_cast %31 : vector<1x32x96xbf16> to vector<32x96xbf16>
    %cst_15 = arith.constant dense<0.000000e+00> : vector<8x96xf32>
    %33 = tpu.matmul %30, %32, %cst_15 {dimension_numbers = #tpu.dot_dimension_numbers<[1], [0], [0], [1], [0, 0, 1, 1], [], []>} : vector<8x32xbf16>, vector<32x96xbf16>, vector<8x96xf32> -> vector<8x96xf32>
    %c0_16 = arith.constant 0 : index
    %c0_17 = arith.constant 0 : index
    %c0_18 = arith.constant 0 : index
    %34 = vector.load %arg6[%c0_16, %c0_17, %c0_18] : memref<1x1x96xf32, #tpu.memory_space<vmem>>, vector<1x1x96xf32>
    %35 = vector.shape_cast %34 : vector<1x1x96xf32> to vector<1x96xf32>
    %36 = vector.broadcast %35 : vector<1x96xf32> to vector<8x96xf32>
    %37 = arith.addf %33, %36 : vector<8x96xf32>
    %c0_19 = arith.constant 0 : index
    %c0_20 = arith.constant 0 : index
    %c0_21 = arith.constant 0 : index
    %38 = vector.load %arg7[%c0_19, %c0_20, %c0_21] : memref<1x32x32xbf16, #tpu.memory_space<vmem>>, vector<1x32x32xbf16>
    %39 = vector.shape_cast %38 : vector<1x32x32xbf16> to vector<32x32xbf16>
    %c0_22 = arith.constant 0 : index
    %c0_23 = arith.constant 0 : index
    %c0_24 = arith.constant 0 : index
    %40 = vector.load %arg8[%c0_22, %c0_23, %c0_24] : memref<1x1x32xf32, #tpu.memory_space<vmem>>, vector<1x1x32xf32>
    %41 = vector.shape_cast %40 : vector<1x1x32xf32> to vector<1x32xf32>
    %cst_25 = arith.constant 0.000000e+00 : f32
    %42 = vector.broadcast %cst_25 : f32 to vector<8x32xf32>
    %43 = vector.extract_strided_slice %37 {offsets = [0, 0], sizes = [8, 8], strides = [1, 1]} : vector<8x96xf32> to vector<8x8xf32>
    %44 = arith.truncf %43 : vector<8x8xf32> to vector<8x8xbf16>
    %45 = vector.extract_strided_slice %37 {offsets = [0, 8], sizes = [8, 8], strides = [1, 1]} : vector<8x96xf32> to vector<8x8xf32>
    %46 = arith.truncf %45 : vector<8x8xf32> to vector<8x8xbf16>
    %47 = vector.extract_strided_slice %37 {offsets = [0, 16], sizes = [8, 8], strides = [1, 1]} : vector<8x96xf32> to vector<8x8xf32>
    %48 = arith.truncf %47 : vector<8x8xf32> to vector<8x8xbf16>
    %cst_26 = arith.constant dense<0.000000e+00> : vector<8x8xf32>
    %49 = tpu.matmul %44, %46, %cst_26 {dimension_numbers = #tpu.dot_dimension_numbers<[1], [1], [0], [0], [0, 0, 1, 0], [], []>} : vector<8x8xbf16>, vector<8x8xbf16>, vector<8x8xf32> -> vector<8x8xf32>
    %cst_27 = arith.constant 0.353553385 : f32
    %50 = vector.broadcast %cst_27 : f32 to vector<8x8xf32>
    %51 = arith.mulf %49, %50 : vector<8x8xf32>
    %cst_28 = arith.constant dense<0xFF800000> : vector<8xf32>
    %52 = vector.multi_reduction <maximumf>, %51, %cst_28 [1] : vector<8x8xf32> to vector<8xf32>
    %53 = vector.shape_cast %52 : vector<8xf32> to vector<8x1xf32>
    %54 = vector.broadcast %53 : vector<8x1xf32> to vector<8x8xf32>
    %55 = arith.subf %51, %54 : vector<8x8xf32>
    %56 = math.exp %55 : vector<8x8xf32>
    %cst_29 = arith.constant dense<0.000000e+00> : vector<8xf32>
    %57 = vector.multi_reduction <add>, %56, %cst_29 [1] : vector<8x8xf32> to vector<8xf32>
    %58 = vector.shape_cast %57 : vector<8xf32> to vector<8x1xf32>
    %59 = tpu.reciprocal %58 {approx = true} : vector<8x1xf32> -> vector<8x1xf32>
    %60 = vector.broadcast %59 : vector<8x1xf32> to vector<8x8xf32>
    %61 = arith.mulf %56, %60 : vector<8x8xf32>
    %62 = arith.truncf %61 : vector<8x8xf32> to vector<8x8xbf16>
    %cst_30 = arith.constant dense<0.000000e+00> : vector<8x8xf32>
    %63 = tpu.matmul %62, %48, %cst_30 {dimension_numbers = #tpu.dot_dimension_numbers<[1], [0], [0], [1], [0, 0, 1, 1], [], []>} : vector<8x8xbf16>, vector<8x8xbf16>, vector<8x8xf32> -> vector<8x8xf32>
    %64 = arith.truncf %63 : vector<8x8xf32> to vector<8x8xbf16>
    %65 = vector.extract_strided_slice %39 {offsets = [0, 0], sizes = [8, 32], strides = [1, 1]} : vector<32x32xbf16> to vector<8x32xbf16>
    %cst_31 = arith.constant dense<0.000000e+00> : vector<8x32xf32>
    %66 = tpu.matmul %64, %65, %cst_31 {dimension_numbers = #tpu.dot_dimension_numbers<[1], [0], [0], [1], [0, 0, 1, 1], [], []>} : vector<8x8xbf16>, vector<8x32xbf16>, vector<8x32xf32> -> vector<8x32xf32>
    %67 = arith.addf %42, %66 : vector<8x32xf32>
    %68 = vector.extract_strided_slice %37 {offsets = [0, 8], sizes = [8, 8], strides = [1, 1]} : vector<8x96xf32> to vector<8x8xf32>
    %69 = arith.truncf %68 : vector<8x8xf32> to vector<8x8xbf16>
    %70 = vector.extract_strided_slice %37 {offsets = [0, 32], sizes = [8, 8], strides = [1, 1]} : vector<8x96xf32> to vector<8x8xf32>
    %71 = arith.truncf %70 : vector<8x8xf32> to vector<8x8xbf16>
    %72 = vector.extract_strided_slice %37 {offsets = [0, 40], sizes = [8, 8], strides = [1, 1]} : vector<8x96xf32> to vector<8x8xf32>
    %73 = arith.truncf %72 : vector<8x8xf32> to vector<8x8xbf16>
    %cst_32 = arith.constant dense<0.000000e+00> : vector<8x8xf32>
    %74 = tpu.matmul %69, %71, %cst_32 {dimension_numbers = #tpu.dot_dimension_numbers<[1], [1], [0], [0], [0, 0, 1, 0], [], []>} : vector<8x8xbf16>, vector<8x8xbf16>, vector<8x8xf32> -> vector<8x8xf32>
    %cst_33 = arith.constant 0.353553385 : f32
    %75 = vector.broadcast %cst_33 : f32 to vector<8x8xf32>
    %76 = arith.mulf %74, %75 : vector<8x8xf32>
    %cst_34 = arith.constant dense<0xFF800000> : vector<8xf32>
    %77 = vector.multi_reduction <maximumf>, %76, %cst_34 [1] : vector<8x8xf32> to vector<8xf32>
    %78 = vector.shape_cast %77 : vector<8xf32> to vector<8x1xf32>
    %79 = vector.broadcast %78 : vector<8x1xf32> to vector<8x8xf32>
    %80 = arith.subf %76, %79 : vector<8x8xf32>
    %81 = math.exp %80 : vector<8x8xf32>
    %cst_35 = arith.constant dense<0.000000e+00> : vector<8xf32>
    %82 = vector.multi_reduction <add>, %81, %cst_35 [1] : vector<8x8xf32> to vector<8xf32>
    %83 = vector.shape_cast %82 : vector<8xf32> to vector<8x1xf32>
    %84 = tpu.reciprocal %83 {approx = true} : vector<8x1xf32> -> vector<8x1xf32>
    %85 = vector.broadcast %84 : vector<8x1xf32> to vector<8x8xf32>
    %86 = arith.mulf %81, %85 : vector<8x8xf32>
    %87 = arith.truncf %86 : vector<8x8xf32> to vector<8x8xbf16>
    %cst_36 = arith.constant dense<0.000000e+00> : vector<8x8xf32>
    %88 = tpu.matmul %87, %73, %cst_36 {dimension_numbers = #tpu.dot_dimension_numbers<[1], [0], [0], [1], [0, 0, 1, 1], [], []>} : vector<8x8xbf16>, vector<8x8xbf16>, vector<8x8xf32> -> vector<8x8xf32>
    %89 = arith.truncf %88 : vector<8x8xf32> to vector<8x8xbf16>
    %90 = vector.extract_strided_slice %39 {offsets = [8, 0], sizes = [8, 32], strides = [1, 1]} : vector<32x32xbf16> to vector<8x32xbf16>
    %cst_37 = arith.constant dense<0.000000e+00> : vector<8x32xf32>
    %91 = tpu.matmul %89, %90, %cst_37 {dimension_numbers = #tpu.dot_dimension_numbers<[1], [0], [0], [1], [0, 0, 1, 1], [], []>} : vector<8x8xbf16>, vector<8x32xbf16>, vector<8x32xf32> -> vector<8x32xf32>
    %92 = arith.addf %67, %91 : vector<8x32xf32>
    %93 = vector.extract_strided_slice %37 {offsets = [0, 16], sizes = [8, 8], strides = [1, 1]} : vector<8x96xf32> to vector<8x8xf32>
    %94 = arith.truncf %93 : vector<8x8xf32> to vector<8x8xbf16>
    %95 = vector.extract_strided_slice %37 {offsets = [0, 56], sizes = [8, 8], strides = [1, 1]} : vector<8x96xf32> to vector<8x8xf32>
    %96 = arith.truncf %95 : vector<8x8xf32> to vector<8x8xbf16>
    %97 = vector.extract_strided_slice %37 {offsets = [0, 64], sizes = [8, 8], strides = [1, 1]} : vector<8x96xf32> to vector<8x8xf32>
    %98 = arith.truncf %97 : vector<8x8xf32> to vector<8x8xbf16>
    %cst_38 = arith.constant dense<0.000000e+00> : vector<8x8xf32>
    %99 = tpu.matmul %94, %96, %cst_38 {dimension_numbers = #tpu.dot_dimension_numbers<[1], [1], [0], [0], [0, 0, 1, 0], [], []>} : vector<8x8xbf16>, vector<8x8xbf16>, vector<8x8xf32> -> vector<8x8xf32>
    %cst_39 = arith.constant 0.353553385 : f32
    %100 = vector.broadcast %cst_39 : f32 to vector<8x8xf32>
    %101 = arith.mulf %99, %100 : vector<8x8xf32>
    %cst_40 = arith.constant dense<0xFF800000> : vector<8xf32>
    %102 = vector.multi_reduction <maximumf>, %101, %cst_40 [1] : vector<8x8xf32> to vector<8xf32>
    %103 = vector.shape_cast %102 : vector<8xf32> to vector<8x1xf32>
    %104 = vector.broadcast %103 : vector<8x1xf32> to vector<8x8xf32>
    %105 = arith.subf %101, %104 : vector<8x8xf32>
    %106 = math.exp %105 : vector<8x8xf32>
    %cst_41 = arith.constant dense<0.000000e+00> : vector<8xf32>
    %107 = vector.multi_reduction <add>, %106, %cst_41 [1] : vector<8x8xf32> to vector<8xf32>
    %108 = vector.shape_cast %107 : vector<8xf32> to vector<8x1xf32>
    %109 = tpu.reciprocal %108 {approx = true} : vector<8x1xf32> -> vector<8x1xf32>
    %110 = vector.broadcast %109 : vector<8x1xf32> to vector<8x8xf32>
    %111 = arith.mulf %106, %110 : vector<8x8xf32>
    %112 = arith.truncf %111 : vector<8x8xf32> to vector<8x8xbf16>
    %cst_42 = arith.constant dense<0.000000e+00> : vector<8x8xf32>
    %113 = tpu.matmul %112, %98, %cst_42 {dimension_numbers = #tpu.dot_dimension_numbers<[1], [0], [0], [1], [0, 0, 1, 1], [], []>} : vector<8x8xbf16>, vector<8x8xbf16>, vector<8x8xf32> -> vector<8x8xf32>
    %114 = arith.truncf %113 : vector<8x8xf32> to vector<8x8xbf16>
    %115 = vector.extract_strided_slice %39 {offsets = [16, 0], sizes = [8, 32], strides = [1, 1]} : vector<32x32xbf16> to vector<8x32xbf16>
    %cst_43 = arith.constant dense<0.000000e+00> : vector<8x32xf32>
    %116 = tpu.matmul %114, %115, %cst_43 {dimension_numbers = #tpu.dot_dimension_numbers<[1], [0], [0], [1], [0, 0, 1, 1], [], []>} : vector<8x8xbf16>, vector<8x32xbf16>, vector<8x32xf32> -> vector<8x32xf32>
    %117 = arith.addf %92, %116 : vector<8x32xf32>
    %118 = vector.extract_strided_slice %37 {offsets = [0, 24], sizes = [8, 8], strides = [1, 1]} : vector<8x96xf32> to vector<8x8xf32>
    %119 = arith.truncf %118 : vector<8x8xf32> to vector<8x8xbf16>
    %120 = vector.extract_strided_slice %37 {offsets = [0, 80], sizes = [8, 8], strides = [1, 1]} : vector<8x96xf32> to vector<8x8xf32>
    %121 = arith.truncf %120 : vector<8x8xf32> to vector<8x8xbf16>
    %122 = vector.extract_strided_slice %37 {offsets = [0, 88], sizes = [8, 8], strides = [1, 1]} : vector<8x96xf32> to vector<8x8xf32>
    %123 = arith.truncf %122 : vector<8x8xf32> to vector<8x8xbf16>
    %cst_44 = arith.constant dense<0.000000e+00> : vector<8x8xf32>
    %124 = tpu.matmul %119, %121, %cst_44 {dimension_numbers = #tpu.dot_dimension_numbers<[1], [1], [0], [0], [0, 0, 1, 0], [], []>} : vector<8x8xbf16>, vector<8x8xbf16>, vector<8x8xf32> -> vector<8x8xf32>
    %cst_45 = arith.constant 0.353553385 : f32
    %125 = vector.broadcast %cst_45 : f32 to vector<8x8xf32>
    %126 = arith.mulf %124, %125 : vector<8x8xf32>
    %cst_46 = arith.constant dense<0xFF800000> : vector<8xf32>
    %127 = vector.multi_reduction <maximumf>, %126, %cst_46 [1] : vector<8x8xf32> to vector<8xf32>
    %128 = vector.shape_cast %127 : vector<8xf32> to vector<8x1xf32>
    %129 = vector.broadcast %128 : vector<8x1xf32> to vector<8x8xf32>
    %130 = arith.subf %126, %129 : vector<8x8xf32>
    %131 = math.exp %130 : vector<8x8xf32>
    %cst_47 = arith.constant dense<0.000000e+00> : vector<8xf32>
    %132 = vector.multi_reduction <add>, %131, %cst_47 [1] : vector<8x8xf32> to vector<8xf32>
    %133 = vector.shape_cast %132 : vector<8xf32> to vector<8x1xf32>
    %134 = tpu.reciprocal %133 {approx = true} : vector<8x1xf32> -> vector<8x1xf32>
    %135 = vector.broadcast %134 : vector<8x1xf32> to vector<8x8xf32>
    %136 = arith.mulf %131, %135 : vector<8x8xf32>
    %137 = arith.truncf %136 : vector<8x8xf32> to vector<8x8xbf16>
    %cst_48 = arith.constant dense<0.000000e+00> : vector<8x8xf32>
    %138 = tpu.matmul %137, %123, %cst_48 {dimension_numbers = #tpu.dot_dimension_numbers<[1], [0], [0], [1], [0, 0, 1, 1], [], []>} : vector<8x8xbf16>, vector<8x8xbf16>, vector<8x8xf32> -> vector<8x8xf32>
    %139 = arith.truncf %138 : vector<8x8xf32> to vector<8x8xbf16>
    %140 = vector.extract_strided_slice %39 {offsets = [24, 0], sizes = [8, 32], strides = [1, 1]} : vector<32x32xbf16> to vector<8x32xbf16>
    %cst_49 = arith.constant dense<0.000000e+00> : vector<8x32xf32>
    %141 = tpu.matmul %139, %140, %cst_49 {dimension_numbers = #tpu.dot_dimension_numbers<[1], [0], [0], [1], [0, 0, 1, 1], [], []>} : vector<8x8xbf16>, vector<8x32xbf16>, vector<8x32xf32> -> vector<8x32xf32>
    %142 = arith.addf %117, %141 : vector<8x32xf32>
    %143 = vector.broadcast %41 : vector<1x32xf32> to vector<8x32xf32>
    %144 = arith.addf %142, %143 : vector<8x32xf32>
    %145 = arith.addf %3, %144 : vector<8x32xf32>
    %c0_50 = arith.constant 0 : index
    %c0_51 = arith.constant 0 : index
    %c0_52 = arith.constant 0 : index
    %146 = vector.load %arg9[%c0_50, %c0_51, %c0_52] : memref<1x1x32xf32, #tpu.memory_space<vmem>>, vector<1x1x32xf32>
    %147 = vector.shape_cast %146 : vector<1x1x32xf32> to vector<1x32xf32>
    %c0_53 = arith.constant 0 : index
    %c0_54 = arith.constant 0 : index
    %c0_55 = arith.constant 0 : index
    %148 = vector.load %arg10[%c0_53, %c0_54, %c0_55] : memref<1x1x32xf32, #tpu.memory_space<vmem>>, vector<1x1x32xf32>
    %149 = vector.shape_cast %148 : vector<1x1x32xf32> to vector<1x32xf32>
    %cst_56 = arith.constant dense<0.000000e+00> : vector<8xf32>
    %150 = vector.multi_reduction <add>, %145, %cst_56 [1] : vector<8x32xf32> to vector<8xf32>
    %151 = vector.shape_cast %150 : vector<8xf32> to vector<8x1xf32>
    %cst_57 = arith.constant 3.200000e+01 : f32
    %152 = vector.broadcast %cst_57 : f32 to vector<8x1xf32>
    %153 = arith.divf %151, %152 : vector<8x1xf32>
    %154 = vector.broadcast %153 : vector<8x1xf32> to vector<8x32xf32>
    %155 = arith.subf %145, %154 : vector<8x32xf32>
    %156 = arith.mulf %155, %155 : vector<8x32xf32>
    %cst_58 = arith.constant dense<0.000000e+00> : vector<8xf32>
    %157 = vector.multi_reduction <add>, %156, %cst_58 [1] : vector<8x32xf32> to vector<8xf32>
    %158 = vector.shape_cast %157 : vector<8xf32> to vector<8x1xf32>
    %cst_59 = arith.constant 3.200000e+01 : f32
    %159 = vector.broadcast %cst_59 : f32 to vector<8x1xf32>
    %160 = arith.divf %158, %159 : vector<8x1xf32>
    %161 = vector.broadcast %153 : vector<8x1xf32> to vector<8x32xf32>
    %162 = arith.subf %145, %161 : vector<8x32xf32>
    %cst_60 = arith.constant 9.99999974E-6 : f32
    %163 = vector.broadcast %cst_60 : f32 to vector<8x1xf32>
    %164 = arith.addf %160, %163 : vector<8x1xf32>
    %165 = math.rsqrt %164 : vector<8x1xf32>
    %166 = vector.broadcast %165 : vector<8x1xf32> to vector<8x32xf32>
    %167 = arith.mulf %162, %166 : vector<8x32xf32>
    %168 = vector.broadcast %147 : vector<1x32xf32> to vector<8x32xf32>
    %169 = arith.mulf %167, %168 : vector<8x32xf32>
    %170 = vector.broadcast %149 : vector<1x32xf32> to vector<8x32xf32>
    %171 = arith.addf %169, %170 : vector<8x32xf32>
    %172 = arith.truncf %171 : vector<8x32xf32> to vector<8x32xbf16>
    %c0_61 = arith.constant 0 : index
    %c0_62 = arith.constant 0 : index
    %c0_63 = arith.constant 0 : index
    %173 = vector.load %arg11[%c0_61, %c0_62, %c0_63] : memref<1x32x128xbf16, #tpu.memory_space<vmem>>, vector<1x32x128xbf16>
    %174 = vector.shape_cast %173 : vector<1x32x128xbf16> to vector<32x128xbf16>
    %cst_64 = arith.constant dense<0.000000e+00> : vector<8x128xf32>
    %175 = tpu.matmul %172, %174, %cst_64 {dimension_numbers = #tpu.dot_dimension_numbers<[1], [0], [0], [1], [0, 0, 1, 1], [], []>} : vector<8x32xbf16>, vector<32x128xbf16>, vector<8x128xf32> -> vector<8x128xf32>
    %c0_65 = arith.constant 0 : index
    %c0_66 = arith.constant 0 : index
    %c0_67 = arith.constant 0 : index
    %176 = vector.load %arg12[%c0_65, %c0_66, %c0_67] : memref<1x1x128xf32, #tpu.memory_space<vmem>>, vector<1x1x128xf32>
    %177 = vector.shape_cast %176 : vector<1x1x128xf32> to vector<1x128xf32>
    %178 = vector.broadcast %177 : vector<1x128xf32> to vector<8x128xf32>
    %179 = arith.addf %175, %178 : vector<8x128xf32>
    %cst_68 = arith.constant 5.000000e-01 : f32
    %180 = vector.broadcast %cst_68 : f32 to vector<8x128xf32>
    %181 = arith.mulf %180, %179 : vector<8x128xf32>
    %cst_69 = arith.constant 0.707106769 : f32
    %182 = vector.broadcast %cst_69 : f32 to vector<8x128xf32>
    %183 = arith.mulf %179, %182 : vector<8x128xf32>
    %184 = math.erf %183 : vector<8x128xf32>
    %cst_70 = arith.constant 1.000000e+00 : f32
    %185 = vector.broadcast %cst_70 : f32 to vector<8x128xf32>
    %186 = arith.addf %185, %184 : vector<8x128xf32>
    %187 = arith.mulf %181, %186 : vector<8x128xf32>
    %188 = arith.truncf %187 : vector<8x128xf32> to vector<8x128xbf16>
    %c0_71 = arith.constant 0 : index
    %c0_72 = arith.constant 0 : index
    %c0_73 = arith.constant 0 : index
    %189 = vector.load %arg13[%c0_71, %c0_72, %c0_73] : memref<1x128x32xbf16, #tpu.memory_space<vmem>>, vector<1x128x32xbf16>
    %190 = vector.shape_cast %189 : vector<1x128x32xbf16> to vector<128x32xbf16>
    %cst_74 = arith.constant dense<0.000000e+00> : vector<8x32xf32>
    %191 = tpu.matmul %188, %190, %cst_74 {dimension_numbers = #tpu.dot_dimension_numbers<[1], [0], [0], [1], [0, 0, 1, 1], [], []>} : vector<8x128xbf16>, vector<128x32xbf16>, vector<8x32xf32> -> vector<8x32xf32>
    %c0_75 = arith.constant 0 : index
    %c0_76 = arith.constant 0 : index
    %c0_77 = arith.constant 0 : index
    %192 = vector.load %arg14[%c0_75, %c0_76, %c0_77] : memref<1x1x32xf32, #tpu.memory_space<vmem>>, vector<1x1x32xf32>
    %193 = vector.shape_cast %192 : vector<1x1x32xf32> to vector<1x32xf32>
    %194 = vector.broadcast %193 : vector<1x32xf32> to vector<8x32xf32>
    %195 = arith.addf %191, %194 : vector<8x32xf32>
    %196 = arith.addf %145, %195 : vector<8x32xf32>
    %c0_78 = arith.constant 0 : index
    %c0_79 = arith.constant 0 : index
    %197 = vector.load %arg16[%c0_78, %c0_79] : memref<8x32xf32, #tpu.memory_space<vmem>>, vector<8x32xf32>
    tpu.vector_store %arg16[%c0_78, %c0_79], %196 {strides = array<i32>} : memref<8x32xf32, #tpu.memory_space<vmem>>, vector<8x32xf32>,
    %c1_i32 = arith.constant 1 : i32
    %198 = arith.cmpi eq, %arg1, %c1_i32 : i32
    %199 = arith.extui %198 : i1 to i32
    %c0_i32_80 = arith.constant 0 : i32
    %200 = arith.cmpi ne, %199, %c0_i32_80 : i32
    scf.if %200 {
      %c0_81 = arith.constant 0 : index
      %c0_82 = arith.constant 0 : index
      %201 = vector.load %arg16[%c0_81, %c0_82] : memref<8x32xf32, #tpu.memory_space<vmem>>, vector<8x32xf32>
      %c0_83 = arith.constant 0 : index
      %c0_84 = arith.constant 0 : index
      %c0_85 = arith.constant 0 : index
      %202 = vector.load %arg15[%c0_83, %c0_84, %c0_85] : memref<1x8x32xf32, #tpu.memory_space<vmem>>, vector<1x8x32xf32>
      %203 = vector.shape_cast %202 : vector<1x8x32xf32> to vector<8x32xf32>
      %204 = vector.shape_cast %201 : vector<8x32xf32> to vector<1x8x32xf32>
      tpu.vector_store %arg15[%c0_83, %c0_84, %c0_85], %204 {strides = array<i32>} : memref<1x8x32xf32, #tpu.memory_space<vmem>>, vector<1x8x32xf32>,
    } else {
    }
    return
  }
  func.func @transform_0(%arg0: i32, %arg1: i32) -> (i32, i32, i32) {
    %c0_i32 = arith.constant 0 : i32
    %c0_i32_0 = arith.constant 0 : i32
    %c0_i32_1 = arith.constant 0 : i32
    return %arg0, %c0_i32, %c0_i32_0 : i32, i32, i32
  }
  func.func @transform_1(%arg0: i32, %arg1: i32) -> (i32, i32, i32) {
    %c0_i32 = arith.constant 0 : i32
    %c0_i32_0 = arith.constant 0 : i32
    %c0_i32_1 = arith.constant 0 : i32
    return %arg1, %c0_i32, %c0_i32_0 : i32, i32, i32
  }
  func.func @transform_2(%arg0: i32, %arg1: i32) -> (i32, i32, i32) {
    %c0_i32 = arith.constant 0 : i32
    %c0_i32_0 = arith.constant 0 : i32
    %c0_i32_1 = arith.constant 0 : i32
    return %arg1, %c0_i32, %c0_i32_0 : i32, i32, i32
  }
  func.func @transform_3(%arg0: i32, %arg1: i32) -> (i32, i32, i32) {
    %c0_i32 = arith.constant 0 : i32
    %c0_i32_0 = arith.constant 0 : i32
    %c0_i32_1 = arith.constant 0 : i32
    return %arg1, %c0_i32, %c0_i32_0 : i32, i32, i32
  }
  func.func @transform_4(%arg0: i32, %arg1: i32) -> (i32, i32, i32) {
    %c0_i32 = arith.constant 0 : i32
    %c0_i32_0 = arith.constant 0 : i32
    %c0_i32_1 = arith.constant 0 : i32
    return %arg1, %c0_i32, %c0_i32_0 : i32, i32, i32
  }
  func.func @transform_5(%arg0: i32, %arg1: i32) -> (i32, i32, i32) {
    %c0_i32 = arith.constant 0 : i32
    %c0_i32_0 = arith.constant 0 : i32
    %c0_i32_1 = arith.constant 0 : i32
    return %arg1, %c0_i32, %c0_i32_0 : i32, i32, i32
  }
  func.func @transform_6(%arg0: i32, %arg1: i32) -> (i32, i32, i32) {
    %c0_i32 = arith.constant 0 : i32
    %c0_i32_0 = arith.constant 0 : i32
    %c0_i32_1 = arith.constant 0 : i32
    return %arg1, %c0_i32, %c0_i32_0 : i32, i32, i32
  }
  func.func @transform_7(%arg0: i32, %arg1: i32) -> (i32, i32, i32) {
    %c0_i32 = arith.constant 0 : i32
    %c0_i32_0 = arith.constant 0 : i32
    %c0_i32_1 = arith.constant 0 : i32
    return %arg1, %c0_i32, %c0_i32_0 : i32, i32, i32
  }
  func.func @transform_8(%arg0: i32, %arg1: i32) -> (i32, i32, i32) {
    %c0_i32 = arith.constant 0 : i32
    %c0_i32_0 = arith.constant 0 : i32
    %c0_i32_1 = arith.constant 0 : i32
    return %arg1, %c0_i32, %c0_i32_0 : i32, i32, i32
  }
  func.func @transform_9(%arg0: i32, %arg1: i32) -> (i32, i32, i32) {
    %c0_i32 = arith.constant 0 : i32
    %c0_i32_0 = arith.constant 0 : i32
    %c0_i32_1 = arith.constant 0 : i32
    return %arg1, %c0_i32, %c0_i32_0 : i32, i32, i32
  }
  func.func @transform_10(%arg0: i32, %arg1: i32) -> (i32, i32, i32) {
    %c0_i32 = arith.constant 0 : i32
    %c0_i32_0 = arith.constant 0 : i32
    %c0_i32_1 = arith.constant 0 : i32
    return %arg1, %c0_i32, %c0_i32_0 : i32, i32, i32
  }
  func.func @transform_11(%arg0: i32, %arg1: i32) -> (i32, i32, i32) {
    %c0_i32 = arith.constant 0 : i32
    %c0_i32_0 = arith.constant 0 : i32
    %c0_i32_1 = arith.constant 0 : i32
    return %arg1, %c0_i32, %c0_i32_0 : i32, i32, i32
  }
  func.func @transform_12(%arg0: i32, %arg1: i32) -> (i32, i32, i32) {
    %c0_i32 = arith.constant 0 : i32
    %c0_i32_0 = arith.constant 0 : i32
    %c0_i32_1 = arith.constant 0 : i32
    return %arg1, %c0_i32, %c0_i32_0 : i32, i32, i32
  }
  func.func @transform_13(%arg0: i32, %arg1: i32) -> (i32, i32, i32) {
    %c0_i32 = arith.constant 0 : i32
    %c0_i32_0 = arith.constant 0 : i32
    %c0_i32_1 = arith.constant 0 : i32
    return %arg0, %c0_i32, %c0_i32_0 : i32, i32, i32
  }
}

</mosaic_0001>

<bundles_post_ra>
// kernel: cross_attention_encoder_forward.3
= control target key start
LH: loop header
LB: loop body
LE: loop exit
PB: predicated region body
PF: predicated region fallthrough
CT: control target
= control target key end

     0   :  { %s2683_s0 = inlined_call_operand.vmem [shape: f32[2,8,32], index: 0, kind: input, shape index: {}]   ;;  %s2684_s1 = inlined_call_operand.vmem [shape: f32[2,1,32], index: 1, kind: input, shape index: {}]   ;;  %s2685_s2 = inlined_call_operand.vmem [shape: f32[2,1,32], index: 2, kind: input, shape index: {}]   ;;  %s2686_s3 = inlined_call_operand.vmem [shape: bf16[2,32,96], index: 3, kind: input, shape index: {}]   ;;  %s2687_s4 = inlined_call_operand.vmem [shape: f32[2,1,96], index: 4, kind: input, shape index: {}]   ;;  %s2688_s5 = inlined_call_operand.vmem [shape: bf16[2,32,32], index: 5, kind: input, shape index: {}]   ;;  %s2689_s6 = inlined_call_operand.vmem [shape: f32[2,1,32], index: 6, kind: input, shape index: {}]   ;;  %s2690_s7 = inlined_call_operand.vmem [shape: f32[2,1,32], index: 7, kind: input, shape index: {}]   ;;  %s2691_s8 = inlined_call_operand.vmem [shape: f32[2,1,32], index: 8, kind: input, shape index: {}]   ;;  %s2692_s9 = inlined_call_operand.vmem [shape: bf16[2,32,128], index: 9, kind: input, shape index: {}]   ;;  %s2693_s10 = inlined_call_operand.vmem [shape: f32[2,1,128], index: 10, kind: input, shape index: {}]   ;;  %s2694_s11 = inlined_call_operand.vmem [shape: bf16[2,128,32], index: 11, kind: input, shape index: {}]   ;;  %s2695_s12 = inlined_call_operand.vmem [shape: f32[2,1,32], index: 12, kind: input, shape index: {}]   ;;  %s2696_s13 = inlined_call_operand.hbm [shape: f32[2,8,32], index: 13, kind: output, shape index: {}]  }
   0x1   :  { %2712 = sst [smem:[#allocation19_spill]] %s2683_s0 }
   0x2   :  { %2713 = sst [smem:[#allocation20_spill]] %s2685_s2 }
   0x3   :  { %2714 = sst [smem:[#allocation21_spill]] %s2686_s3 }
   0x4   :  { %2715 = sst [smem:[#allocation22_spill]] %s2688_s5 }
   0x5   :  { %2716 = sst [smem:[#allocation23_spill]] %s2696_s13 }
   0x6   :  { %18 = vsyncpa [#allocation4], 0 }
   0x7   :  { %20 = vsyncpa [#allocation4 + $0x1], 0  ;;  %s2311_s25 = smov 0   ;;  %s2313_s26 = smov 0  }
   0x8   :  { %s2315_s27 = smov 0   ;;  %s2317_s28 = smov 0  }
   0x9   :  { %s2319_s29 = smov 0   ;;  %s2321_s30 = smov 0  }
   0xa   :  { %s2323_s14 = smov 0   ;;  %s2325_s15 = smov 0  }
   0xb LB: > { %2717 = sst [smem:[#allocation6_spill]] %s2199_s25  ;;  %s1813_s16 = sadd.s32 4294967295, %s2227_s15   ;;  %s2227_s15 = sphi %s2325_s15, %s26_s15   ;;  %s2223_s14 = sphi %s2323_s14, %s2759_s14   ;;  %s2219_s30 = sphi %s2321_s30, %s2758_s30   ;;  %s2215_s29 = sphi %s2319_s29, %s2757_s29   ;;  %s2211_s28 = sphi %s2317_s28, %s2756_s28   ;;  %s2207_s27 = sphi %s2315_s27, %s2755_s27   ;;  %s2203_s26 = sphi %s2313_s26, %s2754_s26   ;;  %s2199_s25 = sphi %s2311_s25, %s2753_s25  }
   0xc   : > { %2718 = sst [smem:[#allocation7_spill]] %s2203_s26  ;;  %s1814_s17 = sadd.s32 4294967294, %s2227_s15  }
   0xd   : > { %2719 = sst [smem:[#allocation8_spill]] %s2207_s27  ;;  %s35_s18 = sadd.s32 1, %s2219_s30 }
   0xe   : > { %2720 = sst [smem:[#allocation9_spill]] %s2211_s28  ;;  %p36_p0 = scmp.ge.s32.totalorder %s35_s18, 2 }
   0xf   : > { %2721 = sst [smem:[#allocation10_spill]] %s2215_s29  ;;  %s38_s19 = sadd.s32 1, %s2223_s14 }
  0x10   : > { %2722 = sst [smem:[#allocation11_spill]] %s2219_s30  ;;  %p393_p1 = scmp.ne.s32.totalorder %s2207_s27, %s2203_s26 }
  0x11   : > { %2723 = sst [smem:[#allocation12_spill]] %s2223_s14  ;;  %p394_p2 = scmp.eq.s32.totalorder %s1813_s16, 3 }
  0x12   : > { %2724 = sst [smem:[#allocation13_spill]] %s2227_s15  ;;  %s2761_s18 = smov (%p36_p0, %s35_s18), 0 }
  0x13   : > { %2725 = sst [smem:[#allocation14_spill]] %s2761_s18  ;;  %s2763_s19 = smov (!%p36_p0, %s38_s19), %s2223_s14 }
  0x14   : > { %p2360_p3 = por %p394_p2, %p393_p1  ;;  %p399_p4 = scmp.ne.s32.totalorder %s2203_s26, %s2199_s25 }
  0x15   : > { %p40_p5 = scmp.ge.s32.totalorder %s2763_s19, 2  ;;  %p400_p6 = scmp.eq.s32.totalorder %s1814_s17, 3 }
  0x16   : > { %s2726_s20 = scalar_select %p2360_p3, 1, 0 }
  0x17   : > { %p1817_p7 = scmp.ge.s32.totalorder %s2227_s15, 1  ;;  %p505_p8 = scmp.lt.s32.totalorder %s2227_s15, 5 }
  0x18   : > { %2727 = sst [smem:[#allocation15_spill]] %s2726_s20  ;;  %s2765_s19 = smov (%p40_p5, %s2763_s19), 0 }
  0x19   : > { %2728 = sst [smem:[#allocation16_spill]] %s2765_s19  ;;  %p2370_p9 = por %p400_p6, %p399_p4 }
  0x1a   : > { %p506_p10 = pnand %p1817_p7, %p505_p8  ;;  %s380_s22 = ssub.s32 %s2223_s14, %s2765_s19 }
  0x1b   : > { %s2729_s21 = scalar_select %p2370_p9, 1, 0 }
  0x1c   : > { %s383_s23 = sadd.s32 1, %s2207_s27  ;;  %p381_p11 = scmp.eq.s32.totalorder %s380_s22, 0 }
  0x1d   : > { %2730 = sst [smem:[#allocation17_spill]] %s2729_s21  ;;  %509 = sbr.rel (%p506_p10) target bundleno = 4099 (0x1003), region = 72 }
  0x1e   : > { %s2378_s24 = scalar_select %p381_p11, %s2207_s27, %s383_s23  }
  0x1f   : > { %s2699_s16 = sand.u32 (!%p506_p10), 1, %s2203_s26   ;;  %p592_p12 = scmp.lt.s32.totalorder (!%p506_p10), %s2215_s29, 1 }
  0x20   : > { %2731 = sst [smem:[#allocation18_spill]] %s2378_s24  ;;  %s2384_s17 = sshll.u32 (!%p506_p10), %s2699_s16, 3 }
  0x21   : > { %p596_p13 = scmp.lt.s32.totalorder (!%p506_p10), %s2211_s28, 1  ;;  %s2732_s0 = sld [smem:[#allocation19_spill]] (!%p506_p10) }
  0x22   : > { %s593_s18 = scalar_select %p592_p12, %s2215_s29, 1 }
  0x23   : > { %s2389_s30 = scalar_select %p596_p13, %s2211_s28, 1 }
  0x24   : > { %s1819_s22 = sshll.u32 %s593_s18, 3  ;;  %s2734_s3 = sld [smem:[#allocation21_spill]] }
  0x25   : > { %s1868_s13 = sshll.u32 %s2389_s30, 4  ;;  %s2735_s5 = sld [smem:[#allocation22_spill]] }
  0x26   : > { %s2432_s18 = scalar_lea.vmem %s2692_s9, %s1868_s13  ;;  %s631_s19 = scalar_lea.vmem %s2693_s10, %s2389_s30 }
  0x27   : > { %s595_s16 = scalar_lea.vmem %s2732_s0, %s1819_s22  ;;  %s639_s25 = scalar_lea.vmem %s2695_s12, %s2389_s30 }
  0x28   : > { %s591_s26 = scalar_lea.vmem [#allocation3], %s2384_s17  ;;  %s2736_s20 = sld [smem:[#allocation9_spill]] }
  0x2a   : > { %s2406_s29 = scalar_lea.vmem %s2734_s3, %s1868_s13  ;;  %s623_s3 = scalar_lea.vmem %s2691_s8, %s2389_s30 }
  0x2b   : > { %s2415_s0 = scalar_lea.vmem %s2735_s5, %s1868_s13  ;;  %s1871_s5 = sshll.u32 %s2389_s30, 6 }
  0x2c   : > { %s2446_s27 = scalar_lea.vmem %s2694_s11, %s1871_s5 }
  0x2e   : > { %p1828_p0 = scmp.ne.s32.totalorder %s2736_s20, 0 }
  0x30   : > { %644 = sbr.rel (%p1828_p0) target bundleno = 55 (0x37), region = 76 }
  0x35   : > { %v645_v0 = vld [vmem:[%s595_s16] sm:$0xff]  ;;  %vm646_vm0 = vcmask 261120  }
  0x36   : > { %647 = vst.msk [vmem:[#allocation2] sm:$0xff] %vm646_vm0, %v645_v0 }
  0x37 PF: > { %vm651_vm1 = vcmask 261120   ;;  %v2101_v8 = vld [vmem:[%s2406_s29 + $0x8] sm:$0xff]   ;;  %v2229_v9 = vmov 0.0   ;;  %vm2230_vm2 = vmmov 0   ;;  %v2102_v10 = vld [vmem:[%s2406_s29] sm:$0xff]   ;;  %s2737_s13 = scalar_lea.vmem %s2684_s1, %s2389_s30  ;;  %s2738_s28 = sld [smem:[#allocation20_spill]] }
  0x38   : > { %1911 = vmatprep.subr.bf16.mxu1 %v2229_v9  ;;  %1915 = vmatprep.mubr.msk.bf16.mxu1 %vm2230_vm2, %v2229_v9  ;;  %v1829_v15 = vld [vmem:[%s2737_s13] ss:$0 sm:$0xff]  ;;  %s2740_s24 = scalar_lea.vmem %s2687_s4, %s2389_s30  ;;  %s2231_s15 = smov 112   ;;  %vm756_vm3 = vcmask 64512   ;;  %vm821_vm4 = vcmask 1043456  }
  0x39   : > { %1912 = vmatpush3.bf16.msra.mxu1 %v2101_v8  ;;  %1937 = vmatprep.subr.bf16.mxu0 %v2229_v9  ;;  %v1831_v21 = vld [vmem:[%s2740_s24] ss:$0 sm:$0xff]  ;;  %s2232_s21 = smov 120   ;;  %s2233_s20 = smov 96   ;;  %v748_v0 = vld [vmem:[%s2415_s0 + $0x4] sm:$0xf] }
  0x3a   : > { %1913 = vmatprep.subr.bf16.mxu1 %v2229_v9  ;;  %1939 = vmatprep.mubr.msk.bf16.mxu0 %vm2230_vm2, %v2229_v9  ;;  %s2234_s2 = smov 64   ;;  %s2235_s5 = smov 88  }
  0x3b   : > { %s2236_s13 = smov 72   ;;  %s2237_s29 = smov 48  }
  0x3c   : > { %s2238_s16 = smov 104   ;;  %s2741_s22 = scalar_lea.vmem %s2689_s6, %s2389_s30 }
  0x3d   : > { %v2450_v1 = vld [vmem:[#allocation2] sm:$0xff]  ;;  %1914 = vmatpush3.bf16.msra.mxu1 %v2102_v10  ;;  %s2739_s23 = scalar_lea.vmem %s2738_s28, %s2389_s30  ;;  %s2239_s28 = smov 40  }
  0x3e   : > { %v652_v2 = vsel %vm651_vm1, %v2450_v1, 0.0  ;;  %1919 = vmatprep.subr.bf16.mxu1 %v2229_v9  ;;  %v1830_v17 = vld [vmem:[%s2739_s23] ss:$0 sm:$0xff]  ;;  %s2742_s24 = scalar_lea.vmem %s2690_s7, %s2389_s30 }
  0x3f   : > { %653 = vadd.xlane.f32.xlu0 %v652_v2  ;;  %v977_v2 = vsel %vm821_vm4, %v748_v0, 0 }
  0xc8   : > { %v654_v3 = vpop.xlane.xlu0 %653 }
  0xc9   : > { %v656_v4 = vmul.f32 0.03125, %v654_v3 }
  0xcb   : > { %v657_v5 = vsub.f32 %v2450_v1, %v656_v4 }
  0xcd   : > { %v658_v6 = vmul.f32 %v657_v5, %v657_v5 }
  0xcf   : > { %v659_v7 = vsel %vm651_vm1, %v658_v6, 0.0 }
  0xd0   : > { %660 = vadd.xlane.f32.xlu0 %v659_v7  ;;  %v747_v7 = vld [vmem:[%s2415_s0] sm:$0xf] }
 0x159   : > { %v661_v11 = vpop.xlane.xlu0 %660 }
 0x15a   : > { %v662_v12 = vmul.f32 0.03125, %v661_v11  ;;  %v1023_v11 = vsel %vm821_vm4, %v747_v7, 0 }
 0x15c   : > { %v663_v13 = vadd.f32 1e-05, %v662_v12 }
 0x15e   : > { %2113 = vrsqrt.f32 %v663_v13 }
 0x16b   : > { %v2114_v14 = vpop.eup %2113 }
 0x16c   : > { %v665_v16 = vmul.f32 %v2114_v14, %v657_v5 }
 0x16e   : > { %v672_v18 = vmul.f32 %v1829_v15, %v665_v16 }
 0x170   : > { %v679_v19 = vadd.f32 %v1830_v17, %v672_v18 }
 0x172   : > { %v680_v20 = vpack.c.bf16 %v679_v19, %v679_v19 }
 0x174   : > { %1916 = vmatmul.mubr.msk.bf16.vlgmr.msra.gmra.mxu1 %vm651_vm1, %v680_v20 }
 0x175   : > { %1921 = vmatprep.mubr.msk.bf16.mxu1 %vm2230_vm2, %v2229_v9 }
 0x234   : > { %v741_v22 = vpop.f32.mrf.mxu1 }
 0x235   : > { %v742_v23 = vadd.f32 %v1831_v21, %v741_v22 }
 0x236   : > { %v1917_v24 = vpop.f32.mrf.mxu1 }
 0x237   : > { %v2484_v25 = vpack.c.bf16 %v742_v23, %v742_v23 }
 0x238   : > { %v744_v26 = vpop.f32.mrf.mxu1 }
 0x239   : > { %816 = vrot.lane.b32.xlu0 %v2484_v25, %s2231_s15  ;;  %754 = vrot.lane.b32.xlu1 %v2484_v25, %s2232_s21 }
 0x23a   : > { %v1918_v27 = vpop.f32.mrf.mxu1 }
 0x2ab   : > { %v755_v28 = vpop.permute.xlu1 %754  ;;  %v2490_v30 = vpop.permute.xlu0 %816 }
 0x2ac   : > { %v761_v29 = vsel %vm756_vm3, %v755_v28, 0  ;;  %v823_v31 = vsel %vm821_vm4, %v2490_v30, 0 }
 0x2ad   : > { %1920 = vmatpush3.bf16.xpose.msra.mxu1 %v761_v29 }
 0x2ae   : > { %1925 = vmatprep.subr.bf16.mxu1 %v2229_v9 }
 0x2b4   : > { %1922 = vmatmul.mubr.msk.bf16.vlgmr.msra.gmra.mxu1 %vm756_vm3, %v2484_v25 }
 0x2b5   : > { %1926 = vmatpush3.bf16.msra.mxu1 %v823_v31  ;;  %1927 = vmatprep.mubr.msk.bf16.mxu1 %vm2230_vm2, %v2229_v9 }
 0x2b6   : > { %1931 = vmatprep.subr.bf16.mxu1 %v2229_v9 }
 0x374   : > { %v797_v32 = vpop.f32.mrf.mxu1 }
 0x375   : > { %v803_v33 = vmul.f32 0.35355338, %v797_v32 }
 0x376   : > { %v1923_v34 = vpop.f32.mrf.mxu1 }
 0x377   : > { %v804_v35 = vsel %vm756_vm3, %v803_v33, -inf }
 0x378   : > { %805 = vmax.xlane.f32.xlu1 %v804_v35  ;;  %v800_v36 = vpop.f32.mrf.mxu1 }
 0x37a   : > { %v1924_v37 = vpop.f32.mrf.mxu1 }
 0x401   : > { %v806_v38 = vpop.xlane.xlu1 %805 }
 0x402   : > { %v807_v39 = vsub.f32 %v803_v33, %v806_v38 }
 0x404   : > { %v808_v40 = vmul.f32 1.442695, %v807_v39 }
 0x406   : > { %2115 = vpow2.f32 %v808_v40 }
 0x413   : > { %v2116_v41 = vpop.eup %2115 }
 0x414   : > { %v810_v42 = vsel %vm756_vm3, %v2116_v41, 0.0 }
 0x415   : > { %811 = vadd.xlane.f32.xlu0 %v810_v42 }
 0x42b   : > { %866 = vrot.lane.b32.xlu0 %v2484_v25, %s2233_s20 }
 0x49e   : > { %v812_v43 = vpop.xlane.xlu0 %811 }
 0x49f   : > { %2117 = vrcp.f32 %v812_v43 }
 0x4a2   : > { %v867_v46 = vpop.permute.xlu0 %866 }
 0x4a3   : > { %v869_v48 = vsel %vm756_vm3, %v867_v46, 0 }
 0x4ac   : > { %v2118_v44 = vpop.eup %2117 }
 0x4ad   : > { %v814_v45 = vmul.f32 %v2118_v44, %v2116_v41 }
 0x4af   : > { %v815_v47 = vpack.c.bf16 %v814_v45, %v814_v45 }
 0x4b1   : > { %1928 = vmatmul.mubr.msk.bf16.vlgmr.msra.gmra.mxu1 %vm756_vm3, %v815_v47 }
 0x4b2   : > { %1932 = vmatpush3.bf16.xpose.msra.mxu1 %v869_v48  ;;  %1933 = vmatprep.mubr.msk.bf16.mxu1 %vm2230_vm2, %v2229_v9 }
 0x4b3   : > { %1943 = vmatprep.subr.bf16.mxu1 %v2229_v9 }
 0x4b9   : > { %1934 = vmatmul.mubr.msk.bf16.vlgmr.msra.gmra.mxu1 %vm756_vm3, %v755_v28 }
 0x4ba   : > { %1945 = vmatprep.mubr.msk.bf16.mxu1 %vm2230_vm2, %v2229_v9  ;;  %1944 = vmatpush3.bf16.msra.mxu1 %v977_v2 }
 0x4bb   : > { %1955 = vmatprep.subr.bf16.mxu1 %v2229_v9 }
 0x571   : > { %v859_v49 = vpop.f32.mrf.mxu1 }
 0x572   : > { %v865_v13 = vpack.c.bf16 %v859_v49, %v859_v49  ;;  %v749_v49 = vld [vmem:[%s2415_s0 + $0x8] sm:$0xf] }
 0x573   : > { %v1929_v50 = vpop.f32.mrf.mxu1 }
 0x574   : > { %v1178_v50 = vsel %vm821_vm4, %v749_v49, 0 }
 0x575   : > { %v862_v51 = vpop.f32.mrf.mxu1 }
 0x577   : > { %v1930_v52 = vpop.f32.mrf.mxu1 }
 0x579   : > { %v905_v53 = vpop.f32.mrf.mxu1 }
 0x57a   : > { %v911_v54 = vmul.f32 0.35355338, %v905_v53 }
 0x57b   : > { %v1935_v55 = vpop.f32.mrf.mxu1 }
 0x57c   : > { %v912_v56 = vsel %vm756_vm3, %v911_v54, -inf }
 0x57d   : > { %913 = vmax.xlane.f32.xlu0 %v912_v56  ;;  %v908_v57 = vpop.f32.mrf.mxu1 }
 0x57f   : > { %v1936_v58 = vpop.f32.mrf.mxu1 }
 0x593   : > { %1125 = vrot.lane.b32.xlu0 %v2484_v25, %s2234_s2 }
 0x606   : > { %v914_v59 = vpop.xlane.xlu0 %913 }
 0x607   : > { %v915_v60 = vsub.f32 %v911_v54, %v914_v59 }
 0x609   : > { %v916_v61 = vmul.f32 1.442695, %v915_v60 }
 0x60a   : > { %v1126_v12 = vpop.permute.xlu0 %1125 }
 0x60b   : > { %2119 = vpow2.f32 %v916_v61  ;;  %v1131_v14 = vsel %vm821_vm4, %v1126_v12, 0 }
 0x618   : > { %v2120_v62 = vpop.eup %2119 }
 0x619   : > { %v918_v63 = vsel %vm756_vm3, %v2120_v62, 0.0 }
 0x61a   : > { %919 = vadd.xlane.f32.xlu1 %v918_v63 }
 0x62b   : > { %924 = vrot.lane.b32.xlu1 %v2484_v25, %s2235_s5 }
 0x62f   : > { %1065 = vrot.lane.b32.xlu1 %v2484_v25, %s2236_s13 }
 0x6a3   : > { %v920_v3 = vpop.xlane.xlu1 %919 }
 0x6a4   : > { %2121 = vrcp.f32 %v920_v3 }
 0x6a7   : > { %v925_v4 = vpop.permute.xlu1 %924 }
 0x6a8   : > { %v930_v5 = vsel %vm821_vm4, %v925_v4, 0 }
 0x6a9   : > { %1938 = vmatpush3.bf16.msra.mxu0 %v930_v5 }
 0x6aa   : > { %1949 = vmatprep.subr.bf16.mxu0 %v2229_v9 }
 0x6ab   : > { %v1066_v15 = vpop.permute.xlu1 %1065 }
 0x6ac   : > { %v1070_v19 = vsel %vm756_vm3, %v1066_v15, 0 }
 0x6b1   : > { %v2122_v6 = vpop.eup %2121 }
 0x6b2   : > { %v922_v8 = vmul.f32 %v2122_v6, %v2120_v62 }
 0x6b4   : > { %v923_v10 = vpack.c.bf16 %v922_v8, %v922_v8 }
 0x6b6   : > { %1940 = vmatmul.mubr.msk.bf16.vlgmr.msra.gmra.mxu0 %vm756_vm3, %v923_v10  ;;  %v750_v10 = vld [vmem:[%s2415_s0 + $0xc] sm:$0xf] }
 0x6b7   : > { %1950 = vmatpush3.bf16.msra.mxu0 %v1023_v11  ;;  %1951 = vmatprep.mubr.msk.bf16.mxu0 %vm2230_vm2, %v2229_v9  ;;  %v1337_v11 = vsel %vm821_vm4, %v750_v10, 0 }
 0x6b8   : > { %1961 = vmatprep.subr.bf16.mxu0 %v2229_v9 }
 0x6be   : > { %1952 = vmatmul.mubr.msk.bf16.vlgmr.msra.gmra.mxu0 %vm756_vm3, %v865_v13 }
 0x6bf   : > { %1962 = vmatpush3.bf16.msra.mxu0 %v1131_v14  ;;  %1963 = vmatprep.mubr.msk.bf16.mxu0 %vm2230_vm2, %v2229_v9 }
 0x6c0   : > { %1973 = vmatprep.subr.bf16.mxu0 %v2229_v9 }
 0x776   : > { %v966_v16 = vpop.f32.mrf.mxu0 }
 0x777   : > { %v972_v17 = vpack.c.bf16 %v966_v16, %v966_v16 }
 0x778   : > { %v1941_v18 = vpop.f32.mrf.mxu0 }
 0x779   : > { %1946 = vmatmul.mubr.msk.bf16.vlgmr.msra.gmra.mxu1 %vm756_vm3, %v972_v17 }
 0x77a   : > { %1956 = vmatpush3.bf16.xpose.msra.mxu1 %v1070_v19  ;;  %v969_v20 = vpop.f32.mrf.mxu0  ;;  %1957 = vmatprep.mubr.msk.bf16.mxu1 %vm2230_vm2, %v2229_v9 }
 0x77b   : > { %1967 = vmatprep.subr.bf16.mxu1 %v2229_v9 }
 0x77c   : > { %v1942_v21 = vpop.f32.mrf.mxu0 }
 0x77e   : > { %v2536_v22 = vpop.f32.mrf.mxu0 }
 0x780   : > { %v1953_v23 = vpop.f32.mrf.mxu0 }
 0x781   : > { %1958 = vmatmul.mubr.msk.bf16.vlgmr.msra.gmra.mxu1 %vm756_vm3, %v2490_v30  ;;  %v1847_v23 = vld [vmem:[%s2741_s22] ss:$0 sm:$0xff] }
 0x782   : > { %v1062_v24 = vpop.f32.mrf.mxu0  ;;  %1969 = vmatprep.mubr.msk.bf16.mxu1 %vm2230_vm2, %v2229_v9  ;;  %1968 = vmatpush3.bf16.msra.mxu1 %v1178_v50 }
 0x783   : > { %1979 = vmatprep.subr.bf16.mxu1 %v2229_v9 }
 0x784   : > { %v1954_v26 = vpop.f32.mrf.mxu0 }
 0x839   : > { %v2542_v27 = vpop.f32.mrf.mxu1 }
 0x83a   : > { %v1060_v6 = vadd.f32 %v2536_v22, %v2542_v27 }
 0x83b   : > { %v1947_v28 = vpop.f32.mrf.mxu1 }
 0x83d   : > { %v1016_v29 = vpop.f32.mrf.mxu1 }
 0x83f   : > { %v1948_v31 = vpop.f32.mrf.mxu1 }
 0x841   : > { %v1106_v32 = vpop.f32.mrf.mxu1 }
 0x842   : > { %v1112_v33 = vmul.f32 0.35355338, %v1106_v32 }
 0x843   : > { %v1959_v34 = vpop.f32.mrf.mxu1 }
 0x844   : > { %v1113_v35 = vsel %vm756_vm3, %v1112_v33, -inf }
 0x845   : > { %1114 = vmax.xlane.f32.xlu1 %v1113_v35  ;;  %v1109_v36 = vpop.f32.mrf.mxu1 }
 0x847   : > { %v1960_v37 = vpop.f32.mrf.mxu1 }
 0x8ce   : > { %v1115_v38 = vpop.xlane.xlu1 %1114 }
 0x8cf   : > { %v1116_v30 = vsub.f32 %v1112_v33, %v1115_v38 }
 0x8d1   : > { %v1117_v39 = vmul.f32 1.442695, %v1116_v30  ;;  %v2103_v30 = vld [vmem:[%s2432_s18 + $0x8] sm:$0xff]  }
 0x8d3   : > { %2123 = vpow2.f32 %v1117_v39  ;;  %v2104_v39 = vld [vmem:[%s2432_s18] sm:$0xff]  }
 0x8e0   : > { %v2124_v40 = vpop.eup %2123 }
 0x8e1   : > { %v1119_v41 = vsel %vm756_vm3, %v2124_v40, 0.0 }
 0x8e2   : > { %1120 = vadd.xlane.f32.xlu0 %v1119_v41 }
 0x8f8   : > { %1223 = vrot.lane.b32.xlu0 %v2484_v25, %s2237_s29 }
 0x8fc   : > { %1221 = vrot.lane.b32.xlu0 %v2484_v25, %s2238_s16 }
 0x96b   : > { %v1121_v42 = vpop.xlane.xlu0 %1120 }
 0x96c   : > { %2125 = vrcp.f32 %v1121_v42 }
 0x96f   : > { %v1224_v45 = vpop.permute.xlu0 %1223 }
 0x970   : > { %v1229_v47 = vsel %vm756_vm3, %v1224_v45, 0  ;;  %v1848_v45 = vld [vmem:[%s2742_s24] ss:$0 sm:$0xff] }
 0x973   : > { %v1222_v48 = vpop.permute.xlu0 %1221 }
 0x979   : > { %v2126_v43 = vpop.eup %2125 }
 0x97a   : > { %v1123_v44 = vmul.f32 %v2126_v43, %v2124_v40  ;;  %v2106_v40 = vld [vmem:[%s2446_s27 + $0x30] sm:$0xff]  }
 0x97c   : > { %v1124_v46 = vpack.c.bf16 %v1123_v44, %v1123_v44 }
 0x97e   : > { %1964 = vmatmul.mubr.msk.bf16.vlgmr.msra.gmra.mxu0 %vm756_vm3, %v1124_v46 }
 0x97f   : > { %1974 = vmatpush3.bf16.xpose.msra.mxu0 %v1229_v47  ;;  %1975 = vmatprep.mubr.msk.bf16.mxu0 %vm2230_vm2, %v2229_v9  ;;  %v1849_v47 = vld [vmem:[%s623_s3] ss:$0 sm:$0xff] }
 0x980   : > { %1985 = vmatprep.subr.bf16.mxu0 %v2229_v9 }
 0x986   : > { %1976 = vmatmul.mubr.msk.bf16.vlgmr.msra.gmra.mxu0 %vm756_vm3, %v1222_v48 }
 0x987   : > { %1987 = vmatprep.mubr.msk.bf16.mxu0 %vm2230_vm2, %v2229_v9  ;;  %1986 = vmatpush3.bf16.msra.mxu0 %v1337_v11 }
 0x988   : > { %1999 = vmatprep.subr.bf16.mxu0 %v2229_v9 }
 0xa3e   : > { %v1167_v51 = vpop.f32.mrf.mxu0 }
 0xa3f   : > { %v1173_v52 = vpack.c.bf16 %v1167_v51, %v1167_v51  ;;  %v2107_v51 = vld [vmem:[%s2446_s27 + $0x28] sm:$0xff]  }
 0xa40   : > { %v1965_v53 = vpop.f32.mrf.mxu0 }
 0xa41   : > { %1970 = vmatmul.mubr.msk.bf16.vlgmr.msra.gmra.mxu1 %vm756_vm3, %v1173_v52  ;;  %v2108_v52 = vld [vmem:[%s2446_s27 + $0x20] sm:$0xff]   ;;  %v2109_v53 = vld [vmem:[%s2446_s27 + $0x18] sm:$0xff]  }
 0xa42   : > { %v1170_v54 = vpop.f32.mrf.mxu0  ;;  %1981 = vmatprep.mubr.msk.bf16.mxu1 %vm2230_vm2, %v2229_v9 }
 0xa43   : > { %v2110_v54 = vld [vmem:[%s2446_s27 + $0x10] sm:$0xff]  }
 0xa44   : > { %v1966_v55 = vpop.f32.mrf.mxu0 }
 0xa45   : > { %v2111_v55 = vld [vmem:[%s2446_s27 + $0x8] sm:$0xff]  }
 0xa46   : > { %v1265_v56 = vpop.f32.mrf.mxu0 }
 0xa47   : > { %v1271_v57 = vmul.f32 0.35355338, %v1265_v56  ;;  %v2112_v56 = vld [vmem:[%s2446_s27] sm:$0xff]  }
 0xa48   : > { %v1977_v58 = vpop.f32.mrf.mxu0 }
 0xa49   : > { %v1272_v59 = vsel %vm756_vm3, %v1271_v57, -inf }
 0xa4a   : > { %1273 = vmax.xlane.f32.xlu1 %v1272_v59  ;;  %v1268_v60 = vpop.f32.mrf.mxu0 }
 0xa4c   : > { %v1978_v61 = vpop.f32.mrf.mxu0 }
 0xa5b   : > { %1284 = vrot.lane.b32.xlu1 %v2484_v25, %s2239_s28 }
 0xad3   : > { %v1274_v62 = vpop.xlane.xlu1 %1273 }
 0xad4   : > { %v1275_v63 = vsub.f32 %v1271_v57, %v1274_v62  ;;  %v1850_v57 = vld [vmem:[%s631_s19] ss:$0 sm:$0xff]  ;;  %s2743_s19 = sld [smem:[#allocation9_spill]] }
 0xad6   : > { %v1276_v0 = vmul.f32 1.442695, %v1275_v63 }
 0xad7   : > { %v1285_v2 = vpop.permute.xlu1 %1284 }
 0xad8   : > { %2127 = vpow2.f32 %v1276_v0  ;;  %v1290_v3 = vsel %vm821_vm4, %v1285_v2, 0 }
 0xad9   : > { %1980 = vmatpush3.bf16.msra.mxu1 %v1290_v3 }
 0xada   : > { %1991 = vmatprep.subr.bf16.mxu1 %v2229_v9  ;;  %p1863_p1 = scmp.ne.s32.totalorder %s2743_s19, 1 }
 0xae5   : > { %v2128_v4 = vpop.eup %2127 }
 0xae6   : > { %v1278_v5 = vsel %vm756_vm3, %v2128_v4, 0.0 }
 0xae7   : > { %1279 = vadd.xlane.f32.xlu0 %v1278_v5  ;;  %v1854_v5 = vld [vmem:[%s639_s25] ss:$0 sm:$0xff] }
 0xb01   : > { %v1214_v7 = vpop.f32.mrf.mxu1 }
 0xb02   : > { %v1220_v25 = vadd.f32 %v1214_v7, %v1060_v6 }
 0xb03   : > { %v1971_v8 = vpop.f32.mrf.mxu1 }
 0xb05   : > { %v1217_v12 = vpop.f32.mrf.mxu1 }
 0xb07   : > { %v1972_v13 = vpop.f32.mrf.mxu1 }
 0xb70   : > { %v1280_v14 = vpop.xlane.xlu0 %1279 }
 0xb71   : > { %2129 = vrcp.f32 %v1280_v14 }
 0xb7e   : > { %v2130_v15 = vpop.eup %2129 }
 0xb7f   : > { %v1282_v16 = vmul.f32 %v2130_v15, %v2128_v4 }
 0xb81   : > { %v1283_v17 = vpack.c.bf16 %v1282_v16, %v1282_v16 }
 0xb83   : > { %1982 = vmatmul.mubr.msk.bf16.vlgmr.msra.gmra.mxu1 %vm756_vm3, %v1283_v17 }
 0xb84   : > { %1995 = vmatprep.mubr.msk.bf16.mxu1 %vm2230_vm2, %v2229_v9  ;;  %1992 = vmatpush3.bf16.msra.mxu1 %v2103_v30 }
 0xb85   : > { %1993 = vmatprep.subr.bf16.mxu1 %v2229_v9 }
 0xb88   : > { %1994 = vmatpush3.bf16.msra.mxu1 %v2104_v39 }
 0xc43   : > { %v1326_v18 = vpop.f32.mrf.mxu1 }
 0xc44   : > { %v1332_v19 = vpack.c.bf16 %v1326_v18, %v1326_v18 }
 0xc45   : > { %v1983_v20 = vpop.f32.mrf.mxu1 }
 0xc46   : > { %1988 = vmatmul.mubr.msk.bf16.vlgmr.msra.gmra.mxu0 %vm756_vm3, %v1332_v19 }
 0xc47   : > { %v1329_v21 = vpop.f32.mrf.mxu1  ;;  %2015 = vmatprep.mubr.msk.bf16.mxu0 %vm2230_vm2, %v2229_v9 }
 0xc49   : > { %v1984_v22 = vpop.f32.mrf.mxu1 }
 0xd06   : > { %v1373_v24 = vpop.f32.mrf.mxu0 }
 0xd07   : > { %v1379_v26 = vadd.f32 %v1373_v24, %v1220_v25 }
 0xd08   : > { %v1989_v27 = vpop.f32.mrf.mxu0 }
 0xd09   : > { %v1386_v28 = vadd.f32 %v1847_v23, %v1379_v26 }
 0xd0a   : > { %v1376_v29 = vpop.f32.mrf.mxu0 }
 0xd0b   : > { %v2584_v31 = vadd.f32 %v1386_v28, %v2450_v1  ;;  %v2105_v1 = vld [vmem:[%s2446_s27 + $0x38] sm:$0xff]  }
 0xd0c   : > { %v1990_v32 = vpop.f32.mrf.mxu0  ;;  %2000 = vmatpush3.bf16.msra.mxu0 %v2105_v1 }
 0xd0d   : > { %v1390_v33 = vsel %vm651_vm1, %v2584_v31, 0.0  ;;  %2001 = vmatprep.subr.bf16.mxu0 %v2229_v9 }
 0xd0e   : > { %1391 = vadd.xlane.f32.xlu1 %v1390_v33 }
 0xd10   : > { %2002 = vmatpush3.bf16.msra.mxu0 %v2106_v40 }
 0xd11   : > { %2003 = vmatprep.subr.bf16.mxu0 %v2229_v9 }
 0xd14   : > { %2004 = vmatpush3.bf16.msra.mxu0 %v2107_v51 }
 0xd15   : > { %2005 = vmatprep.subr.bf16.mxu0 %v2229_v9 }
 0xd18   : > { %2006 = vmatpush3.bf16.msra.mxu0 %v2108_v52 }
 0xd19   : > { %2007 = vmatprep.subr.bf16.mxu0 %v2229_v9 }
 0xd1c   : > { %2008 = vmatpush3.bf16.msra.mxu0 %v2109_v53 }
 0xd1d   : > { %2009 = vmatprep.subr.bf16.mxu0 %v2229_v9 }
 0xd20   : > { %2010 = vmatpush3.bf16.msra.mxu0 %v2110_v54 }
 0xd21   : > { %2011 = vmatprep.subr.bf16.mxu0 %v2229_v9 }
 0xd24   : > { %2012 = vmatpush3.bf16.msra.mxu0 %v2111_v55 }
 0xd25   : > { %2013 = vmatprep.subr.bf16.mxu0 %v2229_v9 }
 0xd28   : > { %2014 = vmatpush3.bf16.msra.mxu0 %v2112_v56 }
 0xd97   : > { %v1392_v34 = vpop.xlane.xlu1 %1391 }
 0xd98   : > { %v1393_v35 = vmul.f32 0.03125, %v1392_v34 }
 0xd9a   : > { %v1394_v36 = vsub.f32 %v2584_v31, %v1393_v35 }
 0xd9c   : > { %v1395_v37 = vmul.f32 %v1394_v36, %v1394_v36 }
 0xd9e   : > { %v1396_v38 = vsel %vm651_vm1, %v1395_v37, 0.0 }
 0xd9f   : > { %1397 = vadd.xlane.f32.xlu0 %v1396_v38 }
 0xe28   : > { %v1398_v41 = vpop.xlane.xlu0 %1397 }
 0xe29   : > { %v1399_v42 = vmul.f32 0.03125, %v1398_v41 }
 0xe2b   : > { %v1400_v43 = vadd.f32 1e-05, %v1399_v42 }
 0xe2d   : > { %2131 = vrsqrt.f32 %v1400_v43 }
 0xe3a   : > { %v2132_v44 = vpop.eup %2131 }
 0xe3b   : > { %v1402_v46 = vmul.f32 %v2132_v44, %v1394_v36 }
 0xe3d   : > { %v1409_v48 = vmul.f32 %v1848_v45, %v1402_v46 }
 0xe3f   : > { %v1416_v49 = vadd.f32 %v1849_v47, %v1409_v48 }
 0xe41   : > { %v1417_v50 = vpack.c.bf16 %v1416_v49, %v1416_v49 }
 0xe43   : > { %1996 = vmatmul.mubr.msk.bf16.vlgmr.msra.gmra.mxu1 %vm651_vm1, %v1417_v50 }
 0xf03   : > { %v1478_v58 = vpop.f32.mrf.mxu1 }
 0xf04   : > { %v1479_v59 = vadd.f32 %v1850_v57, %v1478_v58 }
 0xf05   : > { %v1997_v60 = vpop.f32.mrf.mxu1 }
 0xf06   : > { %v1485_v61 = vmul.f32 0.70710677, %v1479_v59  ;;  %v1484_v2 = vmul.f32 0.5, %v1479_v59 }
 0xf07   : > { %v1481_v62 = vpop.f32.mrf.mxu1 }
 0xf08   : > { %2133 = verf.f32 %v1485_v61 }
 0xf09   : > { %v1998_v63 = vpop.f32.mrf.mxu1 }
 0xf15   : > { %v2134_v0 = vpop.eup %2133 }
 0xf16   : > { %v1487_v3 = vadd.f32 1.0, %v2134_v0 }
 0xf18   : > { %v1488_v4 = vmul.f32 %v1487_v3, %v1484_v2 }
 0xf1a   : > { %v1489_v9 = vpack.c.bf16 %v1488_v4, %v1488_v4 }
 0xf1c   : > { %2016 = vmatmul.mubr.bf16.vlgmr.msra.gmra.mxu0 %v1489_v9 }
 0xfdc   : > { %v1595_v6 = vpop.f32.mrf.mxu0 }
 0xfdd   : > { %v1596_v7 = vadd.f32 %v1854_v5, %v1595_v6 }
 0xfde   : > { %v2017_v25 = vpop.f32.mrf.mxu0  ;;  %1606 = sbr.rel (%p1863_p1) target bundleno = 4074 (0xfea), region = 80 }
 0xfdf   : > { %v1601_v8 = vadd.f32 %v1596_v7, %v2584_v31 }
 0xfe0   : > { %v1598_v10 = vpop.f32.mrf.mxu0 }
 0xfe1   : > { %1602 = vst.msk [vmem:[#allocation2] sm:$0xff] %vm651_vm1, %v1601_v8 }
 0xfe2   : > { %v2018_v11 = vpop.f32.mrf.mxu0 }
 0xfe8   : > { %v1607_v12 = vld [vmem:[#allocation2] sm:$0xff] }
 0xfe9   : > { %1608 = vst.msk [vmem:[%s591_s26] sm:$0xff] %vm651_vm1, %v1607_v12 }
 0xfea PF: > { %s2744_s30 = sld [smem:[#allocation10_spill]]  ;;  %s1623_s22 = sshll.u32 %s591_s26, 4  ;;  %s1624_s22 = int_to_ptr.vmem [resolvable:$true] %s1623_s22 }
 0xfeb   : > { %s2745_s25 = sld [smem:[#allocation7_spill]]  ;;  %s2135_s24 = scalar_lea.vmem %s1624_s22, 128 }
 0xfec   : > { %s2747_s28 = sld [smem:[#allocation23_spill]]  ;;  %p2136_p2 = scmp.ne.s32.totalorder %s1624_s22, %s2135_s24 }
 0xfed   : > { %s2240_s15 = smov [#allocation3]  }
 0xfee   : > { %p2137_p4 = pnand %p2136_p2, %p2360_p3  ;;  %s2139_s21 = sshll.u32 %s2240_s15, 4  ;;  %s2140_s21 = int_to_ptr.vmem [resolvable:$false] %s2139_s21 }
 0xfef   : > { %s2141_s3 = scalar_lea.vmem %s2140_s21, 256  ;;  %p2142_p6 = scmp.lt.s32.totalorder %s1624_s22, %s2140_s21 }
 0xff0   : > { %s1865_s13 = sshll.u32 %s2744_s30, 7  ;;  %p2138_p5 = pneg %p2137_p4 }
 0xff1   : > { %s2749_s18 = sand.u32 1, %s2745_s25   ;;  %p2143_p7 = scmp.lt.s32.totalorder %s2141_s3, %s2135_s24 }
 0xff2   : > { %s2748_s0 = smov %s2747_s28  ;;  %s1621_s23 = scalar_lea.hbm %s2747_s28, %s1865_s13 }
 0xff3   : > { %s1610_s14 = scalar_lea.sflag [#allocation4], %s2749_s18  ;;  %p2144_p8 = por %p2143_p7, %p2142_p6 }
 0xff5   : > { %p2145_p10 = pnand %p2144_p8, %p2138_p5 }
 0xff7   : > { %2148 = shalt.err (!%p2145_p10)
}
 0xff8   : > { %s2149_s20 = scalar_lea.hbm %s1621_s23, 128  ;;  %s2153_s27 = scalar_lea.hbm %s2748_s0, 256 }
 0xff9   : > { %p2150_p11 = scmp.ne.s32.totalorder %s1621_s23, %s2149_s20  ;;  %p2154_p0 = scmp.lt.s32.totalorder %s1621_s23, %s2748_s0 }
 0xffa   : > { %p2155_p1 = scmp.lt.s32.totalorder %s2153_s27, %s2149_s20 }
 0xffb   : > { %p2151_p12 = pnand %p2150_p11, %p2360_p3 }
 0xffc   : > { %p2156_p2 = por %p2155_p1, %p2154_p0 }
 0xffd   : > { %p2152_p13 = pneg %p2151_p12 }
 0xfff   : > { %p2157_p4 = pnand %p2156_p2, %p2152_p13 }
0x1001   : > { %2160 = shalt.err (!%p2157_p4)
}
0x1002   : > { %2019 = dma.vmem_to_hbm [thread:$0]  (%p2360_p3), %s1624_s22, 128, %s1621_s23, %s1610_s14  }
0x1003 PF: > { %s2750_s30 = sld [smem:[#allocation13_spill]] }
0x1004   : > { %s2751_s25 = sld [smem:[#allocation6_spill]] }
0x1009   : > { %p2025_p5 = scmp.ge.s32.totalorder %s2750_s30, 2 }
0x100a   : > { %s1635_s29 = sand.u32 1, %s2751_s25  }
0x100b   : > { %p2022_p6 = pnand %p2025_p5, %p2370_p9  ;;  %s1636_s16 = scalar_lea.sflag [#allocation4], %s1635_s29 }
0x100d   : > { %p2023_p7 = pneg %p2022_p6 }
0x100f   : > { %2194 = dma.done.wait (%p2023_p7), %s1636_s16, 128  }
0x1010   : > { %2196 = vsyncadd (%p2023_p7), %s1636_s16, 4294967168  ;;  %s26_s15 = sadd.s32 1, %s2750_s30   ;;  %s2753_s25 = sld [smem:[#allocation7_spill]] }
0x1011   : > { %p23_p8 = scmp.ge.s32.totalorder %s26_s15, 6   ;;  %s2754_s26 = sld [smem:[#allocation8_spill]] }
0x1012   : > { %s2755_s27 = sld [smem:[#allocation18_spill]] }
0x1013   : > { %s2756_s28 = sld [smem:[#allocation11_spill]]  ;;  %25 = sbr.rel (!%p23_p8) target bundleno = 11 (0xb), region = 151 }
0x1014   : > { %s2757_s29 = sld [smem:[#allocation12_spill]] }
0x1015   : > { %s2758_s30 = sld [smem:[#allocation14_spill]] }
0x1016   : > { %s2759_s14 = sld [smem:[#allocation16_spill]] }
0x1018   :  { %1641 = vsyncpa [#allocation4], 1 }
0x1019   :  { %1643 = vsyncpa [#allocation4 + $0x1], 1 }

// kernel: cross_attention_encoder_forward.2
= control target key start
LH: loop header
LB: loop body
LE: loop exit
PB: predicated region body
PF: predicated region fallthrough
CT: control target
= control target key end

     0   :  { %s3335_s0 = inlined_call_operand.vmem [shape: f32[2,16,7], index: 0, kind: input, shape index: {}]   ;;  %s3336_s1 = inlined_call_operand.vmem [shape: f32[2,16,18], index: 1, kind: input, shape index: {}]   ;;  %s3337_s2 = inlined_call_operand.vmem [shape: f32[8,32], index: 2, kind: input, shape index: {}]   ;;  %s3338_s3 = inlined_call_operand.vmem [shape: bf16[7,32], index: 3, kind: input, shape index: {}]   ;;  %s3339_s4 = inlined_call_operand.vmem [shape: bf16[18,32], index: 4, kind: input, shape index: {}]   ;;  %s3340_s5 = inlined_call_operand.vmem [shape: bf16[18,32], index: 5, kind: input, shape index: {}]   ;;  %s3341_s6 = inlined_call_operand.vmem [shape: f32[1,32], index: 6, kind: input, shape index: {}]   ;;  %s3342_s7 = inlined_call_operand.vmem [shape: f32[1,32], index: 7, kind: input, shape index: {}]   ;;  %s3343_s8 = inlined_call_operand.vmem [shape: f32[1,32], index: 8, kind: input, shape index: {}]   ;;  %s3344_s9 = inlined_call_operand.vmem [shape: f32[1,32], index: 9, kind: input, shape index: {}]   ;;  %s3345_s10 = inlined_call_operand.vmem [shape: f32[1,32], index: 10, kind: input, shape index: {}]   ;;  %s3346_s11 = inlined_call_operand.vmem [shape: bf16[32,32], index: 11, kind: input, shape index: {}]   ;;  %s3347_s12 = inlined_call_operand.vmem [shape: f32[1,32], index: 12, kind: input, shape index: {}]   ;;  %s3348_s13 = inlined_call_operand.vmem [shape: bf16[32,64], index: 13, kind: input, shape index: {}]   ;;  %s3349_s14 = inlined_call_operand.vmem [shape: f32[1,64], index: 14, kind: input, shape index: {}]   ;;  %s3350_s15 = inlined_call_operand.vmem [shape: bf16[32,32], index: 15, kind: input, shape index: {}]   ;;  %s3351_s16 = inlined_call_operand.vmem [shape: f32[1,32], index: 16, kind: input, shape index: {}]   ;;  %s3352_s17 = inlined_call_operand.vmem [shape: f32[1,32], index: 17, kind: input, shape index: {}]   ;;  %s3353_s18 = inlined_call_operand.vmem [shape: f32[1,32], index: 18, kind: input, shape index: {}]   ;;  %s3354_s19 = inlined_call_operand.vmem [shape: bf16[32,128], index: 19, kind: input, shape index: {}]   ;;  %s3355_s20 = inlined_call_operand.vmem [shape: f32[1,128], index: 20, kind: input, shape index: {}]   ;;  %s3356_s21 = inlined_call_operand.vmem [shape: bf16[128,32], index: 21, kind: input, shape index: {}]   ;;  %s3357_s22 = inlined_call_operand.vmem [shape: f32[1,32], index: 22, kind: input, shape index: {}]   ;;  %s3358_s23 = inlined_call_operand.vmem [shape: f32[2,8,32], index: 23, kind: output, shape index: {}]  }
   0x1   :  { %3361 = sst [smem:[#allocation2_spill]] %s3335_s0 }
   0x2   :  { %3362 = sst [smem:[#allocation3_spill]] %s3336_s1 }
   0x3   :  { %3363 = sst [smem:[#allocation4_spill]] %s3337_s2 }
   0x4   :  { %3364 = sst [smem:[#allocation5_spill]] %s3338_s3 }
   0x5   :  { %3365 = sst [smem:[#allocation6_spill]] %s3339_s4  ;;  %s2961_s4 = smov 0  }
   0x6   :  { %3366 = sst [smem:[#allocation7_spill]] %s3340_s5 }
   0x7   :  { %3367 = sst [smem:[#allocation8_spill]] %s3341_s6 }
   0x8   :  { %3368 = sst [smem:[#allocation9_spill]] %s3342_s7 }
   0x9 LB: > { %s2467_s30 = sadd.s32 4294967295, %s2823_s4   ;;  %p2471_p0 = scmp.ge.s32.totalorder %s2823_s4, 1  ;;  %s2823_s4 = sphi %s2961_s4, %s33_s4  }
   0xa   : > { %p647_p1 = scmp.lt.s32.totalorder %s2823_s4, 3 }
   0xc   : > { %p648_p2 = pnand %p2471_p0, %p647_p1 }
   0xd   : > { %s3369_s5 = sld [smem:[#allocation6_spill]] (!%p648_p2)  ;;  %p715_p3 = scmp.lt.s32.totalorder (!%p648_p2), %s2467_s30, 1 }
   0xe   : > { %651 = sbr.rel (%p648_p2) target bundleno = 3828 (0xef4), region = 112  ;;  %s3370_s7 = sld [smem:[#allocation3_spill]] (!%p648_p2) }
   0xf   : > { %s3373_s0 = sld [smem:[#allocation5_spill]] (!%p648_p2)  ;;  %s2837_s27 = smov (!%p648_p2), 96  }
  0x10   : > { %s3374_s1 = sld [smem:[#allocation2_spill]] (!%p648_p2)  ;;  %s2839_s24 = smov (!%p648_p2), 80  }
  0x11   : > { %s3378_s6 = sld [smem:[#allocation9_spill]] (!%p648_p2) }
  0x13   : > { %v2765_v0 = vld [vmem:[%s3369_s5 + $0x8] ss:$0 sps:$4 sm:$0x11]   ;;  %v2825_v1 = vmov 0.0   ;;  %vm961_vm0 = vcmask 1040384   ;;  %v2767_v3 = vld [vmem:[%s3369_s5] sm:$0xff]  }
  0x14   : > { %2595 = vmatprep.subr.bf16.mxu0 %v2825_v1  ;;  %2625 = vmatprep.subr.bf16.mxu1 %v2825_v1  ;;  %v963_v2 = vsel %vm961_vm0, %v2765_v0, 0  ;;  %vm2826_vm1 = vmmov 0   ;;  %s3380_s30 = smov (!%p715_p3, %s2467_s30), 1  ;;  %v2827_v28 = vmov 683565275  }
  0x15   : > { %2596 = vmatpush3.bf16.msra.mxu0 %v963_v2  ;;  %2599 = vmatprep.mubr.msk.bf16.mxu0 %vm2826_vm1, %v2825_v1  ;;  %s2543_s2 = sshll.u32 %s3380_s30, 4  ;;  %v2828_v30 = vmov 2475754826   ;;  %v2829_v32 = vmov 2131351028  }
  0x16   : > { %2597 = vmatprep.subr.bf16.mxu0 %v2825_v1  ;;  %2629 = vmatprep.mubr.msk.bf16.mxu1 %vm2826_vm1, %v2825_v1  ;;  %s724_s28 = scalar_lea.vmem %s3370_s7, %s2543_s2  ;;  %v2830_v34 = vmov 2102212464   ;;  %v2831_v36 = vmov 920167782   ;;  %v2832_v44 = vmov 1326507024   ;;  %s719_s26 = scalar_lea.vmem %s3374_s1, %s2543_s2 }
  0x17   : > { %v2992_v4 = vld [vmem:[%s724_s28] sm:$0xff]  ;;  %v2994_v5 = vld [vmem:[%s724_s28 + $0x8] sm:$0xff]  ;;  %s3375_s7 = sld [smem:[#allocation7_spill]] }
  0x18   : > { %v736_v6 = vand.u32 2147483647, %v2992_v4  ;;  %v739_v7 = vand.u32 2139095040, %v2992_v4  ;;  %v840_v8 = vand.u32 2147483647, %v2994_v5  ;;  %v843_v9 = vand.u32 2139095040, %v2994_v5 }
  0x19   : > { %2598 = vmatpush3.bf16.msra.mxu0 %v2767_v3  ;;  %s3377_s1 = sld [smem:[#allocation8_spill]] }
  0x1a   : > { %2603 = vmatprep.subr.bf16.mxu0 %v2825_v1  ;;  %v740_v10 = vshrl.u32 %v739_v7, 23  ;;  %v743_v11 = vand.u32 8388607, %v736_v6  ;;  %v844_v12 = vshrl.u32 %v843_v9, 23  ;;  %v847_v13 = vand.u32 8388607, %v840_v8 }
  0x1c   : > { %v2477_v14 = vadd.s32 4294967169, %v740_v10  ;;  %v2481_v15 = vadd.s32 4294967169, %v844_v12  ;;  %v744_v16 = vor.u32 8388608, %v743_v11  ;;  %v848_v18 = vor.u32 8388608, %v847_v13 }
  0x1e   : > { %v746_v17 = vadd.s32 1, %v2477_v14  ;;  %v850_v19 = vadd.s32 1, %v2481_v15  ;;  %v3004_v23 = vshll.u32 %v744_v16, 8  ;;  %v3006_v26 = vshll.u32 %v848_v18, 8 }
  0x20   : > { %vm747_vm2 = vcmp.gt.s32.totalorder %v746_v17, 0  ;;  %vm851_vm3 = vcmp.gt.s32.totalorder %v850_v19, 0 }
  0x21   : > { %v748_v20 = vsel %vm747_vm2, %v746_v17, 0  ;;  %v852_v24 = vsel %vm851_vm3, %v850_v19, 0  ;;  %vm738_vm2 = vcmp.lt.s32.totalorder %v2992_v4, 0  ;;  %vm3055_vm3 = vcmp.le.f32.partialorder %v736_v6, 0.7853982 }
  0x22   : > { %v749_v21 = vshrl.u32 %v748_v20, 5  ;;  %v750_v22 = vand.u32 31, %v748_v20  ;;  %v854_v25 = vand.u32 31, %v852_v24  ;;  %v3008_v38 = vshrl.u32 %v852_v24, 5 }
  0x24   : > { %v751_v27 = vsub.s32 32, %v750_v22  ;;  %v753_v29 = vshll.u32 %v2827_v28, %v750_v22  ;;  %v756_v31 = vshll.u32 %v2828_v30, %v750_v22  ;;  %v759_v33 = vshll.u32 %v2829_v32, %v750_v22 }
  0x25   : > { %v762_v35 = vshll.u32 %v2830_v34, %v750_v22  ;;  %v765_v37 = vshll.u32 %v2831_v36, %v750_v22  ;;  %vm768_vm4 = vcmp.lt.s32.totalorder %v749_v21, 1  ;;  %vm769_vm5 = vcmp.lt.s32.totalorder %v749_v21, 2 }
  0x26   : > { %v752_v39 = vshrl.u32 %v2827_v28, %v751_v27  ;;  %v754_v40 = vshrl.u32 %v2828_v30, %v751_v27  ;;  %v757_v41 = vshrl.u32 %v2829_v32, %v751_v27  ;;  %v760_v42 = vshrl.u32 %v2830_v34, %v751_v27 }
  0x27   : > { %v763_v43 = vshrl.u32 %v2831_v36, %v751_v27  ;;  %v766_v45 = vshrl.u32 %v2832_v44, %v751_v27  ;;  %vm771_vm6 = vcmp.lt.s32.totalorder %v749_v21, 4  ;;  %v855_v49 = vsub.s32 32, %v854_v25 }
  0x28   : > { %v755_v46 = vor.u32 %v754_v40, %v753_v29  ;;  %v758_v47 = vor.u32 %v757_v41, %v756_v31  ;;  %v761_v48 = vor.u32 %v760_v42, %v759_v33  ;;  %vm770_vm7 = vcmp.lt.s32.totalorder %v749_v21, 3 }
  0x29   : > { %v764_v50 = vor.u32 %v763_v43, %v762_v35  ;;  %v767_v51 = vor.u32 %v766_v45, %v765_v37  ;;  %v857_v52 = vshll.u32 %v2827_v28, %v854_v25  ;;  %v860_v60 = vshll.u32 %v2828_v30, %v854_v25 }
  0x2a   : > { %v772_v53 = vsel %vm768_vm4, %v752_v39, %v755_v46  ;;  %v773_v54 = vsel %vm771_vm6, %v761_v48, 2102212464  ;;  %v776_v55 = vsel %vm768_vm4, %v755_v46, %v758_v47  ;;  %v780_v56 = vsel %vm768_vm4, %v758_v47, %v761_v48 }
  0x2b   : > { %v774_v57 = vsel %vm770_vm7, %v758_v47, %v773_v54  ;;  %v777_v58 = vsel %vm771_vm6, %v764_v50, 920167782  ;;  %v781_v59 = vsel %vm771_vm6, %v767_v51, 1326507024  ;;  %v856_v63 = vshrl.u32 %v2827_v28, %v855_v49 }
  0x2c   : > { %v778_v61 = vsel %vm770_vm7, %v761_v48, %v777_v58  ;;  %v782_v62 = vsel %vm770_vm7, %v764_v50, %v781_v59  ;;  %v858_v0 = vshrl.u32 %v2828_v30, %v855_v49  ;;  %v775_v2 = vsel %vm769_vm5, %v772_v53, %v774_v57 }
  0x2d   : > { %v779_v3 = vsel %vm769_vm5, %v776_v55, %v778_v61  ;;  %v783_v7 = vsel %vm769_vm5, %v780_v56, %v782_v62  ;;  %v861_v9 = vshrl.u32 %v2829_v32, %v855_v49  ;;  %v863_v16 = vshll.u32 %v2829_v32, %v854_v25 }
  0x2e   : > { %v3017_v10 = vmul.u32.u64.low %v3004_v23, %v783_v7  ;;  %v3018_v11 = vmul.u32.u64.high %v3004_v23, %v783_v7, %v3017_v10  ;;  %v3021_v12 = vmul.u32.u64.low %v3004_v23, %v779_v3  ;;  %v3022_v13 = vmul.u32.u64.high %v3004_v23, %v779_v3, %v3021_v12 }
  0x2f   : > { %v859_v14 = vor.u32 %v858_v0, %v857_v52  ;;  %v862_v15 = vor.u32 %v861_v9, %v860_v60  ;;  %v864_v17 = vshrl.u32 %v2830_v34, %v855_v49  ;;  %v866_v18 = vshll.u32 %v2830_v34, %v854_v25 }
  0x30   : > { %v867_v19 = vshrl.u32 %v2831_v36, %v855_v49  ;;  %v869_v20 = vshll.u32 %v2831_v36, %v854_v25  ;;  %v870_v22 = vshrl.u32 %v2832_v44, %v855_v49  ;;  %v791_v21 = vmul.u32 %v3004_v23, %v775_v2 }
  0x31   : > { %v865_v24 = vor.u32 %v864_v17, %v863_v16  ;;  %vm872_vm8 = vcmp.lt.s32.totalorder %v3008_v38, 1  ;;  %vm873_vm9 = vcmp.lt.s32.totalorder %v3008_v38, 2  ;;  %vm793_vm10 = vc.u32 %v3018_v11, %v3021_v12 }
  0x32   : > { %v794_v27 = vadd.s32 1, %v3022_v13  ;;  %v868_v28 = vor.u32 %v867_v19, %v866_v18  ;;  %vm874_vm11 = vcmp.lt.s32.totalorder %v3008_v38, 3  ;;  %v871_v29 = vor.u32 %v870_v22, %v869_v20 }
  0x33   : > { %vm875_vm12 = vcmp.lt.s32.totalorder %v3008_v38, 4  ;;  %v876_v30 = vsel %vm872_vm8, %v856_v63, %v859_v14  ;;  %v880_v25 = vsel %vm872_vm8, %v859_v14, %v862_v15  ;;  %v884_v33 = vsel %vm872_vm8, %v862_v15, %v865_v24 }
  0x34   : > { %v795_v31 = vsel %vm793_vm10, %v794_v27, %v3022_v13  ;;  %v877_v23 = vsel %vm875_vm12, %v865_v24, 2102212464  ;;  %v881_v32 = vsel %vm875_vm12, %v868_v28, 920167782  ;;  %v885_v37 = vsel %vm875_vm12, %v871_v29, 1326507024 }
  0x35   : > { %v796_v34 = vadd.s32 %v795_v31, %v791_v21  ;;  %v878_v35 = vsel %vm874_vm11, %v862_v15, %v877_v23  ;;  %v882_v36 = vsel %vm874_vm11, %v865_v24, %v881_v32  ;;  %v886_v41 = vsel %vm874_vm11, %v868_v28, %v885_v37 }
  0x36   : > { %v879_v39 = vsel %vm873_vm9, %v876_v30, %v878_v35  ;;  %v883_v40 = vsel %vm873_vm9, %v880_v25, %v882_v36  ;;  %v887_v43 = vsel %vm873_vm9, %v884_v33, %v886_v41  ;;  %v792_v62 = vadd.s32 %v3021_v12, %v3018_v11 }
  0x37   : > { %v797_v42 = vadd.s32 536870912, %v796_v34  ;;  %v3039_v44 = vmul.u32.u64.low %v3006_v26, %v883_v40  ;;  %v3040_v45 = vmul.u32.u64.high %v3006_v26, %v883_v40, %v3039_v44  ;;  %v895_v49 = vmul.u32 %v3006_v26, %v879_v39 }
  0x38   : > { %v3043_v46 = vmul.u32.u64.low %v3006_v26, %v887_v43  ;;  %v3044_v47 = vmul.u32.u64.high %v3006_v26, %v887_v43, %v3043_v46  ;;  %vm842_vm4 = vcmp.lt.s32.totalorder %v2994_v5, 0  ;;  %vm841_vm5 = vcmp.le.f32.partialorder %v840_v8, 0.7853982 }
  0x39   : > { %v798_v48 = vshrl.u32 %v797_v42, 30  ;;  %v898_v51 = vadd.s32 1, %v3040_v45  ;;  %vm1010_vm8 = vcmask 1042432   ;;  %vm1011_vm11 = vcmask 1043456  }
  0x3a   : > { %vm897_vm13 = vc.u32 %v3044_v47, %v3039_v44  ;;  %v896_v19 = vadd.s32 %v3039_v44, %v3044_v47  ;;  %vm828_vm12 = vweird.f32 %v2992_v4 }
  0x3b   : > { %v799_v50 = vshll.u32 %v798_v48, 30  ;;  %v899_v38 = vsel %vm897_vm13, %v898_v51, %v3040_v45  ;;  %v822_v32 = vsub.s32 4, %v798_v48 }
  0x3c   : > { %v900_v53 = vadd.s32 %v899_v38, %v895_v49 }
  0x3d   : > { %v800_v52 = vsub.s32 %v796_v34, %v799_v50  ;;  %v823_v37 = vsel %vm738_vm2, %v822_v32, %v798_v48 }
  0x3e   : > { %v901_v55 = vadd.s32 536870912, %v900_v53  ;;  %v825_v41 = vsel %vm3055_vm3, 0, %v823_v37 }
  0x3f   : > { %v802_v54 = vsub.s32 0, %v800_v52  ;;  %v829_v45 = vadd.s32 3, %v825_v41 }
  0x40   : > { %v902_v57 = vshrl.u32 %v901_v55, 30  ;;  %v2833_v55 = vmov 65535  }
  0x41   : > { %v2478_v56 = vmin.u32 %v802_v54, %v800_v52  ;;  %v830_v48 = vand.u32 3, %v829_v45 }
  0x42   : > { %v903_v59 = vshll.u32 %v902_v57, 30  ;;  %v926_v6 = vsub.s32 4, %v902_v57 }
  0x43   : > { %v804_v58 = vclz %v2478_v56  ;;  %vm832_vm6 = vcmp.eq.s32.totalorder %v830_v48, 0  ;;  %vm835_vm7 = vcmp.eq.s32.totalorder %v830_v48, 2  ;;  %vm831_vm9 = vcmp.lt.s32.totalorder %v830_v48, 2 }
  0x44   : > { %v904_v61 = vsub.s32 %v900_v53, %v903_v59  ;;  %v927_v43 = vsel %vm842_vm4, %v926_v6, %v902_v57  ;;  %v1012_v56 = vsel %vm1010_vm8, 4294967295, %v2833_v55 }
  0x45   : > { %v2479_v60 = vadd.s32 4294967294, %v804_v58  ;;  %v929_v46 = vsel %vm841_vm5, 0, %v927_v43 }
  0x46   : > { %v906_v63 = vsub.s32 0, %v904_v61  ;;  %v933_v50 = vadd.s32 3, %v929_v46 }
  0x47   : > { %vm2480_vm14 = vcmp.lt.s32.totalorder %v2479_v60, 0 }
  0x48   : > { %v807_v26 = vsel %vm2480_vm14, 0, %v2479_v60  ;;  %v2482_v7 = vmin.u32 %v906_v63, %v904_v61  ;;  %v934_v8 = vand.u32 3, %v933_v50 }
  0x49   : > { %v808_v0 = vsub.s32 32, %v807_v26  ;;  %v809_v2 = vshll.u32 %v800_v52, %v807_v26  ;;  %v812_v3 = vsub.s32 4294967266, %v807_v26  ;;  %v1013_v26 = vsel %vm1011_vm11, %v1012_v56, 0 }
  0x4a   : > { %v908_v13 = vclz %v2482_v7  ;;  %vm939_vm10 = vcmp.eq.s32.totalorder %v934_v8, 2  ;;  %vm936_vm13 = vcmp.eq.s32.totalorder %v934_v8, 0  ;;  %vm935_vm14 = vcmp.lt.s32.totalorder %v934_v8, 2 }
  0x4b   : > { %v810_v9 = vshrl.u32 %v792_v62, %v808_v0  ;;  %v813_v10 = vadd.s32 127, %v812_v3  ;;  %v735_v62 = vld [vmem:[%s3373_s0] sm:$0xf]  ;;  %v1151_v3 = vand.u32 3, %v825_v41  ;;  %v1254_v7 = vand.u32 3, %v929_v46  ;;  %s3376_s0 = sld [smem:[#allocation4_spill]] }
  0x4c   : > { %v2483_v16 = vadd.s32 4294967294, %v908_v13 }
  0x4d   : > { %v811_v14 = vor.u32 %v810_v9, %v809_v2  ;;  %v814_v15 = vshll.u32 %v813_v10, 23  ;;  %v1015_v10 = vand.u32 %v1013_v26, %v735_v62  ;;  %vm1255_vm8 = vcmp.lt.s32.totalorder %v1254_v7, 2  ;;  %v2769_v62 = vld [vmem:[%s3346_s11 + $0x8] sm:$0xff]  }
  0x4e   : > { %vm2484_vm15 = vcmp.lt.s32.totalorder %v2483_v16, 0  ;;  %v2770_v26 = vld [vmem:[%s3348_s13 + $0x8] sm:$0xff]  }
  0x4f   : > { %v815_v17 = vor.u32 4788187, %v814_v15  ;;  %v818_v18 = vcvt.s32.f32 %v811_v14  ;;  %v911_v11 = vsel %vm2484_vm15, 0, %v2483_v16  ;;  %vm932_vm15 = vweird.f32 %v2994_v5  ;;  %v730_v14 = vld [vmem:[%s719_s26] sm:$0xff]  ;;  %v731_v15 = vld [vmem:[%s719_s26 + $0x8] sm:$0xff]  ;;  %2626 = vmatpush3.bf16.msra.mxu1 %v2770_v26  ;;  %s2835_s26 = smov 112  }
  0x50   : > { %v912_v12 = vsub.s32 32, %v911_v11  ;;  %v913_v22 = vshll.u32 %v904_v61, %v911_v11  ;;  %v916_v21 = vsub.s32 4294967266, %v911_v11  ;;  %v2766_v16 = vld [vmem:[%s3375_s7 + $0x8] ss:$0 sps:$4 sm:$0x11]   ;;  %v732_v11 = vpack.c.bf16 %v731_v15, %v730_v14  ;;  %2627 = vmatprep.subr.bf16.mxu1 %v2825_v1 }
  0x51   : > { %v816_v20 = vand.u32 2147483647, %v815_v17 }
  0x52   : > { %v914_v27 = vshrl.u32 %v896_v19, %v912_v12  ;;  %v917_v28 = vadd.s32 127, %v916_v21  ;;  %v1281_v12 = vsel %vm961_vm0, %v2766_v16, 0  ;;  %vm1338_vm0 = vcmask 261120  }
  0x53   : > { %v819_v24 = vmul.f32 %v818_v18, %v816_v20 }
  0x54   : > { %v915_v25 = vor.u32 %v914_v27, %v913_v22  ;;  %v918_v31 = vshll.u32 %v917_v28, 23  ;;  %v2768_v28 = vld [vmem:[%s3375_s7] sm:$0xff]  }
  0x55   : > { %v820_v30 = vxor.u32 2147483648, %v819_v24 }
  0x56   : > { %v919_v34 = vor.u32 4788187, %v918_v31  ;;  %v922_v35 = vcvt.s32.f32 %v915_v25 }
  0x57   : > { %v821_v23 = vsel %vm738_vm2, %v820_v30, %v819_v24  ;;  %vm957_vm2 = vcmask 146432  }
  0x58   : > { %v824_v33 = vsel %vm3055_vm3, %v2992_v4, %v821_v23  ;;  %v920_v36 = vand.u32 2147483647, %v919_v34  ;;  %vm1153_vm3 = vcmp.eq.s32.totalorder %v1151_v3, 0  ;;  %v3108_v4 = vld [vmem:[%s3376_s0] sm:$0xff]  ;;  %s2838_s0 = smov 88  }
  0x59   : > { %2783 = vcosq.f32 %v824_v33 }
  0x5a   : > { %2785 = vsinq.f32 %v824_v33  ;;  %v923_v39 = vmul.f32 %v922_v35, %v920_v36 }
  0x5c   : > { %v924_v40 = vxor.u32 2147483648, %v923_v39 }
  0x5e   : > { %v925_v42 = vsel %vm842_vm4, %v924_v40, %v923_v39  ;;  %vm1156_vm4 = vcmp.eq.s32.totalorder %v1151_v3, 2  ;;  %v2500_v39 = vld [vmem:[%s3377_s1] ss:$0 sm:$0xff]  ;;  %s2834_s1 = smov 120  }
  0x5f   : > { %v928_v44 = vsel %vm841_vm5, %v2994_v5, %v925_v42  ;;  %vm1256_vm5 = vcmp.eq.s32.totalorder %v1254_v7, 0  ;;  %v1339_v5 = vsel %vm1338_vm0, %v3108_v4, 0.0 }
  0x60   : > { %2787 = vcosq.f32 %v928_v44  ;;  %1340 = vadd.xlane.f32.xlu1 %v1339_v5 }
  0x61   : > { %2789 = vsinq.f32 %v928_v44 }
  0x66   : > { %v2784_v47 = vpop.eup %2783 }
  0x67   : > { %v2786_v49 = vpop.eup %2785  ;;  %v836_v52 = vxor.u32 2147483648, %v2784_v47 }
  0x68   : > { %v833_v51 = vxor.u32 2147483648, %v2786_v49 }
  0x69   : > { %v837_v53 = vsel %vm835_vm7, %v836_v52, %v2786_v49  ;;  %vm1152_vm7 = vcmp.lt.s32.totalorder %v1151_v3, 2  ;;  %v1158_v18 = vsel %vm1156_vm4, %v836_v52, %v2786_v49 }
  0x6a   : > { %v834_v38 = vsel %vm832_vm6, %v2784_v47, %v833_v51  ;;  %vm1259_vm6 = vcmp.eq.s32.totalorder %v1254_v7, 2  ;;  %v1155_v17 = vsel %vm1153_vm3, %v2784_v47, %v833_v51 }
  0x6b   : > { %v838_v58 = vsel %vm831_vm9, %v834_v38, %v837_v53  ;;  %vm1006_vm9 = vcmask 56320   ;;  %v1159_v22 = vsel %vm1152_vm7, %v1155_v17, %v1158_v18 }
  0x6c   : > { %v839_v63 = vsel %vm828_vm12, nan, %v838_v58  ;;  %v1160_v24 = vsel %vm828_vm12, nan, %v1159_v22  ;;  %vm1601_vm12 = vcmask 130048  }
  0x6d   : > { %v2788_v54 = vpop.eup %2787 }
  0x6e   : > { %v2790_v57 = vpop.eup %2789  ;;  %v940_v59 = vxor.u32 2147483648, %v2788_v54 }
  0x6f   : > { %v937_v60 = vxor.u32 2147483648, %v2790_v57 }
  0x70   : > { %v941_v61 = vsel %vm939_vm10, %v940_v59, %v2790_v57  ;;  %v1261_v20 = vsel %vm1259_vm6, %v940_v59, %v2790_v57  ;;  %vm1553_vm10 = vcmask 64512  }
  0x71   : > { %v938_v0 = vsel %vm936_vm13, %v2788_v54, %v937_v60  ;;  %v1258_v19 = vsel %vm1256_vm5, %v2788_v54, %v937_v60 }
  0x72   : > { %v942_v2 = vsel %vm935_vm14, %v938_v0, %v941_v61  ;;  %v1262_v21 = vsel %vm1255_vm8, %v1258_v19, %v1261_v20  ;;  %v2772_v0 = vld [vmem:[%s3348_s13] sm:$0xff]  }
  0x73   : > { %v943_v9 = vsel %vm932_vm15, nan, %v942_v2  ;;  %v1263_v27 = vsel %vm932_vm15, nan, %v1262_v21  ;;  %2628 = vmatpush3.bf16.msra.mxu1 %v2772_v0  ;;  %v2507_v19 = vld [vmem:[%s3344_s9] ss:$0 sm:$0xff] }
  0x74   : > { %v944_v13 = vpack.c.bf16 %v943_v9, %v839_v63  ;;  %v1264_v29 = vpack.c.bf16 %v1263_v27, %v1160_v24  ;;  %v2771_v63 = vld [vmem:[%s3346_s11] sm:$0xff]   ;;  %2639 = vmatprep.subr.bf16.mxu1 %v2825_v1 }
  0x75   : > { %v2502_v21 = vld [vmem:[%s3343_s8] ss:$0 sm:$0xff] }
  0x76   : > { %2600 = vmatmul.mubr.msk.bf16.vlgmr.msra.gmra.mxu0 %vm957_vm2, %v944_v13 }
  0x77   : > { %2604 = vmatpush3.bf16.msra.mxu0 %v1015_v10  ;;  %2605 = vmatprep.mubr.msk.bf16.mxu0 %vm2826_vm1, %v2825_v1 }
  0x78   : > { %2609 = vmatprep.subr.bf16.mxu0 %v2825_v1 }
  0x7e   : > { %2606 = vmatmul.mubr.msk.bf16.vlgmr.msra.gmra.mxu0 %vm1006_vm9, %v732_v11  ;;  %v2501_v11 = vld [vmem:[%s3378_s6] ss:$0 sm:$0xff]  ;;  %s2836_s6 = smov 104  }
  0x7f   : > { %2610 = vmatpush3.bf16.msra.mxu0 %v1281_v12  ;;  %2613 = vmatprep.mubr.msk.bf16.mxu0 %vm2826_vm1, %v2825_v1 }
  0x80   : > { %2611 = vmatprep.subr.bf16.mxu0 %v2825_v1 }
  0x83   : > { %2612 = vmatpush3.bf16.msra.mxu0 %v2768_v28 }
  0x84   : > { %2617 = vmatprep.subr.bf16.mxu0 %v2825_v1 }
  0x86   : > { %2614 = vmatmul.mubr.msk.bf16.vlgmr.msra.gmra.mxu0 %vm957_vm2, %v1264_v29  ;;  %v2508_v29 = vld [vmem:[%s3345_s10] ss:$0 sm:$0xff] }
  0x87   : > { %2621 = vmatprep.mubr.msk.bf16.mxu0 %vm2826_vm1, %v2825_v1  ;;  %2618 = vmatpush3.bf16.msra.mxu0 %v2769_v62 }
  0x88   : > { %2619 = vmatprep.subr.bf16.mxu0 %v2825_v1 }
  0x8b   : > { %2620 = vmatpush3.bf16.msra.mxu0 %v2771_v63 }
  0x8c   : > { %2633 = vmatprep.subr.bf16.mxu0 %v2825_v1 }
  0xe9   : > { %v1341_v49 = vpop.xlane.xlu1 %1340 }
  0xea   : > { %v1343_v50 = vmul.f32 0.03125, %v1341_v49 }
  0xec   : > { %v1344_v8 = vsub.f32 %v3108_v4, %v1343_v50 }
  0xee   : > { %v1345_v56 = vmul.f32 %v1344_v8, %v1344_v8 }
  0xf0   : > { %v1346_v59 = vsel %vm1338_vm0, %v1345_v56, 0.0 }
 0x136   : > { %v999_v30 = vpop.f32.mrf.mxu0 }
 0x138   : > { %v2601_v25 = vpop.f32.mrf.mxu0 }
 0x13a   : > { %v1002_v31 = vpop.f32.mrf.mxu0 }
 0x13c   : > { %v2602_v23 = vpop.f32.mrf.mxu0 }
 0x13e   : > { %v1051_v32 = vpop.f32.mrf.mxu0 }
 0x13f   : > { %v1052_v36 = vadd.f32 %v1051_v32, %v999_v30 }
 0x140   : > { %v2607_v33 = vpop.f32.mrf.mxu0 }
 0x141   : > { %v2503_v33 = vld [vmem:[%s3347_s12] ss:$0 sm:$0xff] }
 0x142   : > { %v1054_v34 = vpop.f32.mrf.mxu0 }
 0x143   : > { %v1055_v41 = vadd.f32 %v1054_v34, %v1002_v31 }
 0x144   : > { %v2608_v35 = vpop.f32.mrf.mxu0 }
 0x146   : > { %v1317_v37 = vpop.f32.mrf.mxu0 }
 0x147   : > { %v1324_v6 = vadd.f32 %v1317_v37, %v1052_v36 }
 0x148   : > { %v2615_v40 = vpop.f32.mrf.mxu0 }
 0x149   : > { %v1333_v42 = vadd.f32 %v2500_v39, %v1324_v6  ;;  %v2509_v6 = vld [vmem:[%s3349_s14] ss:$0 sm:$0xff] }
 0x14a   : > { %v1320_v43 = vpop.f32.mrf.mxu0 }
 0x14b   : > { %v1325_v44 = vadd.f32 %v1320_v43, %v1055_v41  ;;  %v1436_v45 = vsel %vm1338_vm0, %v1333_v42, 0.0 }
 0x14c   : > { %1437 = vadd.xlane.f32.xlu0 %v1436_v45  ;;  %v2616_v46 = vpop.f32.mrf.mxu0 }
 0x14d   : > { %v1334_v47 = vadd.f32 %v2500_v39, %v1325_v44 }
 0x14f   : > { %v1439_v48 = vsel %vm1338_vm0, %v1334_v47, 0.0 }
 0x150   : > { %1440 = vadd.xlane.f32.xlu0 %v1439_v48 }
 0x1d5   : > { %v1438_v51 = vpop.xlane.xlu0 %1437 }
 0x1d6   : > { %v1442_v52 = vmul.f32 0.03125, %v1438_v51 }
 0x1d8   : > { %v1444_v38 = vsub.f32 %v1333_v42, %v1442_v52 }
 0x1d9   : > { %v1441_v53 = vpop.xlane.xlu0 %1440 }
 0x1da   : > { %v1443_v54 = vmul.f32 0.03125, %v1441_v53  ;;  %v1446_v55 = vmul.f32 %v1444_v38, %v1444_v38 }
 0x1dc   : > { %v1445_v57 = vsub.f32 %v1334_v47, %v1443_v54  ;;  %v1448_v58 = vsel %vm1338_vm0, %v1446_v55, 0.0 }
 0x1dd   : > { %1449 = vadd.xlane.f32.xlu1 %v1448_v58 }
 0x1de   : > { %v1447_v60 = vmul.f32 %v1445_v57, %v1445_v57 }
 0x1e0   : > { %v1451_v61 = vsel %vm1338_vm0, %v1447_v60, 0.0 }
 0x1e1   : > { %1347 = vadd.xlane.f32.xlu1 %v1346_v59  ;;  %1452 = vadd.xlane.f32.xlu0 %v1451_v61 }
 0x266   : > { %v1450_v2 = vpop.xlane.xlu1 %1449 }
 0x267   : > { %v1454_v3 = vmul.f32 0.03125, %v1450_v2 }
 0x269   : > { %v1456_v7 = vadd.f32 1e-05, %v1454_v3 }
 0x26a   : > { %v1348_v9 = vpop.xlane.xlu1 %1347  ;;  %v1453_v10 = vpop.xlane.xlu0 %1452 }
 0x26b   : > { %2791 = vrsqrt.f32 %v1456_v7  ;;  %v1349_v13 = vmul.f32 0.03125, %v1348_v9  ;;  %v1455_v14 = vmul.f32 0.03125, %v1453_v10 }
 0x26d   : > { %v1350_v15 = vadd.f32 1e-05, %v1349_v13  ;;  %v1457_v16 = vadd.f32 1e-05, %v1455_v14 }
 0x26f   : > { %2793 = vrsqrt.f32 %v1350_v15 }
 0x270   : > { %2795 = vrsqrt.f32 %v1457_v16 }
 0x278   : > { %v2792_v17 = vpop.eup %2791 }
 0x279   : > { %v1460_v18 = vmul.f32 %v2792_v17, %v1444_v38 }
 0x27b   : > { %v1468_v27 = vmul.f32 %v2507_v19, %v1460_v18 }
 0x27c   : > { %v2794_v20 = vpop.eup %2793 }
 0x27d   : > { %v2796_v12 = vpop.eup %2795  ;;  %v1352_v22 = vmul.f32 %v2794_v20, %v1344_v8  ;;  %v1476_v25 = vadd.f32 %v2508_v29, %v1468_v27 }
 0x27e   : > { %v1461_v24 = vmul.f32 %v2796_v12, %v1445_v57 }
 0x27f   : > { %v1359_v28 = vmul.f32 %v2501_v11, %v1352_v22 }
 0x280   : > { %v1469_v5 = vmul.f32 %v2507_v19, %v1461_v24  ;;  %v1547_v19 = vld [vmem:[%s3350_s15 + $0x4] sm:$0xf] }
 0x281   : > { %v1366_v30 = vadd.f32 %v2502_v21, %v1359_v28  ;;  %v1777_v20 = vsel %vm1011_vm11, %v1547_v19, 0  ;;  %v1546_v21 = vld [vmem:[%s3350_s15] sm:$0xf] }
 0x282   : > { %v1477_v31 = vadd.f32 %v2508_v29, %v1469_v5  ;;  %v1823_v28 = vsel %vm1011_vm11, %v1546_v21, 0 }
 0x283   : > { %v1367_v23 = vpack.c.bf16 %v1366_v30, %v1366_v30 }
 0x284   : > { %v1478_v32 = vpack.c.bf16 %v1477_v31, %v1476_v25 }
 0x285   : > { %2622 = vmatmul.mubr.msk.bf16.vlgmr.msra.gmra.mxu0 %vm1338_vm0, %v1367_v23 }
 0x286   : > { %2630 = vmatmul.mubr.msk.bf16.vlgmr.msra.gmra.mxu1 %vm1338_vm0, %v1478_v32  ;;  %2635 = vmatprep.mubr.msk.bf16.mxu0 %vm2826_vm1, %v2825_v1 }
 0x287   : > { %2641 = vmatprep.mubr.msk.bf16.mxu1 %vm2826_vm1, %v2825_v1 }
 0x345   : > { %v1428_v34 = vpop.f32.mrf.mxu0 }
 0x346   : > { %v1429_v35 = vadd.f32 %v2503_v33, %v1428_v34  ;;  %v1539_v36 = vpop.f32.mrf.mxu1 }
 0x347   : > { %v2623_v37 = vpop.f32.mrf.mxu0  ;;  %v1540_v43 = vadd.f32 %v2509_v6, %v1539_v36 }
 0x348   : > { %v3158_v39 = vpack.c.bf16 %v1429_v35, %v1429_v35  ;;  %v2631_v40 = vpop.f32.mrf.mxu1 }
 0x349   : > { %v1431_v41 = vpop.f32.mrf.mxu0 }
 0x34a   : > { %v1542_v42 = vpop.f32.mrf.mxu1  ;;  %1663 = vrot.lane.b32.xlu1 %v3158_v39, %s2834_s1 }
 0x34b   : > { %v1543_v44 = vadd.f32 %v2509_v6, %v1542_v42  ;;  %v2624_v45 = vpop.f32.mrf.mxu0 }
 0x34c   : > { %v2632_v46 = vpop.f32.mrf.mxu1 }
 0x34d   : > { %v3165_v47 = vpack.c.bf16 %v1543_v44, %v1540_v43 }
 0x34f   : > { %1665 = vrot.lane.b32.xlu0 %v3165_v47, %s2835_s26  ;;  %v1558_v48 = vsel %vm1553_vm10, %v3165_v47, 0 }
 0x350   : > { %2634 = vmatpush3.bf16.xpose.msra.mxu0 %v1558_v48 }
 0x351   : > { %2645 = vmatprep.subr.bf16.mxu0 %v2825_v1 }
 0x357   : > { %2636 = vmatmul.mubr.msk.bf16.vlgmr.msra.gmra.mxu0 %vm1553_vm10, %v3158_v39 }
 0x358   : > { %2647 = vmatprep.mubr.msk.bf16.mxu0 %vm2826_vm1, %v2825_v1 }
 0x3bc   : > { %v1664_v51 = vpop.permute.xlu1 %1663 }
 0x3c1   : > { %v1666_v49 = vpop.permute.xlu0 %1665 }
 0x3c2   : > { %v1671_v50 = vsel %vm1553_vm10, %v1666_v49, 0 }
 0x3c3   : > { %2646 = vmatpush3.bf16.xpose.msra.mxu0 %v1671_v50 }
 0x3c4   : > { %2657 = vmatprep.subr.bf16.mxu0 %v2825_v1 }
 0x3ca   : > { %2648 = vmatmul.mubr.msk.bf16.vlgmr.msra.gmra.mxu0 %vm1553_vm10, %v1664_v51 }
 0x3cb   : > { %2659 = vmatprep.mubr.msk.bf16.mxu0 %vm2826_vm1, %v2825_v1  ;;  %2658 = vmatpush3.bf16.msra.mxu0 %v1777_v20 }
 0x3cc   : > { %2669 = vmatprep.subr.bf16.mxu0 %v2825_v1 }
 0x417   : > { %v1594_v52 = vpop.f32.mrf.mxu0 }
 0x418   : > { %v1600_v8 = vmul.f32 0.35355338, %v1594_v52 }
 0x419   : > { %v2637_v38 = vpop.f32.mrf.mxu0 }
 0x41a   : > { %v1602_v53 = vsel %vm1601_vm12, %v1600_v8, -inf }
 0x41b   : > { %1603 = vmax.xlane.f32.xlu1 %v1602_v53  ;;  %v1597_v54 = vpop.f32.mrf.mxu0 }
 0x41d   : > { %v2638_v55 = vpop.f32.mrf.mxu0 }
 0x48a   : > { %v1707_v56 = vpop.f32.mrf.mxu0 }
 0x48b   : > { %v1713_v57 = vmul.f32 0.35355338, %v1707_v56 }
 0x48c   : > { %v2649_v58 = vpop.f32.mrf.mxu0 }
 0x48d   : > { %v1714_v59 = vsel %vm1601_vm12, %v1713_v57, -inf }
 0x48e   : > { %1715 = vmax.xlane.f32.xlu0 %v1714_v59  ;;  %v1710_v60 = vpop.f32.mrf.mxu0 }
 0x490   : > { %v2650_v61 = vpop.f32.mrf.mxu0 }
 0x4a4   : > { %v1604_v62 = vpop.xlane.xlu1 %1603 }
 0x4a5   : > { %v1605_v26 = vsub.f32 %v1600_v8, %v1604_v62 }
 0x4a7   : > { %v1606_v63 = vmul.f32 1.442695, %v1605_v26 }
 0x4a9   : > { %2797 = vpow2.f32 %v1606_v63 }
 0x4b6   : > { %v2798_v0 = vpop.eup %2797 }
 0x4b7   : > { %v1608_v2 = vsel %vm1601_vm12, %v2798_v0, 0.0 }
 0x4b8   : > { %1609 = vadd.xlane.f32.xlu0 %v1608_v2 }
 0x4ce   : > { %1615 = vrot.lane.b32.xlu0 %v3165_v47, %s2834_s1 }
 0x517   : > { %v1716_v3 = vpop.xlane.xlu0 %1715 }
 0x518   : > { %v1717_v7 = vsub.f32 %v1713_v57, %v1716_v3 }
 0x51a   : > { %v1718_v9 = vmul.f32 1.442695, %v1717_v7 }
 0x51c   : > { %2799 = vpow2.f32 %v1718_v9 }
 0x529   : > { %v2800_v10 = vpop.eup %2799 }
 0x52a   : > { %v1720_v13 = vsel %vm1601_vm12, %v2800_v10, 0.0 }
 0x52b   : > { %1721 = vadd.xlane.f32.xlu1 %v1720_v13 }
 0x53c   : > { %1726 = vrot.lane.b32.xlu1 %v3165_v47, %s2836_s6 }
 0x540   : > { %1867 = vrot.lane.b32.xlu1 %v3165_v47, %s2837_s27 }
 0x541   : > { %v1610_v14 = vpop.xlane.xlu0 %1609 }
 0x542   : > { %2801 = vrcp.f32 %v1610_v14 }
 0x544   : > { %1865 = vrot.lane.b32.xlu1 %v3158_v39, %s2835_s26  ;;  %s2840_s26 = smov 72  }
 0x545   : > { %v1616_v15 = vpop.permute.xlu0 %1615 }
 0x546   : > { %2640 = vmatpush3.bf16.msra.mxu1 %v1616_v15 }
 0x547   : > { %2651 = vmatprep.subr.bf16.mxu1 %v2825_v1 }
 0x54f   : > { %v2802_v16 = vpop.eup %2801 }
 0x550   : > { %v1612_v17 = vmul.f32 %v2802_v16, %v2798_v0  ;;  %v1548_v0 = vld [vmem:[%s3350_s15 + $0x8] sm:$0xf] }
 0x551   : > { %v1979_v2 = vsel %vm1011_vm11, %v1548_v0, 0 }
 0x552   : > { %v1613_v18 = vpack.c.bf16 %v1612_v17, %v1612_v17 }
 0x554   : > { %2642 = vmatmul.mubr.msk.bf16.vlgmr.msra.gmra.mxu1 %vm1601_vm12, %v1613_v18 }
 0x555   : > { %2653 = vmatprep.mubr.msk.bf16.mxu1 %vm2826_vm1, %v2825_v1 }
 0x5b4   : > { %v1722_v11 = vpop.xlane.xlu1 %1721 }
 0x5b5   : > { %2803 = vrcp.f32 %v1722_v11 }
 0x5b8   : > { %v1727_v12 = vpop.permute.xlu1 %1726 }
 0x5b9   : > { %2652 = vmatpush3.bf16.msra.mxu1 %v1727_v12 }
 0x5ba   : > { %2663 = vmatprep.subr.bf16.mxu1 %v2825_v1 }
 0x5bc   : > { %v1868_v23 = vpop.permute.xlu1 %1867 }
 0x5bd   : > { %v1873_v35 = vsel %vm1553_vm10, %v1868_v23, 0 }
 0x5c0   : > { %v1866_v6 = vpop.permute.xlu1 %1865 }
 0x5c2   : > { %v2804_v22 = vpop.eup %2803 }
 0x5c3   : > { %v1724_v24 = vmul.f32 %v2804_v22, %v2800_v10 }
 0x5c5   : > { %v1725_v27 = vpack.c.bf16 %v1724_v24, %v1724_v24 }
 0x5c7   : > { %2654 = vmatmul.mubr.msk.bf16.vlgmr.msra.gmra.mxu1 %vm1601_vm12, %v1725_v27 }
 0x5c8   : > { %2664 = vmatpush3.bf16.msra.mxu1 %v1823_v28  ;;  %2665 = vmatprep.mubr.msk.bf16.mxu1 %vm2826_vm1, %v2825_v1 }
 0x5c9   : > { %2675 = vmatprep.subr.bf16.mxu1 %v2825_v1 }
 0x614   : > { %v1655_v29 = vpop.f32.mrf.mxu1 }
 0x615   : > { %v1661_v5 = vpack.c.bf16 %v1655_v29, %v1655_v29 }
 0x616   : > { %v2643_v30 = vpop.f32.mrf.mxu1 }
 0x617   : > { %2666 = vmatmul.mubr.msk.bf16.vlgmr.msra.gmra.mxu1 %vm1553_vm10, %v1661_v5  ;;  %v1549_v5 = vld [vmem:[%s3350_s15 + $0xc] sm:$0xf] }
 0x618   : > { %v1658_v25 = vpop.f32.mrf.mxu1  ;;  %2677 = vmatprep.mubr.msk.bf16.mxu1 %vm2826_vm1, %v2825_v1  ;;  %v2136_v30 = vsel %vm1011_vm11, %v1549_v5, 0 }
 0x61a   : > { %v2644_v31 = vpop.f32.mrf.mxu1 }
 0x687   : > { %v1766_v32 = vpop.f32.mrf.mxu1 }
 0x688   : > { %v1772_v33 = vpack.c.bf16 %v1766_v32, %v1766_v32 }
 0x689   : > { %v2655_v34 = vpop.f32.mrf.mxu1 }
 0x68a   : > { %2660 = vmatmul.mubr.msk.bf16.vlgmr.msra.gmra.mxu0 %vm1553_vm10, %v1772_v33 }
 0x68b   : > { %2670 = vmatpush3.bf16.xpose.msra.mxu0 %v1873_v35  ;;  %v1769_v36 = vpop.f32.mrf.mxu1  ;;  %2671 = vmatprep.mubr.msk.bf16.mxu0 %vm2826_vm1, %v2825_v1 }
 0x68c   : > { %2681 = vmatprep.subr.bf16.mxu0 %v2825_v1 }
 0x68d   : > { %v2656_v37 = vpop.f32.mrf.mxu1 }
 0x692   : > { %2672 = vmatmul.mubr.msk.bf16.vlgmr.msra.gmra.mxu0 %vm1553_vm10, %v1866_v6 }
 0x693   : > { %2683 = vmatprep.mubr.msk.bf16.mxu0 %vm2826_vm1, %v2825_v1  ;;  %2682 = vmatpush3.bf16.msra.mxu0 %v1979_v2  ;;  %v2777_v2 = vld [vmem:[%s3356_s21 + $0x28] sm:$0xff]  }
 0x694   : > { %2693 = vmatprep.subr.bf16.mxu0 %v2825_v1 }
 0x6d7   : > { %v3221_v40 = vpop.f32.mrf.mxu1 }
 0x6d9   : > { %v2667_v41 = vpop.f32.mrf.mxu1 }
 0x6da   : > { %v2525_v41 = vld [vmem:[%s3351_s16] ss:$0 sm:$0xff] }
 0x6db   : > { %v1862_v42 = vpop.f32.mrf.mxu1 }
 0x6dd   : > { %v2668_v43 = vpop.f32.mrf.mxu1 }
 0x74a   : > { %v3223_v44 = vpop.f32.mrf.mxu0 }
 0x74b   : > { %v1860_v24 = vadd.f32 %v3221_v40, %v3223_v44 }
 0x74c   : > { %v2661_v45 = vpop.f32.mrf.mxu0 }
 0x74e   : > { %v1816_v46 = vpop.f32.mrf.mxu0 }
 0x750   : > { %v2662_v48 = vpop.f32.mrf.mxu0 }
 0x752   : > { %v1909_v49 = vpop.f32.mrf.mxu0 }
 0x753   : > { %v1915_v50 = vmul.f32 0.35355338, %v1909_v49 }
 0x754   : > { %v2673_v51 = vpop.f32.mrf.mxu0 }
 0x755   : > { %v1916_v52 = vsel %vm1601_vm12, %v1915_v50, -inf }
 0x756   : > { %1917 = vmax.xlane.f32.xlu0 %v1916_v52  ;;  %v1912_v8 = vpop.f32.mrf.mxu0 }
 0x758   : > { %v2674_v38 = vpop.f32.mrf.mxu0 }
 0x76c   : > { %1928 = vrot.lane.b32.xlu0 %v3165_v47, %s2838_s0 }
 0x770   : > { %2022 = vrot.lane.b32.xlu0 %v3158_v39, %s2836_s6 }
 0x7df   : > { %v1918_v53 = vpop.xlane.xlu0 %1917 }
 0x7e0   : > { %v1919_v54 = vsub.f32 %v1915_v50, %v1918_v53 }
 0x7e2   : > { %v1920_v55 = vmul.f32 1.442695, %v1919_v54  ;;  %v2773_v54 = vld [vmem:[%s3354_s19 + $0x8] sm:$0xff]  }
 0x7e3   : > { %v1929_v56 = vpop.permute.xlu0 %1928 }
 0x7e4   : > { %2805 = vpow2.f32 %v1920_v55  ;;  %2676 = vmatpush3.bf16.msra.mxu1 %v1929_v56  ;;  %v2775_v55 = vld [vmem:[%s3356_s21 + $0x38] sm:$0xff]   ;;  %v2776_v56 = vld [vmem:[%s3356_s21 + $0x30] sm:$0xff]  }
 0x7e5   : > { %2687 = vmatprep.subr.bf16.mxu1 %v2825_v1 }
 0x7e7   : > { %v2023_v63 = vpop.permute.xlu0 %2022 }
 0x7f1   : > { %v2806_v57 = vpop.eup %2805 }
 0x7f2   : > { %v1922_v58 = vsel %vm1601_vm12, %v2806_v57, 0.0 }
 0x7f3   : > { %1923 = vadd.xlane.f32.xlu1 %v1922_v58 }
 0x804   : > { %2024 = vrot.lane.b32.xlu1 %v3165_v47, %s2839_s24 }
 0x87c   : > { %v1924_v59 = vpop.xlane.xlu1 %1923 }
 0x87d   : > { %2807 = vrcp.f32 %v1924_v59 }
 0x880   : > { %v2025_v39 = vpop.permute.xlu1 %2024 }
 0x881   : > { %v2030_v26 = vsel %vm1553_vm10, %v2025_v39, 0 }
 0x88a   : > { %v2808_v60 = vpop.eup %2807 }
 0x88b   : > { %v1926_v61 = vmul.f32 %v2808_v60, %v2806_v57 }
 0x88d   : > { %v1927_v62 = vpack.c.bf16 %v1926_v61, %v1926_v61  ;;  %v2526_v61 = vld [vmem:[%s3352_s17] ss:$0 sm:$0xff] }
 0x88f   : > { %2678 = vmatmul.mubr.msk.bf16.vlgmr.msra.gmra.mxu1 %vm1601_vm12, %v1927_v62  ;;  %v2527_v62 = vld [vmem:[%s3353_s18] ss:$0 sm:$0xff] }
 0x890   : > { %2688 = vmatpush3.bf16.xpose.msra.mxu1 %v2030_v26  ;;  %2689 = vmatprep.mubr.msk.bf16.mxu1 %vm2826_vm1, %v2825_v1 }
 0x891   : > { %2699 = vmatprep.subr.bf16.mxu1 %v2825_v1 }
 0x897   : > { %2690 = vmatmul.mubr.msk.bf16.vlgmr.msra.gmra.mxu1 %vm1553_vm10, %v2023_v63 }
 0x898   : > { %2701 = vmatprep.mubr.msk.bf16.mxu1 %vm2826_vm1, %v2825_v1  ;;  %2700 = vmatpush3.bf16.msra.mxu1 %v2136_v30 }
 0x899   : > { %2713 = vmatprep.subr.bf16.mxu1 %v2825_v1 }
 0x94f   : > { %v1968_v3 = vpop.f32.mrf.mxu1 }
 0x950   : > { %v1974_v7 = vpack.c.bf16 %v1968_v3, %v1968_v3  ;;  %v2778_v3 = vld [vmem:[%s3356_s21 + $0x20] sm:$0xff]  }
 0x951   : > { %v2679_v9 = vpop.f32.mrf.mxu1 }
 0x952   : > { %2684 = vmatmul.mubr.msk.bf16.vlgmr.msra.gmra.mxu0 %vm1553_vm10, %v1974_v7  ;;  %v2779_v7 = vld [vmem:[%s3356_s21 + $0x18] sm:$0xff]   ;;  %v2780_v9 = vld [vmem:[%s3356_s21 + $0x10] sm:$0xff]  }
 0x953   : > { %v1971_v10 = vpop.f32.mrf.mxu1  ;;  %2695 = vmatprep.mubr.msk.bf16.mxu0 %vm2826_vm1, %v2825_v1 }
 0x954   : > { %v2781_v10 = vld [vmem:[%s3356_s21 + $0x8] sm:$0xff]  }
 0x955   : > { %v2680_v13 = vpop.f32.mrf.mxu1 }
 0x956   : > { %v2782_v13 = vld [vmem:[%s3356_s21] sm:$0xff]  }
 0x957   : > { %v2066_v14 = vpop.f32.mrf.mxu1 }
 0x958   : > { %v2072_v15 = vmul.f32 0.35355338, %v2066_v14  ;;  %v2528_v14 = vld [vmem:[%s3355_s20] ss:$0 sm:$0xff] }
 0x959   : > { %v2691_v16 = vpop.f32.mrf.mxu1 }
 0x95a   : > { %v2073_v17 = vsel %vm1601_vm12, %v2072_v15, -inf }
 0x95b   : > { %2074 = vmax.xlane.f32.xlu1 %v2073_v17  ;;  %v2069_v18 = vpop.f32.mrf.mxu1 }
 0x95d   : > { %v2692_v19 = vpop.f32.mrf.mxu1 }
 0x9e4   : > { %v2075_v20 = vpop.xlane.xlu1 %2074 }
 0x9e5   : > { %v2076_v11 = vsub.f32 %v2072_v15, %v2075_v20 }
 0x9e7   : > { %v2077_v12 = vmul.f32 1.442695, %v2076_v11 }
 0x9e9   : > { %2809 = vpow2.f32 %v2077_v12 }
 0x9f6   : > { %v2810_v22 = vpop.eup %2809 }
 0x9f7   : > { %v2079_v21 = vsel %vm1601_vm12, %v2810_v22, 0.0 }
 0x9f8   : > { %2080 = vadd.xlane.f32.xlu0 %v2079_v21 }
 0xa0e   : > { %2085 = vrot.lane.b32.xlu0 %v3165_v47, %s2840_s26  ;;  %s2476_s26 = sshll.u32 %s3380_s30, 3 }
 0xa0f   : > { %s728_s2 = scalar_lea.vmem %s3358_s23, %s2476_s26 }
 0xa12   : > { %v2015_v27 = vpop.f32.mrf.mxu0 }
 0xa13   : > { %v2021_v28 = vadd.f32 %v2015_v27, %v1860_v24  ;;  %v2532_v24 = vld [vmem:[%s3357_s22] ss:$0 sm:$0xff] }
 0xa14   : > { %v2685_v29 = vpop.f32.mrf.mxu0 }
 0xa16   : > { %v2018_v25 = vpop.f32.mrf.mxu0 }
 0xa18   : > { %v2686_v31 = vpop.f32.mrf.mxu0 }
 0xa81   : > { %v2081_v23 = vpop.xlane.xlu0 %2080 }
 0xa82   : > { %2811 = vrcp.f32 %v2081_v23 }
 0xa85   : > { %v2086_v47 = vpop.permute.xlu0 %2085 }
 0xa86   : > { %2694 = vmatpush3.bf16.msra.mxu0 %v2086_v47 }
 0xa87   : > { %2705 = vmatprep.subr.bf16.mxu0 %v2825_v1 }
 0xa8f   : > { %v2812_v32 = vpop.eup %2811 }
 0xa90   : > { %v2083_v33 = vmul.f32 %v2812_v32, %v2810_v22 }
 0xa92   : > { %v2084_v34 = vpack.c.bf16 %v2083_v33, %v2083_v33 }
 0xa94   : > { %2696 = vmatmul.mubr.msk.bf16.vlgmr.msra.gmra.mxu0 %vm1601_vm12, %v2084_v34 }
 0xa95   : > { %2709 = vmatprep.mubr.msk.bf16.mxu0 %vm2826_vm1, %v2825_v1  ;;  %2706 = vmatpush3.bf16.msra.mxu0 %v2773_v54 }
 0xa96   : > { %2707 = vmatprep.subr.bf16.mxu0 %v2825_v1 }
 0xb54   : > { %v2125_v35 = vpop.f32.mrf.mxu0 }
 0xb55   : > { %v2131_v36 = vpack.c.bf16 %v2125_v35, %v2125_v35 }
 0xb56   : > { %v2697_v37 = vpop.f32.mrf.mxu0 }
 0xb57   : > { %2702 = vmatmul.mubr.msk.bf16.vlgmr.msra.gmra.mxu1 %vm1553_vm10, %v2131_v36 }
 0xb58   : > { %v2128_v6 = vpop.f32.mrf.mxu0  ;;  %2729 = vmatprep.mubr.msk.bf16.mxu1 %vm2826_vm1, %v2825_v1  ;;  %2714 = vmatpush3.bf16.msra.mxu1 %v2775_v55 }
 0xb59   : > { %2715 = vmatprep.subr.bf16.mxu1 %v2825_v1 }
 0xb5a   : > { %v2698_v40 = vpop.f32.mrf.mxu0 }
 0xb5c   : > { %2716 = vmatpush3.bf16.msra.mxu1 %v2776_v56 }
 0xb5d   : > { %2717 = vmatprep.subr.bf16.mxu1 %v2825_v1 }
 0xb60   : > { %2718 = vmatpush3.bf16.msra.mxu1 %v2777_v2 }
 0xb61   : > { %2719 = vmatprep.subr.bf16.mxu1 %v2825_v1 }
 0xb64   : > { %2720 = vmatpush3.bf16.msra.mxu1 %v2778_v3 }
 0xb65   : > { %2721 = vmatprep.subr.bf16.mxu1 %v2825_v1 }
 0xb68   : > { %2722 = vmatpush3.bf16.msra.mxu1 %v2779_v7 }
 0xb69   : > { %2723 = vmatprep.subr.bf16.mxu1 %v2825_v1 }
 0xb6c   : > { %2724 = vmatpush3.bf16.msra.mxu1 %v2780_v9 }
 0xb6d   : > { %2725 = vmatprep.subr.bf16.mxu1 %v2825_v1 }
 0xb70   : > { %2726 = vmatpush3.bf16.msra.mxu1 %v2781_v10 }
 0xb71   : > { %2727 = vmatprep.subr.bf16.mxu1 %v2825_v1 }
 0xb74   : > { %2728 = vmatpush3.bf16.msra.mxu1 %v2782_v13 }
 0xc17   : > { %v2172_v42 = vpop.f32.mrf.mxu1 }
 0xc18   : > { %v2178_v43 = vadd.f32 %v2172_v42, %v2021_v28 }
 0xc19   : > { %v2703_v44 = vpop.f32.mrf.mxu1 }
 0xc1a   : > { %v2185_v45 = vadd.f32 %v2525_v41, %v2178_v43 }
 0xc1b   : > { %v2175_v46 = vpop.f32.mrf.mxu1 }
 0xc1c   : > { %v3269_v48 = vadd.f32 %v2185_v45, %v3108_v4  ;;  %v2774_v4 = vld [vmem:[%s3354_s19] sm:$0xff]  }
 0xc1d   : > { %v2704_v49 = vpop.f32.mrf.mxu1  ;;  %2708 = vmatpush3.bf16.msra.mxu0 %v2774_v4 }
 0xc1e   : > { %v2189_v50 = vsel %vm1338_vm0, %v3269_v48, 0.0 }
 0xc1f   : > { %2190 = vadd.xlane.f32.xlu1 %v2189_v50 }
 0xca8   : > { %v2191_v51 = vpop.xlane.xlu1 %2190 }
 0xca9   : > { %v2192_v52 = vmul.f32 0.03125, %v2191_v51 }
 0xcab   : > { %v2193_v8 = vsub.f32 %v3269_v48, %v2192_v52 }
 0xcad   : > { %v2194_v38 = vmul.f32 %v2193_v8, %v2193_v8 }
 0xcaf   : > { %v2195_v53 = vsel %vm1338_vm0, %v2194_v38, 0.0 }
 0xcb0   : > { %2196 = vadd.xlane.f32.xlu1 %v2195_v53 }
 0xd39   : > { %v2197_v57 = vpop.xlane.xlu1 %2196 }
 0xd3a   : > { %v2198_v58 = vmul.f32 0.03125, %v2197_v57 }
 0xd3c   : > { %v2199_v59 = vadd.f32 1e-05, %v2198_v58 }
 0xd3e   : > { %2813 = vrsqrt.f32 %v2199_v59 }
 0xd4b   : > { %v2814_v60 = vpop.eup %2813 }
 0xd4c   : > { %v2201_v39 = vmul.f32 %v2814_v60, %v2193_v8 }
 0xd4e   : > { %v2208_v26 = vmul.f32 %v2526_v61, %v2201_v39 }
 0xd50   : > { %v2215_v63 = vadd.f32 %v2527_v62, %v2208_v26 }
 0xd52   : > { %v2216_v0 = vpack.c.bf16 %v2215_v63, %v2215_v63 }
 0xd54   : > { %2710 = vmatmul.mubr.msk.bf16.vlgmr.msra.gmra.mxu0 %vm1338_vm0, %v2216_v0 }
 0xe14   : > { %v2277_v15 = vpop.f32.mrf.mxu0 }
 0xe15   : > { %v2278_v16 = vadd.f32 %v2528_v14, %v2277_v15 }
 0xe16   : > { %v2711_v17 = vpop.f32.mrf.mxu0 }
 0xe17   : > { %v2284_v18 = vmul.f32 0.70710677, %v2278_v16  ;;  %v2283_v12 = vmul.f32 0.5, %v2278_v16 }
 0xe18   : > { %v2280_v19 = vpop.f32.mrf.mxu0 }
 0xe19   : > { %2815 = verf.f32 %v2284_v18 }
 0xe1a   : > { %v2712_v20 = vpop.f32.mrf.mxu0 }
 0xe26   : > { %v2816_v11 = vpop.eup %2815 }
 0xe27   : > { %v2286_v1 = vadd.f32 1.0, %v2816_v11 }
 0xe29   : > { %v2287_v22 = vmul.f32 %v2286_v1, %v2283_v12 }
 0xe2b   : > { %v2288_v21 = vpack.c.bf16 %v2287_v22, %v2287_v22 }
 0xe2d   : > { %2730 = vmatmul.mubr.bf16.vlgmr.msra.gmra.mxu1 %v2288_v21 }
 0xeed   : > { %v2394_v27 = vpop.f32.mrf.mxu1 }
 0xeee   : > { %v2395_v28 = vadd.f32 %v2532_v24, %v2394_v27 }
 0xeef   : > { %v2731_v29 = vpop.f32.mrf.mxu1 }
 0xef0   : > { %v2400_v5 = vadd.f32 %v2395_v28, %v3269_v48 }
 0xef1   : > { %v2397_v30 = vpop.f32.mrf.mxu1 }
 0xef2   : > { %2401 = vst.msk [vmem:[%s728_s2] sm:$0xff] %vm1338_vm0, %v2400_v5 }
 0xef3   : > { %v2732_v25 = vpop.f32.mrf.mxu1 }
 0xef4 PF: > { %s33_s4 = sadd.s32 1, %s2823_s4  }
 0xef5   : > { %p30_p4 = scmp.ge.s32.totalorder %s33_s4, 4  }
 0xef7   :  { %32 = sbr.rel (!%p30_p4) target bundleno = 9 (0x9), region = 145 }

</bundles_post_ra>
